<compile_context>
chip_gen: v7x
topology: tpu7x:2x2x1
jax: 0.10.0
libtpu: 0.0.40
codegen_flags: <defaults>
</compile_context>

<pallas_src>
import math

import jax
import jax.numpy as jnp
from jax.experimental import pallas as pl
from jax.experimental.pallas import tpu as pltpu

# Set to jnp.bfloat16 to feed the MXU bf16 operands on v6e/v7x (adds a few e-3
# of absolute error; re-validate against the tolerance before enabling).
MXU_DTYPE = jnp.float32

HALO = 128  # lane halo on each side of the (.., HW) conv scratch slabs


def _gelu_tanh(x):
    # tanh-approximate GELU (runs on the EUP slot).
    # TODO(synk): torch default is exact erf-GELU; difference < ~3e-4 abs,
    # well inside the validation tolerance here.
    c = 0.7978845608028654  # sqrt(2/pi)
    return 0.5 * x * (1.0 + jnp.tanh(c * (x + 0.044715 * x * x * x)))


def _make_kernel(H, W, C, hidden, CH):
    HW = H * W
    C3 = 3 * C
    H2 = 2 * hidden
    # off-centre taps in the same (row-major) order the host builds the masks
    TAPS = [(ky, kx) for ky in range(3) for kx in range(3)
            if not (ky == 1 and kx == 1)]

    def norm_nc(u):
        # WithBias_LayerNorm over channels (axis 0 of (C, HW)); the affine
        # (weight, bias) is folded into the following 1x1 conv on the host.
        mu = jnp.mean(u, axis=0, keepdims=True)
        uc = u - mu
        var = jnp.mean(uc * uc, axis=0, keepdims=True)
        return uc * jax.lax.rsqrt(var + 1e-5)

    def kernel(x_ref,
               qkv_w_ref, qkv_b_ref, dwq_w_ref, dwq_b_ref, temp_ref,
               po_w_ref, po_b_ref, bias_ref,
               pin_w_ref, pin_b_ref, dwf_w_ref, dwf_b_ref,
               pout_w_ref, pout_b_ref, masks_ref,
               o_ref, qkv_scr, ffn_scr):
        x = x_ref[0]                                          # (C, HW)

        # Zero the lane halos once.  The boundary masks make their contents
        # "don't care" numerically, but uninitialised VMEM could hold NaNs.
        qkv_scr[:, 0:HALO] = jnp.zeros((C3, HALO), jnp.float32)
        qkv_scr[:, HALO + HW:] = jnp.zeros((C3, HALO), jnp.float32)
        ffn_scr[:, 0:HALO] = jnp.zeros((H2, HALO), jnp.float32)
        ffn_scr[:, HALO + HW:] = jnp.zeros((H2, HALO), jnp.float32)

        def conv1x1_dw(y, w_ref, b_ref, dww_ref, dwb_ref, scr, n_out):
            """Fused (1x1 conv + 3x3 depthwise conv), chunked over channels.

            Each chunk computes its 1x1-conv rows, stages them in the haloed
            scratch, reads the 9 lane-shifted tap windows back (static
            slices), and overwrites the staged rows with the conv output.
            """
            ym = y.astype(w_ref.dtype)

            @pl.loop(0, n_out // CH)
            def _(ci):
                c0 = pl.multiple_of(ci * CH, 8)
                z = (jnp.dot(w_ref[pl.ds(c0, CH), :], ym,
                             preferred_element_type=jnp.float32)
                     + b_ref[pl.ds(c0, CH), :])               # (CH, HW)
                scr[pl.ds(c0, CH), HALO:HALO + HW] = z
                wch = dww_ref[pl.ds(c0, CH), :]               # (CH, 9) taps
                acc = z * wch[:, 4:5] + dwb_ref[pl.ds(c0, CH), :]
                for j, (ky, kx) in enumerate(TAPS):
                    d = (ky - 1) * W + (kx - 1)
                    shifted = scr[pl.ds(c0, CH), HALO + d:HALO + d + HW]
                    acc = acc + (shifted * masks_ref[j]) * wch[:, ky * 3 + kx:
                                                               ky * 3 + kx + 1]
                scr[pl.ds(c0, CH), HALO:HALO + HW] = acc

        # ------------------------------ attention ---------------------------
        conv1x1_dw(norm_nc(x), qkv_w_ref, qkv_b_ref, dwq_w_ref, dwq_b_ref,
                   qkv_scr, C3)

        q = qkv_scr[0:C, HALO:HALO + HW]
        k = qkv_scr[C:2 * C, HALO:HALO + HW]
        # F.normalize over spatial tokens; per-head temperature folded into
        # the k scale (per-channel column, free vs. scaling the score matrix).
        qn = q * jax.lax.rsqrt(
            jnp.maximum(jnp.sum(q * q, axis=-1, keepdims=True), 1e-24))
        kscale = (jax.lax.rsqrt(
            jnp.maximum(jnp.sum(k * k, axis=-1, keepdims=True), 1e-24))
            * temp_ref[...])
        kn = k * kscale

        # All heads in one (C, C) matmul; host-precomputed block-diagonal
        # additive bias (-1e30 off-block) makes off-head entries exp to 0.
        s = jax.lax.dot_general(qn.astype(MXU_DTYPE), kn.astype(MXU_DTYPE),
                                (((1,), (1,)), ((), ())),
                                preferred_element_type=jnp.float32)
        s = s + bias_ref[...]
        s = s - jnp.max(s, axis=-1, keepdims=True)
        e = jnp.exp(s)
        attn = e * pl.reciprocal(jnp.sum(e, axis=-1, keepdims=True),
                                 approx=True)

        v = qkv_scr[2 * C:3 * C, HALO:HALO + HW]
        out_att = jnp.dot(attn.astype(MXU_DTYPE), v.astype(MXU_DTYPE),
                          preferred_element_type=jnp.float32)   # (C, HW)
        proj = (jnp.dot(po_w_ref[...], out_att.astype(po_w_ref.dtype),
                        preferred_element_type=jnp.float32) + po_b_ref[...])
        x1 = x + proj                                          # residual

        # -------------------------------- FFN --------------------------------
        conv1x1_dw(norm_nc(x1), pin_w_ref, pin_b_ref, dwf_w_ref, dwf_b_ref,
                   ffn_scr, H2)

        # Gated GELU + project_out, accumulated over hidden-chunks so the
        # (2*hidden, HW) slab never lives in vregs.
        def gate_step(hi, acc):
            h0 = pl.multiple_of(hi * CH, 8)
            g = (_gelu_tanh(ffn_scr[pl.ds(h0, CH), HALO:HALO + HW])
                 * ffn_scr[pl.ds(hidden + h0, CH), HALO:HALO + HW])
            pw = pout_w_ref[hi]                                # (C, CH)
            return acc + jnp.dot(pw, g.astype(pw.dtype),
                                 preferred_element_type=jnp.float32)

        ffn_out = jax.lax.fori_loop(0, hidden // CH, gate_step,
                                    jnp.zeros((C, HW), jnp.float32))

        o_ref[0] = (x1 + ffn_out + pout_b_ref[...]).astype(o_ref.dtype)

    return kernel


# ---------------------------------------------------------------------------
# wrapper
# ---------------------------------------------------------------------------
def transformer_block(x_nchw, params, num_heads):
    B, C, H, W = x_nchw.shape
    hidden = params['pout_w'].shape[1]
    HW = H * W
    dh = C // num_heads
    C3, H2 = 3 * C, 2 * hidden

    # channel chunk size for the fused conv loops (bounds live vregs per step)
    CH = math.gcd(math.gcd(C3, H2), hidden)
    CH = min(CH, 32)
    assert CH % 8 == 0 and C3 % CH == 0 and H2 % CH == 0 and hidden % CH == 0

    # NCHW is already channel-major: a free reshape gives the (C, HW) slabs.
    x = x_nchw.reshape(B, C, HW).astype(jnp.float32)

    f32 = lambda a: jnp.asarray(a, jnp.float32)
    col = lambda v: f32(v).reshape(-1, 1)

    # --- fold the LayerNorm affines into the following 1x1 convs (host) -----
    qkv_w, ln1w, ln1b = f32(params['qkv_w']), f32(params['ln1_w']), f32(params['ln1_b'])
    qkv_w_f = qkv_w * ln1w[None, :]
    qkv_b_f = (f32(params['qkv_b']) + qkv_w @ ln1b).reshape(-1, 1)
    pin_w, ln2w, ln2b = f32(params['pin_w']), f32(params['ln2_w']), f32(params['ln2_b'])
    pin_w_f = pin_w * ln2w[None, :]
    pin_b_f = (f32(params['pin_b']) + pin_w @ ln2b).reshape(-1, 1)

    # depthwise-conv taps, channel-major (Ch, 9): one load per channel chunk
    dwtaps = lambda w: f32(w).reshape(w.shape[0], 9)

    # per-head temperature as a per-channel column (folded into the k scale)
    temp_col = jnp.repeat(f32(params['temp']).reshape(-1), dh).reshape(C, 1)

    # block-diagonal (per-head) additive attention bias, precomputed once
    head_id = jnp.arange(C) // dh
    attn_bias = jnp.where(head_id[:, None] == head_id[None, :],
                          0.0, -1e30).astype(jnp.float32)

    # boundary masks for the 8 off-centre taps (row-major order, centre skipped)
    t = jnp.arange(HW)
    xpos, ypos = t % W, t // W
    mask_list = []
    for ky in range(3):
        for kx in range(3):
            if ky == 1 and kx == 1:
                continue
            dy, dx = ky - 1, kx - 1
            valid = ((xpos + dx >= 0) & (xpos + dx < W) &
                     (ypos + dy >= 0) & (ypos + dy < H))
            mask_list.append(valid.astype(jnp.float32).reshape(1, HW))
    masks = jnp.stack(mask_list, axis=0)                      # (8, 1, HW)

    # project_out weight pre-split into hidden-chunks: (n_hc, C, CH)
    n_hc = hidden // CH
    pout_w_chunks = f32(params['pout_w']).reshape(C, n_hc, CH).transpose(1, 0, 2)

    wdt = MXU_DTYPE
    kern_args = [
        x,
        qkv_w_f.astype(wdt), qkv_b_f, dwtaps(params['dwq_w']),
        col(params['dwq_b']), temp_col,
        f32(params['po_w']).astype(wdt), col(params['po_b']), attn_bias,
        pin_w_f.astype(wdt), pin_b_f, dwtaps(params['dwf_w']),
        col(params['dwf_b']),
        pout_w_chunks.astype(wdt), col(params['pout_b']),
        masks,
    ]

    in_specs = [pl.BlockSpec((1, C, HW), lambda b: (b, 0, 0))]
    for a in kern_args[1:]:
        in_specs.append(pl.BlockSpec(a.shape, lambda b, nd=a.ndim: (0,) * nd))

    kernel = _make_kernel(H, W, C, hidden, CH)
    out = pl.pallas_call(
        kernel,
        out_shape=jax.ShapeDtypeStruct((B, C, HW), jnp.float32),
        grid_spec=pltpu.PrefetchScalarGridSpec(
            num_scalar_prefetch=0,
            grid=(B,),
            in_specs=in_specs,
            out_specs=pl.BlockSpec((1, C, HW), lambda b: (b, 0, 0)),
            scratch_shapes=[
                pltpu.VMEM((C3, HW + 2 * HALO), jnp.float32),
                pltpu.VMEM((H2, HW + 2 * HALO), jnp.float32),
            ]),
        compiler_params=pltpu.CompilerParams(
            dimension_semantics=("parallel",)),
    )(*kern_args)
    # TODO(synk): for production sizes (H,W >= 128, dim >= 48) add an H-stripe
    # grid axis with a 1-row halo; size the stripe for v7x's 64 MiB VMEM
    # (roughly half the v6e budget), set vmem_limit_bytes explicitly and keep
    # the weight BlockSpecs at constant indices (single-buffered).
    return out.reshape(B, C, H, W)


# ---------------------------------------------------------------------------
# deterministic parameter init (torch-shaped) + pure-JAX reference
# ---------------------------------------------------------------------------
def init_params(key, dim, num_heads, ffn_expansion_factor):
    hidden = int(dim * ffn_expansion_factor)
    ks = jax.random.split(key, 18)
    def w(k, shape, scale=0.1):
        return (scale * jax.random.normal(k, shape)).astype(jnp.float32)
    return dict(
        ln1_w=jnp.ones((dim,), jnp.float32) + w(ks[0], (dim,), 0.05),
        ln1_b=w(ks[1], (dim,), 0.05),
        qkv_w=w(ks[2], (3 * dim, dim)),
        qkv_b=w(ks[3], (3 * dim,)),
        dwq_w=w(ks[4], (3 * dim, 1, 3, 3)),
        dwq_b=w(ks[5], (3 * dim,)),
        temp=jnp.ones((num_heads,), jnp.float32) + w(ks[6], (num_heads,), 0.05),
        po_w=w(ks[7], (dim, dim)),
        po_b=w(ks[8], (dim,)),
        ln2_w=jnp.ones((dim,), jnp.float32) + w(ks[9], (dim,), 0.05),
        ln2_b=w(ks[10], (dim,), 0.05),
        pin_w=w(ks[11], (2 * hidden, dim)),
        pin_b=w(ks[12], (2 * hidden,)),
        dwf_w=w(ks[13], (2 * hidden, 1, 3, 3)),
        dwf_b=w(ks[14], (2 * hidden,)),
        pout_w=w(ks[15], (dim, hidden)),
        pout_b=w(ks[16], (dim,)),
    )


def reference(x, params, num_heads):
    B, C, H, W = x.shape
    hidden = params['pout_w'].shape[1]
    dh = C // num_heads

    def ln(x4, w, b):
        x3 = jnp.transpose(x4.reshape(B, C, H * W), (0, 2, 1))
        mu = jnp.mean(x3, axis=-1, keepdims=True)
        var = jnp.mean((x3 - mu) ** 2, axis=-1, keepdims=True)
        y = (x3 - mu) / jnp.sqrt(var + 1e-5) * w + b
        return jnp.transpose(y, (0, 2, 1)).reshape(B, C, H, W)

    def conv1x1(x4, w, b):
        return jnp.einsum('bchw,oc->bohw', x4, w) + b[None, :, None, None]

    def dwconv(x4, w, b):
        y = jax.lax.conv_general_dilated(
            x4, w, (1, 1), [(1, 1), (1, 1)],
            feature_group_count=x4.shape[1],
            dimension_numbers=('NCHW', 'OIHW', 'NCHW'))
        return y + b[None, :, None, None]

    xn = ln(x, params['ln1_w'], params['ln1_b'])
    qkv = dwconv(conv1x1(xn, params['qkv_w'], params['qkv_b']),
                 params['dwq_w'], params['dwq_b'])
    q, k, v = jnp.split(qkv, 3, axis=1)
    to_h = lambda t: t.reshape(B, num_heads, dh, H * W)
    q, k, v = to_h(q), to_h(k), to_h(v)
    q = q / jnp.maximum(jnp.linalg.norm(q, axis=-1, keepdims=True), 1e-12)
    k = k / jnp.maximum(jnp.linalg.norm(k, axis=-1, keepdims=True), 1e-12)
    attn = jnp.einsum('bhcs,bhds->bhcd', q, k) * params['temp'][None, :, None, None]
    attn = jax.nn.softmax(attn, axis=-1)
    out = jnp.einsum('bhcd,bhds->bhcs', attn, v).reshape(B, C, H, W)
    x = x + conv1x1(out, params['po_w'], params['po_b'])

    xn = ln(x, params['ln2_w'], params['ln2_b'])
    u = dwconv(conv1x1(xn, params['pin_w'], params['pin_b']),
               params['dwf_w'], params['dwf_b'])
    u1, u2 = u[:, :hidden], u[:, hidden:]
    f = jax.nn.gelu(u1, approximate=False) * u2
    return x + conv1x1(f, params['pout_w'], params['pout_b'])


# ---------------------------------------------------------------------------
if __name__ == "__main__":
    B, dim, H, W = 2, 32, 16, 16
    num_heads = 4
    ffn_expansion_factor = 2

    key = jax.random.PRNGKey(0)
    kx, kp = jax.random.split(key)
    x = jax.random.normal(kx, (B, dim, H, W), jnp.float32)
    params = init_params(kp, dim, num_heads, ffn_expansion_factor)

    out = jax.block_until_ready(transformer_block(x, params, num_heads))
    ref = jax.block_until_ready(reference(x, params, num_heads))

    assert out.shape == x.shape and out.dtype == jnp.float32
    err = float(jnp.max(jnp.abs(out - ref)))
    assert err < 1e-2, f"max abs err {err}"
    print("KERNEL_OK")
</pallas_src>

<mosaic_0001>
module attributes {stable_mosaic.version = 11 : i64} {
  func.func @kernel(%arg0: i32, %arg1: memref<1x32x256xf32, #tpu.memory_space<vmem>>, %arg2: memref<96x32xf32, #tpu.memory_space<vmem>>, %arg3: memref<96x1xf32, #tpu.memory_space<vmem>>, %arg4: memref<96x9xf32, #tpu.memory_space<vmem>>, %arg5: memref<96x1xf32, #tpu.memory_space<vmem>>, %arg6: memref<32x1xf32, #tpu.memory_space<vmem>>, %arg7: memref<32x32xf32, #tpu.memory_space<vmem>>, %arg8: memref<32x1xf32, #tpu.memory_space<vmem>>, %arg9: memref<32x32xf32, #tpu.memory_space<vmem>>, %arg10: memref<128x32xf32, #tpu.memory_space<vmem>>, %arg11: memref<128x1xf32, #tpu.memory_space<vmem>>, %arg12: memref<128x9xf32, #tpu.memory_space<vmem>>, %arg13: memref<128x1xf32, #tpu.memory_space<vmem>>, %arg14: memref<2x32x32xf32, #tpu.memory_space<vmem>>, %arg15: memref<32x1xf32, #tpu.memory_space<vmem>>, %arg16: memref<8x1x256xf32, #tpu.memory_space<vmem>>, %arg17: memref<1x32x256xf32, #tpu.memory_space<vmem>>, %arg18: memref<96x512xf32, #tpu.memory_space<vmem>>, %arg19: memref<128x512xf32, #tpu.memory_space<vmem>>) attributes {dimension_semantics = [#tpu.dimension_semantics<parallel>], iteration_bounds = array<i64: 2>, scalar_prefetch = 0 : i64, scratch_operands = 2 : i64, tpu.core_type = #tpu.core_type<tc>, window_params = [{transform_indices = @transform_0, window_bounds = array<i64: 1, 32, 256>}, {pipeline_mode = #tpu.pipeline_mode<synchronous>, transform_indices = @transform_1, window_bounds = array<i64: 96, 32>}, {pipeline_mode = #tpu.pipeline_mode<synchronous>, transform_indices = @transform_2, window_bounds = array<i64: 96, 1>}, {pipeline_mode = #tpu.pipeline_mode<synchronous>, transform_indices = @transform_3, window_bounds = array<i64: 96, 9>}, {pipeline_mode = #tpu.pipeline_mode<synchronous>, transform_indices = @transform_4, window_bounds = array<i64: 96, 1>}, {pipeline_mode = #tpu.pipeline_mode<synchronous>, transform_indices = @transform_5, window_bounds = array<i64: 32, 1>}, {pipeline_mode = #tpu.pipeline_mode<synchronous>, transform_indices = @transform_6, window_bounds = array<i64: 32, 32>}, {pipeline_mode = #tpu.pipeline_mode<synchronous>, transform_indices = @transform_7, window_bounds = array<i64: 32, 1>}, {pipeline_mode = #tpu.pipeline_mode<synchronous>, transform_indices = @transform_8, window_bounds = array<i64: 32, 32>}, {pipeline_mode = #tpu.pipeline_mode<synchronous>, transform_indices = @transform_9, window_bounds = array<i64: 128, 32>}, {pipeline_mode = #tpu.pipeline_mode<synchronous>, transform_indices = @transform_10, window_bounds = array<i64: 128, 1>}, {pipeline_mode = #tpu.pipeline_mode<synchronous>, transform_indices = @transform_11, window_bounds = array<i64: 128, 9>}, {pipeline_mode = #tpu.pipeline_mode<synchronous>, transform_indices = @transform_12, window_bounds = array<i64: 128, 1>}, {pipeline_mode = #tpu.pipeline_mode<synchronous>, transform_indices = @transform_13, window_bounds = array<i64: 2, 32, 32>}, {pipeline_mode = #tpu.pipeline_mode<synchronous>, transform_indices = @transform_14, window_bounds = array<i64: 32, 1>}, {pipeline_mode = #tpu.pipeline_mode<synchronous>, transform_indices = @transform_15, window_bounds = array<i64: 8, 1, 256>}, {transform_indices = @transform_16, window_bounds = array<i64: 1, 32, 256>}]} {
    %c0 = arith.constant 0 : index
    %c0_0 = arith.constant 0 : index
    %c0_1 = arith.constant 0 : index
    %0 = vector.load %arg1[%c0, %c0_0, %c0_1] : memref<1x32x256xf32, #tpu.memory_space<vmem>>, vector<1x32x256xf32>
    %1 = vector.shape_cast %0 : vector<1x32x256xf32> to vector<32x256xf32>
    %cst = arith.constant 0.000000e+00 : f32
    %2 = vector.broadcast %cst : f32 to vector<96x128xf32>
    %c0_2 = arith.constant 0 : index
    %c0_3 = arith.constant 0 : index
    %3 = vector.load %arg18[%c0_2, %c0_3] : memref<96x512xf32, #tpu.memory_space<vmem>>, vector<96x128xf32>
    tpu.vector_store %arg18[%c0_2, %c0_3], %2 {strides = array<i32>} : memref<96x512xf32, #tpu.memory_space<vmem>>, vector<96x128xf32>,
    %cst_4 = arith.constant 0.000000e+00 : f32
    %4 = vector.broadcast %cst_4 : f32 to vector<96x128xf32>
    %c0_5 = arith.constant 0 : index
    %c384 = arith.constant 384 : index
    %5 = vector.load %arg18[%c0_5, %c384] : memref<96x512xf32, #tpu.memory_space<vmem>>, vector<96x128xf32>
    tpu.vector_store %arg18[%c0_5, %c384], %4 {strides = array<i32>} : memref<96x512xf32, #tpu.memory_space<vmem>>, vector<96x128xf32>,
    %cst_6 = arith.constant 0.000000e+00 : f32
    %6 = vector.broadcast %cst_6 : f32 to vector<128x128xf32>
    %c0_7 = arith.constant 0 : index
    %c0_8 = arith.constant 0 : index
    %7 = vector.load %arg19[%c0_7, %c0_8] : memref<128x512xf32, #tpu.memory_space<vmem>>, vector<128x128xf32>
    tpu.vector_store %arg19[%c0_7, %c0_8], %6 {strides = array<i32>} : memref<128x512xf32, #tpu.memory_space<vmem>>, vector<128x128xf32>,
    %cst_9 = arith.constant 0.000000e+00 : f32
    %8 = vector.broadcast %cst_9 : f32 to vector<128x128xf32>
    %c0_10 = arith.constant 0 : index
    %c384_11 = arith.constant 384 : index
    %9 = vector.load %arg19[%c0_10, %c384_11] : memref<128x512xf32, #tpu.memory_space<vmem>>, vector<128x128xf32>
    tpu.vector_store %arg19[%c0_10, %c384_11], %8 {strides = array<i32>} : memref<128x512xf32, #tpu.memory_space<vmem>>, vector<128x128xf32>,
    %cst_12 = arith.constant dense<0.000000e+00> : vector<256xf32>
    %10 = vector.multi_reduction <add>, %1, %cst_12 [0] : vector<32x256xf32> to vector<256xf32>
    %11 = vector.shape_cast %10 : vector<256xf32> to vector<1x256xf32>
    %cst_13 = arith.constant 3.200000e+01 : f32
    %12 = vector.broadcast %cst_13 : f32 to vector<1x256xf32>
    %13 = arith.divf %11, %12 : vector<1x256xf32>
    %14 = vector.broadcast %13 : vector<1x256xf32> to vector<32x256xf32>
    %15 = arith.subf %1, %14 : vector<32x256xf32>
    %16 = arith.mulf %15, %15 : vector<32x256xf32>
    %cst_14 = arith.constant dense<0.000000e+00> : vector<256xf32>
    %17 = vector.multi_reduction <add>, %16, %cst_14 [0] : vector<32x256xf32> to vector<256xf32>
    %18 = vector.shape_cast %17 : vector<256xf32> to vector<1x256xf32>
    %cst_15 = arith.constant 3.200000e+01 : f32
    %19 = vector.broadcast %cst_15 : f32 to vector<1x256xf32>
    %20 = arith.divf %18, %19 : vector<1x256xf32>
    %cst_16 = arith.constant 9.99999974E-6 : f32
    %21 = vector.broadcast %cst_16 : f32 to vector<1x256xf32>
    %22 = arith.addf %20, %21 : vector<1x256xf32>
    %23 = math.rsqrt %22 : vector<1x256xf32>
    %24 = vector.broadcast %23 : vector<1x256xf32> to vector<32x256xf32>
    %25 = arith.mulf %15, %24 : vector<32x256xf32>
    %c0_i32 = arith.constant 0 : i32
    %c3_i32 = arith.constant 3 : i32
    %26 = arith.addi %c0_i32, %c3_i32 : i32
    %c1_i32 = arith.constant 1 : i32
    scf.for %arg20 = %c0_i32 to %26 step %c1_i32  : i32 {
      %c1_i32_55 = arith.constant 1 : i32
      %95 = arith.muli %arg20, %c1_i32_55 : i32
      %c0_i32_56 = arith.constant 0 : i32
      %96 = arith.addi %c0_i32_56, %95 : i32
      %c32_i32 = arith.constant 32 : i32
      %97 = arith.muli %96, %c32_i32 : i32
      %98 = tpu.assume_multiple %97, 8 : i32
      %99 = arith.index_cast %98 : i32 to index
      %c0_57 = arith.constant 0 : index
      %100 = vector.load %arg2[%99, %c0_57] : memref<96x32xf32, #tpu.memory_space<vmem>>, vector<32x32xf32>
      %cst_58 = arith.constant dense<0.000000e+00> : vector<32x256xf32>
      %101 = tpu.matmul %100, %25, %cst_58 {dimension_numbers = #tpu.dot_dimension_numbers<[1], [0], [0], [1], [0, 0, 1, 1], [], []>} : vector<32x32xf32>, vector<32x256xf32>, vector<32x256xf32> -> vector<32x256xf32>
      %102 = arith.index_cast %98 : i32 to index
      %c0_59 = arith.constant 0 : index
      %103 = vector.load %arg3[%102, %c0_59] : memref<96x1xf32, #tpu.memory_space<vmem>>, vector<32x1xf32>
      %104 = vector.broadcast %103 : vector<32x1xf32> to vector<32x256xf32>
      %105 = arith.addf %101, %104 : vector<32x256xf32>
      %106 = arith.index_cast %98 : i32 to index
      %c128_60 = arith.constant 128 : index
      %107 = vector.load %arg18[%106, %c128_60] : memref<96x512xf32, #tpu.memory_space<vmem>>, vector<32x256xf32>
      tpu.vector_store %arg18[%106, %c128_60], %105 {strides = array<i32>} : memref<96x512xf32, #tpu.memory_space<vmem>>, vector<32x256xf32>,
      %108 = arith.index_cast %98 : i32 to index
      %c0_61 = arith.constant 0 : index
      %109 = vector.load %arg4[%108, %c0_61] : memref<96x9xf32, #tpu.memory_space<vmem>>, vector<32x9xf32>
      %110 = vector.extract_strided_slice %109 {offsets = [0, 4], sizes = [32, 1], strides = [1, 1]} : vector<32x9xf32> to vector<32x1xf32>
      %111 = vector.broadcast %110 : vector<32x1xf32> to vector<32x256xf32>
      %112 = arith.mulf %105, %111 : vector<32x256xf32>
      %113 = arith.index_cast %98 : i32 to index
      %c0_62 = arith.constant 0 : index
      %114 = vector.load %arg5[%113, %c0_62] : memref<96x1xf32, #tpu.memory_space<vmem>>, vector<32x1xf32>
      %115 = vector.broadcast %114 : vector<32x1xf32> to vector<32x256xf32>
      %116 = arith.addf %112, %115 : vector<32x256xf32>
      %117 = arith.index_cast %98 : i32 to index
      %c111 = arith.constant 111 : index
      %118 = vector.load %arg18[%117, %c111] : memref<96x512xf32, #tpu.memory_space<vmem>>, vector<32x256xf32>
      %c0_63 = arith.constant 0 : index
      %c0_64 = arith.constant 0 : index
      %c0_65 = arith.constant 0 : index
      %119 = vector.load %arg16[%c0_63, %c0_64, %c0_65] : memref<8x1x256xf32, #tpu.memory_space<vmem>>, vector<1x1x256xf32>
      %120 = vector.shape_cast %119 : vector<1x1x256xf32> to vector<1x256xf32>
      %121 = vector.broadcast %120 : vector<1x256xf32> to vector<32x256xf32>
      %122 = arith.mulf %118, %121 : vector<32x256xf32>
      %123 = vector.extract_strided_slice %109 {offsets = [0, 0], sizes = [32, 1], strides = [1, 1]} : vector<32x9xf32> to vector<32x1xf32>
      %124 = vector.broadcast %123 : vector<32x1xf32> to vector<32x256xf32>
      %125 = arith.mulf %122, %124 : vector<32x256xf32>
      %126 = arith.addf %116, %125 : vector<32x256xf32>
      %127 = arith.index_cast %98 : i32 to index
      %c112 = arith.constant 112 : index
      %128 = vector.load %arg18[%127, %c112] : memref<96x512xf32, #tpu.memory_space<vmem>>, vector<32x256xf32>
      %c1 = arith.constant 1 : index
      %c0_66 = arith.constant 0 : index
      %c0_67 = arith.constant 0 : index
      %129 = vector.load %arg16[%c1, %c0_66, %c0_67] : memref<8x1x256xf32, #tpu.memory_space<vmem>>, vector<1x1x256xf32>
      %130 = vector.shape_cast %129 : vector<1x1x256xf32> to vector<1x256xf32>
      %131 = vector.broadcast %130 : vector<1x256xf32> to vector<32x256xf32>
      %132 = arith.mulf %128, %131 : vector<32x256xf32>
      %133 = vector.extract_strided_slice %109 {offsets = [0, 1], sizes = [32, 1], strides = [1, 1]} : vector<32x9xf32> to vector<32x1xf32>
      %134 = vector.broadcast %133 : vector<32x1xf32> to vector<32x256xf32>
      %135 = arith.mulf %132, %134 : vector<32x256xf32>
      %136 = arith.addf %126, %135 : vector<32x256xf32>
      %137 = arith.index_cast %98 : i32 to index
      %c113 = arith.constant 113 : index
      %138 = vector.load %arg18[%137, %c113] : memref<96x512xf32, #tpu.memory_space<vmem>>, vector<32x256xf32>
      %c2 = arith.constant 2 : index
      %c0_68 = arith.constant 0 : index
      %c0_69 = arith.constant 0 : index
      %139 = vector.load %arg16[%c2, %c0_68, %c0_69] : memref<8x1x256xf32, #tpu.memory_space<vmem>>, vector<1x1x256xf32>
      %140 = vector.shape_cast %139 : vector<1x1x256xf32> to vector<1x256xf32>
      %141 = vector.broadcast %140 : vector<1x256xf32> to vector<32x256xf32>
      %142 = arith.mulf %138, %141 : vector<32x256xf32>
      %143 = vector.extract_strided_slice %109 {offsets = [0, 2], sizes = [32, 1], strides = [1, 1]} : vector<32x9xf32> to vector<32x1xf32>
      %144 = vector.broadcast %143 : vector<32x1xf32> to vector<32x256xf32>
      %145 = arith.mulf %142, %144 : vector<32x256xf32>
      %146 = arith.addf %136, %145 : vector<32x256xf32>
      %147 = arith.index_cast %98 : i32 to index
      %c127 = arith.constant 127 : index
      %148 = vector.load %arg18[%147, %c127] : memref<96x512xf32, #tpu.memory_space<vmem>>, vector<32x256xf32>
      %c3 = arith.constant 3 : index
      %c0_70 = arith.constant 0 : index
      %c0_71 = arith.constant 0 : index
      %149 = vector.load %arg16[%c3, %c0_70, %c0_71] : memref<8x1x256xf32, #tpu.memory_space<vmem>>, vector<1x1x256xf32>
      %150 = vector.shape_cast %149 : vector<1x1x256xf32> to vector<1x256xf32>
      %151 = vector.broadcast %150 : vector<1x256xf32> to vector<32x256xf32>
      %152 = arith.mulf %148, %151 : vector<32x256xf32>
      %153 = vector.extract_strided_slice %109 {offsets = [0, 3], sizes = [32, 1], strides = [1, 1]} : vector<32x9xf32> to vector<32x1xf32>
      %154 = vector.broadcast %153 : vector<32x1xf32> to vector<32x256xf32>
      %155 = arith.mulf %152, %154 : vector<32x256xf32>
      %156 = arith.addf %146, %155 : vector<32x256xf32>
      %157 = arith.index_cast %98 : i32 to index
      %c129 = arith.constant 129 : index
      %158 = vector.load %arg18[%157, %c129] : memref<96x512xf32, #tpu.memory_space<vmem>>, vector<32x256xf32>
      %c4 = arith.constant 4 : index
      %c0_72 = arith.constant 0 : index
      %c0_73 = arith.constant 0 : index
      %159 = vector.load %arg16[%c4, %c0_72, %c0_73] : memref<8x1x256xf32, #tpu.memory_space<vmem>>, vector<1x1x256xf32>
      %160 = vector.shape_cast %159 : vector<1x1x256xf32> to vector<1x256xf32>
      %161 = vector.broadcast %160 : vector<1x256xf32> to vector<32x256xf32>
      %162 = arith.mulf %158, %161 : vector<32x256xf32>
      %163 = vector.extract_strided_slice %109 {offsets = [0, 5], sizes = [32, 1], strides = [1, 1]} : vector<32x9xf32> to vector<32x1xf32>
      %164 = vector.broadcast %163 : vector<32x1xf32> to vector<32x256xf32>
      %165 = arith.mulf %162, %164 : vector<32x256xf32>
      %166 = arith.addf %156, %165 : vector<32x256xf32>
      %167 = arith.index_cast %98 : i32 to index
      %c143 = arith.constant 143 : index
      %168 = vector.load %arg18[%167, %c143] : memref<96x512xf32, #tpu.memory_space<vmem>>, vector<32x256xf32>
      %c5 = arith.constant 5 : index
      %c0_74 = arith.constant 0 : index
      %c0_75 = arith.constant 0 : index
      %169 = vector.load %arg16[%c5, %c0_74, %c0_75] : memref<8x1x256xf32, #tpu.memory_space<vmem>>, vector<1x1x256xf32>
      %170 = vector.shape_cast %169 : vector<1x1x256xf32> to vector<1x256xf32>
      %171 = vector.broadcast %170 : vector<1x256xf32> to vector<32x256xf32>
      %172 = arith.mulf %168, %171 : vector<32x256xf32>
      %173 = vector.extract_strided_slice %109 {offsets = [0, 6], sizes = [32, 1], strides = [1, 1]} : vector<32x9xf32> to vector<32x1xf32>
      %174 = vector.broadcast %173 : vector<32x1xf32> to vector<32x256xf32>
      %175 = arith.mulf %172, %174 : vector<32x256xf32>
      %176 = arith.addf %166, %175 : vector<32x256xf32>
      %177 = arith.index_cast %98 : i32 to index
      %c144 = arith.constant 144 : index
      %178 = vector.load %arg18[%177, %c144] : memref<96x512xf32, #tpu.memory_space<vmem>>, vector<32x256xf32>
      %c6 = arith.constant 6 : index
      %c0_76 = arith.constant 0 : index
      %c0_77 = arith.constant 0 : index
      %179 = vector.load %arg16[%c6, %c0_76, %c0_77] : memref<8x1x256xf32, #tpu.memory_space<vmem>>, vector<1x1x256xf32>
      %180 = vector.shape_cast %179 : vector<1x1x256xf32> to vector<1x256xf32>
      %181 = vector.broadcast %180 : vector<1x256xf32> to vector<32x256xf32>
      %182 = arith.mulf %178, %181 : vector<32x256xf32>
      %183 = vector.extract_strided_slice %109 {offsets = [0, 7], sizes = [32, 1], strides = [1, 1]} : vector<32x9xf32> to vector<32x1xf32>
      %184 = vector.broadcast %183 : vector<32x1xf32> to vector<32x256xf32>
      %185 = arith.mulf %182, %184 : vector<32x256xf32>
      %186 = arith.addf %176, %185 : vector<32x256xf32>
      %187 = arith.index_cast %98 : i32 to index
      %c145 = arith.constant 145 : index
      %188 = vector.load %arg18[%187, %c145] : memref<96x512xf32, #tpu.memory_space<vmem>>, vector<32x256xf32>
      %c7 = arith.constant 7 : index
      %c0_78 = arith.constant 0 : index
      %c0_79 = arith.constant 0 : index
      %189 = vector.load %arg16[%c7, %c0_78, %c0_79] : memref<8x1x256xf32, #tpu.memory_space<vmem>>, vector<1x1x256xf32>
      %190 = vector.shape_cast %189 : vector<1x1x256xf32> to vector<1x256xf32>
      %191 = vector.broadcast %190 : vector<1x256xf32> to vector<32x256xf32>
      %192 = arith.mulf %188, %191 : vector<32x256xf32>
      %193 = vector.extract_strided_slice %109 {offsets = [0, 8], sizes = [32, 1], strides = [1, 1]} : vector<32x9xf32> to vector<32x1xf32>
      %194 = vector.broadcast %193 : vector<32x1xf32> to vector<32x256xf32>
      %195 = arith.mulf %192, %194 : vector<32x256xf32>
      %196 = arith.addf %186, %195 : vector<32x256xf32>
      %197 = arith.index_cast %98 : i32 to index
      %c128_80 = arith.constant 128 : index
      %198 = vector.load %arg18[%197, %c128_80] : memref<96x512xf32, #tpu.memory_space<vmem>>, vector<32x256xf32>
      tpu.vector_store %arg18[%197, %c128_80], %196 {strides = array<i32>} : memref<96x512xf32, #tpu.memory_space<vmem>>, vector<32x256xf32>,
    }
    %c3_i32_17 = arith.constant 3 : i32
    %c0_18 = arith.constant 0 : index
    %c128 = arith.constant 128 : index
    %27 = vector.load %arg18[%c0_18, %c128] : memref<96x512xf32, #tpu.memory_space<vmem>>, vector<32x256xf32>
    %c32 = arith.constant 32 : index
    %c128_19 = arith.constant 128 : index
    %28 = vector.load %arg18[%c32, %c128_19] : memref<96x512xf32, #tpu.memory_space<vmem>>, vector<32x256xf32>
    %29 = arith.mulf %27, %27 : vector<32x256xf32>
    %cst_20 = arith.constant dense<0.000000e+00> : vector<32xf32>
    %30 = vector.multi_reduction <add>, %29, %cst_20 [1] : vector<32x256xf32> to vector<32xf32>
    %31 = vector.shape_cast %30 : vector<32xf32> to vector<32x1xf32>
    %cst_21 = arith.constant 1.000000e-24 : f32
    %32 = vector.broadcast %cst_21 : f32 to vector<32x1xf32>
    %33 = arith.maximumf %31, %32 : vector<32x1xf32>
    %34 = math.rsqrt %33 : vector<32x1xf32>
    %35 = vector.broadcast %34 : vector<32x1xf32> to vector<32x256xf32>
    %36 = arith.mulf %27, %35 : vector<32x256xf32>
    %37 = arith.mulf %28, %28 : vector<32x256xf32>
    %cst_22 = arith.constant dense<0.000000e+00> : vector<32xf32>
    %38 = vector.multi_reduction <add>, %37, %cst_22 [1] : vector<32x256xf32> to vector<32xf32>
    %39 = vector.shape_cast %38 : vector<32xf32> to vector<32x1xf32>
    %cst_23 = arith.constant 1.000000e-24 : f32
    %40 = vector.broadcast %cst_23 : f32 to vector<32x1xf32>
    %41 = arith.maximumf %39, %40 : vector<32x1xf32>
    %42 = math.rsqrt %41 : vector<32x1xf32>
    %c0_24 = arith.constant 0 : index
    %c0_25 = arith.constant 0 : index
    %43 = vector.load %arg6[%c0_24, %c0_25] : memref<32x1xf32, #tpu.memory_space<vmem>>, vector<32x1xf32>
    %44 = arith.mulf %42, %43 : vector<32x1xf32>
    %45 = vector.broadcast %44 : vector<32x1xf32> to vector<32x256xf32>
    %46 = arith.mulf %28, %45 : vector<32x256xf32>
    %cst_26 = arith.constant dense<0.000000e+00> : vector<32x32xf32>
    %47 = tpu.matmul %36, %46, %cst_26 {dimension_numbers = #tpu.dot_dimension_numbers<[1], [1], [0], [0], [0, 0, 1, 0], [], []>} : vector<32x256xf32>, vector<32x256xf32>, vector<32x32xf32> -> vector<32x32xf32>
    %c0_27 = arith.constant 0 : index
    %c0_28 = arith.constant 0 : index
    %48 = vector.load %arg9[%c0_27, %c0_28] : memref<32x32xf32, #tpu.memory_space<vmem>>, vector<32x32xf32>
    %49 = arith.addf %47, %48 : vector<32x32xf32>
    %cst_29 = arith.constant dense<0xFF800000> : vector<32xf32>
    %50 = vector.multi_reduction <maximumf>, %49, %cst_29 [1] : vector<32x32xf32> to vector<32xf32>
    %51 = vector.shape_cast %50 : vector<32xf32> to vector<32x1xf32>
    %52 = vector.broadcast %51 : vector<32x1xf32> to vector<32x32xf32>
    %53 = arith.subf %49, %52 : vector<32x32xf32>
    %54 = math.exp %53 : vector<32x32xf32>
    %cst_30 = arith.constant dense<0.000000e+00> : vector<32xf32>
    %55 = vector.multi_reduction <add>, %54, %cst_30 [1] : vector<32x32xf32> to vector<32xf32>
    %56 = vector.shape_cast %55 : vector<32xf32> to vector<32x1xf32>
    %57 = tpu.reciprocal %56 {approx = true} : vector<32x1xf32> -> vector<32x1xf32>
    %58 = vector.broadcast %57 : vector<32x1xf32> to vector<32x32xf32>
    %59 = arith.mulf %54, %58 : vector<32x32xf32>
    %c64 = arith.constant 64 : index
    %c128_31 = arith.constant 128 : index
    %60 = vector.load %arg18[%c64, %c128_31] : memref<96x512xf32, #tpu.memory_space<vmem>>, vector<32x256xf32>
    %cst_32 = arith.constant dense<0.000000e+00> : vector<32x256xf32>
    %61 = tpu.matmul %59, %60, %cst_32 {dimension_numbers = #tpu.dot_dimension_numbers<[1], [0], [0], [1], [0, 0, 1, 1], [], []>} : vector<32x32xf32>, vector<32x256xf32>, vector<32x256xf32> -> vector<32x256xf32>
    %c0_33 = arith.constant 0 : index
    %c0_34 = arith.constant 0 : index
    %62 = vector.load %arg7[%c0_33, %c0_34] : memref<32x32xf32, #tpu.memory_space<vmem>>, vector<32x32xf32>
    %cst_35 = arith.constant dense<0.000000e+00> : vector<32x256xf32>
    %63 = tpu.matmul %62, %61, %cst_35 {dimension_numbers = #tpu.dot_dimension_numbers<[1], [0], [0], [1], [0, 0, 1, 1], [], []>} : vector<32x32xf32>, vector<32x256xf32>, vector<32x256xf32> -> vector<32x256xf32>
    %c0_36 = arith.constant 0 : index
    %c0_37 = arith.constant 0 : index
    %64 = vector.load %arg8[%c0_36, %c0_37] : memref<32x1xf32, #tpu.memory_space<vmem>>, vector<32x1xf32>
    %65 = vector.broadcast %64 : vector<32x1xf32> to vector<32x256xf32>
    %66 = arith.addf %63, %65 : vector<32x256xf32>
    %67 = arith.addf %1, %66 : vector<32x256xf32>
    %cst_38 = arith.constant dense<0.000000e+00> : vector<256xf32>
    %68 = vector.multi_reduction <add>, %67, %cst_38 [0] : vector<32x256xf32> to vector<256xf32>
    %69 = vector.shape_cast %68 : vector<256xf32> to vector<1x256xf32>
    %cst_39 = arith.constant 3.200000e+01 : f32
    %70 = vector.broadcast %cst_39 : f32 to vector<1x256xf32>
    %71 = arith.divf %69, %70 : vector<1x256xf32>
    %72 = vector.broadcast %71 : vector<1x256xf32> to vector<32x256xf32>
    %73 = arith.subf %67, %72 : vector<32x256xf32>
    %74 = arith.mulf %73, %73 : vector<32x256xf32>
    %cst_40 = arith.constant dense<0.000000e+00> : vector<256xf32>
    %75 = vector.multi_reduction <add>, %74, %cst_40 [0] : vector<32x256xf32> to vector<256xf32>
    %76 = vector.shape_cast %75 : vector<256xf32> to vector<1x256xf32>
    %cst_41 = arith.constant 3.200000e+01 : f32
    %77 = vector.broadcast %cst_41 : f32 to vector<1x256xf32>
    %78 = arith.divf %76, %77 : vector<1x256xf32>
    %cst_42 = arith.constant 9.99999974E-6 : f32
    %79 = vector.broadcast %cst_42 : f32 to vector<1x256xf32>
    %80 = arith.addf %78, %79 : vector<1x256xf32>
    %81 = math.rsqrt %80 : vector<1x256xf32>
    %82 = vector.broadcast %81 : vector<1x256xf32> to vector<32x256xf32>
    %83 = arith.mulf %73, %82 : vector<32x256xf32>
    %c0_i32_43 = arith.constant 0 : i32
    %c4_i32 = arith.constant 4 : i32
    %84 = arith.addi %c0_i32_43, %c4_i32 : i32
    %c1_i32_44 = arith.constant 1 : i32
    scf.for %arg20 = %c0_i32_43 to %84 step %c1_i32_44  : i32 {
      %c1_i32_55 = arith.constant 1 : i32
      %95 = arith.muli %arg20, %c1_i32_55 : i32
      %c0_i32_56 = arith.constant 0 : i32
      %96 = arith.addi %c0_i32_56, %95 : i32
      %c32_i32 = arith.constant 32 : i32
      %97 = arith.muli %96, %c32_i32 : i32
      %98 = tpu.assume_multiple %97, 8 : i32
      %99 = arith.index_cast %98 : i32 to index
      %c0_57 = arith.constant 0 : index
      %100 = vector.load %arg10[%99, %c0_57] : memref<128x32xf32, #tpu.memory_space<vmem>>, vector<32x32xf32>
      %cst_58 = arith.constant dense<0.000000e+00> : vector<32x256xf32>
      %101 = tpu.matmul %100, %83, %cst_58 {dimension_numbers = #tpu.dot_dimension_numbers<[1], [0], [0], [1], [0, 0, 1, 1], [], []>} : vector<32x32xf32>, vector<32x256xf32>, vector<32x256xf32> -> vector<32x256xf32>
      %102 = arith.index_cast %98 : i32 to index
      %c0_59 = arith.constant 0 : index
      %103 = vector.load %arg11[%102, %c0_59] : memref<128x1xf32, #tpu.memory_space<vmem>>, vector<32x1xf32>
      %104 = vector.broadcast %103 : vector<32x1xf32> to vector<32x256xf32>
      %105 = arith.addf %101, %104 : vector<32x256xf32>
      %106 = arith.index_cast %98 : i32 to index
      %c128_60 = arith.constant 128 : index
      %107 = vector.load %arg19[%106, %c128_60] : memref<128x512xf32, #tpu.memory_space<vmem>>, vector<32x256xf32>
      tpu.vector_store %arg19[%106, %c128_60], %105 {strides = array<i32>} : memref<128x512xf32, #tpu.memory_space<vmem>>, vector<32x256xf32>,
      %108 = arith.index_cast %98 : i32 to index
      %c0_61 = arith.constant 0 : index
      %109 = vector.load %arg12[%108, %c0_61] : memref<128x9xf32, #tpu.memory_space<vmem>>, vector<32x9xf32>
      %110 = vector.extract_strided_slice %109 {offsets = [0, 4], sizes = [32, 1], strides = [1, 1]} : vector<32x9xf32> to vector<32x1xf32>
      %111 = vector.broadcast %110 : vector<32x1xf32> to vector<32x256xf32>
      %112 = arith.mulf %105, %111 : vector<32x256xf32>
      %113 = arith.index_cast %98 : i32 to index
      %c0_62 = arith.constant 0 : index
      %114 = vector.load %arg13[%113, %c0_62] : memref<128x1xf32, #tpu.memory_space<vmem>>, vector<32x1xf32>
      %115 = vector.broadcast %114 : vector<32x1xf32> to vector<32x256xf32>
      %116 = arith.addf %112, %115 : vector<32x256xf32>
      %117 = arith.index_cast %98 : i32 to index
      %c111 = arith.constant 111 : index
      %118 = vector.load %arg19[%117, %c111] : memref<128x512xf32, #tpu.memory_space<vmem>>, vector<32x256xf32>
      %c0_63 = arith.constant 0 : index
      %c0_64 = arith.constant 0 : index
      %c0_65 = arith.constant 0 : index
      %119 = vector.load %arg16[%c0_63, %c0_64, %c0_65] : memref<8x1x256xf32, #tpu.memory_space<vmem>>, vector<1x1x256xf32>
      %120 = vector.shape_cast %119 : vector<1x1x256xf32> to vector<1x256xf32>
      %121 = vector.broadcast %120 : vector<1x256xf32> to vector<32x256xf32>
      %122 = arith.mulf %118, %121 : vector<32x256xf32>
      %123 = vector.extract_strided_slice %109 {offsets = [0, 0], sizes = [32, 1], strides = [1, 1]} : vector<32x9xf32> to vector<32x1xf32>
      %124 = vector.broadcast %123 : vector<32x1xf32> to vector<32x256xf32>
      %125 = arith.mulf %122, %124 : vector<32x256xf32>
      %126 = arith.addf %116, %125 : vector<32x256xf32>
      %127 = arith.index_cast %98 : i32 to index
      %c112 = arith.constant 112 : index
      %128 = vector.load %arg19[%127, %c112] : memref<128x512xf32, #tpu.memory_space<vmem>>, vector<32x256xf32>
      %c1 = arith.constant 1 : index
      %c0_66 = arith.constant 0 : index
      %c0_67 = arith.constant 0 : index
      %129 = vector.load %arg16[%c1, %c0_66, %c0_67] : memref<8x1x256xf32, #tpu.memory_space<vmem>>, vector<1x1x256xf32>
      %130 = vector.shape_cast %129 : vector<1x1x256xf32> to vector<1x256xf32>
      %131 = vector.broadcast %130 : vector<1x256xf32> to vector<32x256xf32>
      %132 = arith.mulf %128, %131 : vector<32x256xf32>
      %133 = vector.extract_strided_slice %109 {offsets = [0, 1], sizes = [32, 1], strides = [1, 1]} : vector<32x9xf32> to vector<32x1xf32>
      %134 = vector.broadcast %133 : vector<32x1xf32> to vector<32x256xf32>
      %135 = arith.mulf %132, %134 : vector<32x256xf32>
      %136 = arith.addf %126, %135 : vector<32x256xf32>
      %137 = arith.index_cast %98 : i32 to index
      %c113 = arith.constant 113 : index
      %138 = vector.load %arg19[%137, %c113] : memref<128x512xf32, #tpu.memory_space<vmem>>, vector<32x256xf32>
      %c2 = arith.constant 2 : index
      %c0_68 = arith.constant 0 : index
      %c0_69 = arith.constant 0 : index
      %139 = vector.load %arg16[%c2, %c0_68, %c0_69] : memref<8x1x256xf32, #tpu.memory_space<vmem>>, vector<1x1x256xf32>
      %140 = vector.shape_cast %139 : vector<1x1x256xf32> to vector<1x256xf32>
      %141 = vector.broadcast %140 : vector<1x256xf32> to vector<32x256xf32>
      %142 = arith.mulf %138, %141 : vector<32x256xf32>
      %143 = vector.extract_strided_slice %109 {offsets = [0, 2], sizes = [32, 1], strides = [1, 1]} : vector<32x9xf32> to vector<32x1xf32>
      %144 = vector.broadcast %143 : vector<32x1xf32> to vector<32x256xf32>
      %145 = arith.mulf %142, %144 : vector<32x256xf32>
      %146 = arith.addf %136, %145 : vector<32x256xf32>
      %147 = arith.index_cast %98 : i32 to index
      %c127 = arith.constant 127 : index
      %148 = vector.load %arg19[%147, %c127] : memref<128x512xf32, #tpu.memory_space<vmem>>, vector<32x256xf32>
      %c3 = arith.constant 3 : index
      %c0_70 = arith.constant 0 : index
      %c0_71 = arith.constant 0 : index
      %149 = vector.load %arg16[%c3, %c0_70, %c0_71] : memref<8x1x256xf32, #tpu.memory_space<vmem>>, vector<1x1x256xf32>
      %150 = vector.shape_cast %149 : vector<1x1x256xf32> to vector<1x256xf32>
      %151 = vector.broadcast %150 : vector<1x256xf32> to vector<32x256xf32>
      %152 = arith.mulf %148, %151 : vector<32x256xf32>
      %153 = vector.extract_strided_slice %109 {offsets = [0, 3], sizes = [32, 1], strides = [1, 1]} : vector<32x9xf32> to vector<32x1xf32>
      %154 = vector.broadcast %153 : vector<32x1xf32> to vector<32x256xf32>
      %155 = arith.mulf %152, %154 : vector<32x256xf32>
      %156 = arith.addf %146, %155 : vector<32x256xf32>
      %157 = arith.index_cast %98 : i32 to index
      %c129 = arith.constant 129 : index
      %158 = vector.load %arg19[%157, %c129] : memref<128x512xf32, #tpu.memory_space<vmem>>, vector<32x256xf32>
      %c4 = arith.constant 4 : index
      %c0_72 = arith.constant 0 : index
      %c0_73 = arith.constant 0 : index
      %159 = vector.load %arg16[%c4, %c0_72, %c0_73] : memref<8x1x256xf32, #tpu.memory_space<vmem>>, vector<1x1x256xf32>
      %160 = vector.shape_cast %159 : vector<1x1x256xf32> to vector<1x256xf32>
      %161 = vector.broadcast %160 : vector<1x256xf32> to vector<32x256xf32>
      %162 = arith.mulf %158, %161 : vector<32x256xf32>
      %163 = vector.extract_strided_slice %109 {offsets = [0, 5], sizes = [32, 1], strides = [1, 1]} : vector<32x9xf32> to vector<32x1xf32>
      %164 = vector.broadcast %163 : vector<32x1xf32> to vector<32x256xf32>
      %165 = arith.mulf %162, %164 : vector<32x256xf32>
      %166 = arith.addf %156, %165 : vector<32x256xf32>
      %167 = arith.index_cast %98 : i32 to index
      %c143 = arith.constant 143 : index
      %168 = vector.load %arg19[%167, %c143] : memref<128x512xf32, #tpu.memory_space<vmem>>, vector<32x256xf32>
      %c5 = arith.constant 5 : index
      %c0_74 = arith.constant 0 : index
      %c0_75 = arith.constant 0 : index
      %169 = vector.load %arg16[%c5, %c0_74, %c0_75] : memref<8x1x256xf32, #tpu.memory_space<vmem>>, vector<1x1x256xf32>
      %170 = vector.shape_cast %169 : vector<1x1x256xf32> to vector<1x256xf32>
      %171 = vector.broadcast %170 : vector<1x256xf32> to vector<32x256xf32>
      %172 = arith.mulf %168, %171 : vector<32x256xf32>
      %173 = vector.extract_strided_slice %109 {offsets = [0, 6], sizes = [32, 1], strides = [1, 1]} : vector<32x9xf32> to vector<32x1xf32>
      %174 = vector.broadcast %173 : vector<32x1xf32> to vector<32x256xf32>
      %175 = arith.mulf %172, %174 : vector<32x256xf32>
      %176 = arith.addf %166, %175 : vector<32x256xf32>
      %177 = arith.index_cast %98 : i32 to index
      %c144 = arith.constant 144 : index
      %178 = vector.load %arg19[%177, %c144] : memref<128x512xf32, #tpu.memory_space<vmem>>, vector<32x256xf32>
      %c6 = arith.constant 6 : index
      %c0_76 = arith.constant 0 : index
      %c0_77 = arith.constant 0 : index
      %179 = vector.load %arg16[%c6, %c0_76, %c0_77] : memref<8x1x256xf32, #tpu.memory_space<vmem>>, vector<1x1x256xf32>
      %180 = vector.shape_cast %179 : vector<1x1x256xf32> to vector<1x256xf32>
      %181 = vector.broadcast %180 : vector<1x256xf32> to vector<32x256xf32>
      %182 = arith.mulf %178, %181 : vector<32x256xf32>
      %183 = vector.extract_strided_slice %109 {offsets = [0, 7], sizes = [32, 1], strides = [1, 1]} : vector<32x9xf32> to vector<32x1xf32>
      %184 = vector.broadcast %183 : vector<32x1xf32> to vector<32x256xf32>
      %185 = arith.mulf %182, %184 : vector<32x256xf32>
      %186 = arith.addf %176, %185 : vector<32x256xf32>
      %187 = arith.index_cast %98 : i32 to index
      %c145 = arith.constant 145 : index
      %188 = vector.load %arg19[%187, %c145] : memref<128x512xf32, #tpu.memory_space<vmem>>, vector<32x256xf32>
      %c7 = arith.constant 7 : index
      %c0_78 = arith.constant 0 : index
      %c0_79 = arith.constant 0 : index
      %189 = vector.load %arg16[%c7, %c0_78, %c0_79] : memref<8x1x256xf32, #tpu.memory_space<vmem>>, vector<1x1x256xf32>
      %190 = vector.shape_cast %189 : vector<1x1x256xf32> to vector<1x256xf32>
      %191 = vector.broadcast %190 : vector<1x256xf32> to vector<32x256xf32>
      %192 = arith.mulf %188, %191 : vector<32x256xf32>
      %193 = vector.extract_strided_slice %109 {offsets = [0, 8], sizes = [32, 1], strides = [1, 1]} : vector<32x9xf32> to vector<32x1xf32>
      %194 = vector.broadcast %193 : vector<32x1xf32> to vector<32x256xf32>
      %195 = arith.mulf %192, %194 : vector<32x256xf32>
      %196 = arith.addf %186, %195 : vector<32x256xf32>
      %197 = arith.index_cast %98 : i32 to index
      %c128_80 = arith.constant 128 : index
      %198 = vector.load %arg19[%197, %c128_80] : memref<128x512xf32, #tpu.memory_space<vmem>>, vector<32x256xf32>
      tpu.vector_store %arg19[%197, %c128_80], %196 {strides = array<i32>} : memref<128x512xf32, #tpu.memory_space<vmem>>, vector<32x256xf32>,
    }
    %c4_i32_45 = arith.constant 4 : i32
    %cst_46 = arith.constant 0.000000e+00 : f32
    %85 = vector.broadcast %cst_46 : f32 to vector<32x256xf32>
    %c0_i32_47 = arith.constant 0 : i32
    %c2_i32 = arith.constant 2 : i32
    %86 = arith.addi %c0_i32_47, %c2_i32 : i32
    %c1_i32_48 = arith.constant 1 : i32
    %87 = scf.for %arg20 = %c0_i32_47 to %86 step %c1_i32_48 iter_args(%arg21 = %85) -> (vector<32x256xf32>)  : i32 {
      %c32_i32 = arith.constant 32 : i32
      %95 = arith.muli %arg20, %c32_i32 : i32
      %96 = tpu.assume_multiple %95, 8 : i32
      %97 = arith.index_cast %96 : i32 to index
      %c128_55 = arith.constant 128 : index
      %98 = vector.load %arg19[%97, %c128_55] : memref<128x512xf32, #tpu.memory_space<vmem>>, vector<32x256xf32>
      %cst_56 = arith.constant 5.000000e-01 : f32
      %99 = vector.broadcast %cst_56 : f32 to vector<32x256xf32>
      %100 = arith.mulf %99, %98 : vector<32x256xf32>
      %cst_57 = arith.constant 4.471500e-02 : f32
      %101 = vector.broadcast %cst_57 : f32 to vector<32x256xf32>
      %102 = arith.mulf %101, %98 : vector<32x256xf32>
      %103 = arith.mulf %102, %98 : vector<32x256xf32>
      %104 = arith.mulf %103, %98 : vector<32x256xf32>
      %105 = arith.addf %98, %104 : vector<32x256xf32>
      %cst_58 = arith.constant 0.797884583 : f32
      %106 = vector.broadcast %cst_58 : f32 to vector<32x256xf32>
      %107 = arith.mulf %106, %105 : vector<32x256xf32>
      %108 = math.tanh %107 : vector<32x256xf32>
      %cst_59 = arith.constant 1.000000e+00 : f32
      %109 = vector.broadcast %cst_59 : f32 to vector<32x256xf32>
      %110 = arith.addf %109, %108 : vector<32x256xf32>
      %111 = arith.mulf %100, %110 : vector<32x256xf32>
      %c64_i32 = arith.constant 64 : i32
      %112 = arith.addi %c64_i32, %96 : i32
      %113 = arith.index_cast %112 : i32 to index
      %c128_60 = arith.constant 128 : index
      %114 = vector.load %arg19[%113, %c128_60] : memref<128x512xf32, #tpu.memory_space<vmem>>, vector<32x256xf32>
      %115 = arith.mulf %111, %114 : vector<32x256xf32>
      %116 = arith.index_cast %arg20 : i32 to index
      %c0_61 = arith.constant 0 : index
      %c0_62 = arith.constant 0 : index
      %117 = vector.load %arg14[%116, %c0_61, %c0_62] : memref<2x32x32xf32, #tpu.memory_space<vmem>>, vector<1x32x32xf32>
      %118 = vector.shape_cast %117 : vector<1x32x32xf32> to vector<32x32xf32>
      %cst_63 = arith.constant dense<0.000000e+00> : vector<32x256xf32>
      %119 = tpu.matmul %118, %115, %cst_63 {dimension_numbers = #tpu.dot_dimension_numbers<[1], [0], [0], [1], [0, 0, 1, 1], [], []>} : vector<32x32xf32>, vector<32x256xf32>, vector<32x256xf32> -> vector<32x256xf32>
      %120 = arith.addf %arg21, %119 : vector<32x256xf32>
      scf.yield %120 : vector<32x256xf32>
    }
    %c2_i32_49 = arith.constant 2 : i32
    %88 = arith.addf %67, %87 : vector<32x256xf32>
    %c0_50 = arith.constant 0 : index
    %c0_51 = arith.constant 0 : index
    %89 = vector.load %arg15[%c0_50, %c0_51] : memref<32x1xf32, #tpu.memory_space<vmem>>, vector<32x1xf32>
    %90 = vector.broadcast %89 : vector<32x1xf32> to vector<32x256xf32>
    %91 = arith.addf %88, %90 : vector<32x256xf32>
    %c0_52 = arith.constant 0 : index
    %c0_53 = arith.constant 0 : index
    %c0_54 = arith.constant 0 : index
    %92 = vector.load %arg17[%c0_52, %c0_53, %c0_54] : memref<1x32x256xf32, #tpu.memory_space<vmem>>, vector<1x32x256xf32>
    %93 = vector.shape_cast %92 : vector<1x32x256xf32> to vector<32x256xf32>
    %94 = vector.shape_cast %91 : vector<32x256xf32> to vector<1x32x256xf32>
    tpu.vector_store %arg17[%c0_52, %c0_53, %c0_54], %94 {strides = array<i32>} : memref<1x32x256xf32, #tpu.memory_space<vmem>>, vector<1x32x256xf32>,
    return
  }
  func.func @transform_0(%arg0: i32) -> (i32, i32, i32) {
    %c0_i32 = arith.constant 0 : i32
    %c0_i32_0 = arith.constant 0 : i32
    %c0_i32_1 = arith.constant 0 : i32
    return %arg0, %c0_i32, %c0_i32_0 : i32, i32, i32
  }
  func.func @transform_1(%arg0: i32) -> (i32, i32) {
    %c0_i32 = arith.constant 0 : i32
    %c0_i32_0 = arith.constant 0 : i32
    %c0_i32_1 = arith.constant 0 : i32
    return %c0_i32, %c0_i32_0 : i32, i32
  }
  func.func @transform_2(%arg0: i32) -> (i32, i32) {
    %c0_i32 = arith.constant 0 : i32
    %c0_i32_0 = arith.constant 0 : i32
    %c0_i32_1 = arith.constant 0 : i32
    return %c0_i32, %c0_i32_0 : i32, i32
  }
  func.func @transform_3(%arg0: i32) -> (i32, i32) {
    %c0_i32 = arith.constant 0 : i32
    %c0_i32_0 = arith.constant 0 : i32
    %c0_i32_1 = arith.constant 0 : i32
    return %c0_i32, %c0_i32_0 : i32, i32
  }
  func.func @transform_4(%arg0: i32) -> (i32, i32) {
    %c0_i32 = arith.constant 0 : i32
    %c0_i32_0 = arith.constant 0 : i32
    %c0_i32_1 = arith.constant 0 : i32
    return %c0_i32, %c0_i32_0 : i32, i32
  }
  func.func @transform_5(%arg0: i32) -> (i32, i32) {
    %c0_i32 = arith.constant 0 : i32
    %c0_i32_0 = arith.constant 0 : i32
    %c0_i32_1 = arith.constant 0 : i32
    return %c0_i32, %c0_i32_0 : i32, i32
  }
  func.func @transform_6(%arg0: i32) -> (i32, i32) {
    %c0_i32 = arith.constant 0 : i32
    %c0_i32_0 = arith.constant 0 : i32
    %c0_i32_1 = arith.constant 0 : i32
    return %c0_i32, %c0_i32_0 : i32, i32
  }
  func.func @transform_7(%arg0: i32) -> (i32, i32) {
    %c0_i32 = arith.constant 0 : i32
    %c0_i32_0 = arith.constant 0 : i32
    %c0_i32_1 = arith.constant 0 : i32
    return %c0_i32, %c0_i32_0 : i32, i32
  }
  func.func @transform_8(%arg0: i32) -> (i32, i32) {
    %c0_i32 = arith.constant 0 : i32
    %c0_i32_0 = arith.constant 0 : i32
    %c0_i32_1 = arith.constant 0 : i32
    return %c0_i32, %c0_i32_0 : i32, i32
  }
  func.func @transform_9(%arg0: i32) -> (i32, i32) {
    %c0_i32 = arith.constant 0 : i32
    %c0_i32_0 = arith.constant 0 : i32
    %c0_i32_1 = arith.constant 0 : i32
    return %c0_i32, %c0_i32_0 : i32, i32
  }
  func.func @transform_10(%arg0: i32) -> (i32, i32) {
    %c0_i32 = arith.constant 0 : i32
    %c0_i32_0 = arith.constant 0 : i32
    %c0_i32_1 = arith.constant 0 : i32
    return %c0_i32, %c0_i32_0 : i32, i32
  }
  func.func @transform_11(%arg0: i32) -> (i32, i32) {
    %c0_i32 = arith.constant 0 : i32
    %c0_i32_0 = arith.constant 0 : i32
    %c0_i32_1 = arith.constant 0 : i32
    return %c0_i32, %c0_i32_0 : i32, i32
  }
  func.func @transform_12(%arg0: i32) -> (i32, i32) {
    %c0_i32 = arith.constant 0 : i32
    %c0_i32_0 = arith.constant 0 : i32
    %c0_i32_1 = arith.constant 0 : i32
    return %c0_i32, %c0_i32_0 : i32, i32
  }
  func.func @transform_13(%arg0: i32) -> (i32, i32, i32) {
    %c0_i32 = arith.constant 0 : i32
    %c0_i32_0 = arith.constant 0 : i32
    %c0_i32_1 = arith.constant 0 : i32
    %c0_i32_2 = arith.constant 0 : i32
    return %c0_i32, %c0_i32_0, %c0_i32_1 : i32, i32, i32
  }
  func.func @transform_14(%arg0: i32) -> (i32, i32) {
    %c0_i32 = arith.constant 0 : i32
    %c0_i32_0 = arith.constant 0 : i32
    %c0_i32_1 = arith.constant 0 : i32
    return %c0_i32, %c0_i32_0 : i32, i32
  }
  func.func @transform_15(%arg0: i32) -> (i32, i32, i32) {
    %c0_i32 = arith.constant 0 : i32
    %c0_i32_0 = arith.constant 0 : i32
    %c0_i32_1 = arith.constant 0 : i32
    %c0_i32_2 = arith.constant 0 : i32
    return %c0_i32, %c0_i32_0, %c0_i32_1 : i32, i32, i32
  }
  func.func @transform_16(%arg0: i32) -> (i32, i32, i32) {
    %c0_i32 = arith.constant 0 : i32
    %c0_i32_0 = arith.constant 0 : i32
    %c0_i32_1 = arith.constant 0 : i32
    return %arg0, %c0_i32, %c0_i32_0 : i32, i32, i32
  }
}

</mosaic_0001>

<bundles_post_ra>
// kernel: tpu_custom_call.1
= control target key start
LH: loop header
LB: loop body
LE: loop exit
PB: predicated region body
PF: predicated region fallthrough
CT: control target
= control target key end

     0   :  { %s7036_s0 = inlined_call_operand.vmem [shape: f32[2,32,256], index: 0, kind: input, shape index: {}]   ;;  %s7037_s1 = inlined_call_operand.vmem [shape: f32[96,32], index: 1, kind: input, shape index: {}]   ;;  %s7038_s2 = inlined_call_operand.vmem [shape: f32[96,1], index: 2, kind: input, shape index: {}]   ;;  %s7039_s3 = inlined_call_operand.vmem [shape: f32[96,9], index: 3, kind: input, shape index: {}]   ;;  %s7040_s4 = inlined_call_operand.vmem [shape: f32[96,1], index: 4, kind: input, shape index: {}]   ;;  %s7041_s5 = inlined_call_operand.vmem [shape: f32[32,1], index: 5, kind: input, shape index: {}]   ;;  %s7042_s6 = inlined_call_operand.vmem [shape: f32[32,32], index: 6, kind: input, shape index: {}]   ;;  %s7043_s7 = inlined_call_operand.vmem [shape: f32[32,1], index: 7, kind: input, shape index: {}]   ;;  %s7044_s8 = inlined_call_operand.vmem [shape: f32[32,32], index: 8, kind: input, shape index: {}]   ;;  %s7045_s9 = inlined_call_operand.vmem [shape: f32[128,32], index: 9, kind: input, shape index: {}]   ;;  %s7046_s10 = inlined_call_operand.vmem [shape: f32[128,1], index: 10, kind: input, shape index: {}]   ;;  %s7047_s11 = inlined_call_operand.vmem [shape: f32[128,9], index: 11, kind: input, shape index: {}]   ;;  %s7048_s12 = inlined_call_operand.vmem [shape: f32[128,1], index: 12, kind: input, shape index: {}]   ;;  %s7049_s13 = inlined_call_operand.vmem [shape: f32[2,32,32], index: 13, kind: input, shape index: {}]   ;;  %s7050_s14 = inlined_call_operand.vmem [shape: f32[32,1], index: 14, kind: input, shape index: {}]   ;;  %s7051_s15 = inlined_call_operand.vmem [shape: f32[8,1,256], index: 15, kind: input, shape index: {}]   ;;  %s7052_s16 = inlined_call_operand.hbm [shape: f32[2,32,256], index: 16, kind: output, shape index: {}]  }
   0x1   :  { %7114 = sst [smem:[#allocation43_spill]] %s7036_s0 }
   0x2   :  { %7115 = sst [smem:[#allocation44_spill]] %s7038_s2 }
   0x3   :  { %21 = vsyncpa [#allocation5], 0 }
   0x4   :  { %23 = vsyncpa [#allocation5 + $0x1], 0  ;;  %s4731_s21 = smov 0   ;;  %s4733_s22 = smov 0  }
   0x5   :  { %s4735_s23 = smov 0   ;;  %s4737_s24 = smov 0  }
   0x6 LB: > { %7116 = sst [smem:[#allocation7_spill]] %s4554_s23  ;;  %s4752_s25 = sadd.s32 4294967295, %s4558_s24   ;;  %s4558_s24 = sphi %s4737_s24, %s7238_s24   ;;  %s4554_s23 = sphi %s4735_s23, %s7240_s23   ;;  %s4550_s22 = sphi %s4733_s22, %s7242_s22   ;;  %s4546_s21 = sphi %s4731_s21, %s7241_s21  }
   0x7   : > { %s4059_s26 = sadd.s32 4294967294, %s4558_s24   ;;  %s4756_s27 = sadd.s32 1, %s4558_s24  }
   0x8   : > { %7117 = sst [smem:[#allocation8_spill]] %s4756_s27  ;;  %s377_s28 = sadd.s32 1, %s4554_s23 }
   0x9   : > { %s374_s29 = ssub.s32 %s4558_s24, %s4756_s27  ;;  %p387_p0 = scmp.ne.s32.totalorder %s4554_s23, %s4550_s22 }
   0xa   : > { %p375_p1 = scmp.eq.s32.totalorder %s374_s29, 0  ;;  %p388_p2 = scmp.eq.s32.totalorder %s4752_s25, 1 }
   0xb   : > { %p393_p3 = scmp.ne.s32.totalorder %s4550_s22, %s4546_s21  ;;  %p394_p4 = scmp.eq.s32.totalorder %s4059_s26, 1 }
   0xc   : > { %s4767_s30 = scalar_select %p375_p1, %s4554_s23, %s377_s28  }
   0xd   : > { %p4769_p5 = por %p388_p2, %p387_p0  ;;  %p4773_p6 = por %p394_p4, %p393_p3 }
   0xe   : > { %7118 = sst [smem:[#allocation9_spill]] %s4767_s30  ;;  %p4062_p7 = scmp.ge.s32.totalorder %s4558_s24, 1 }
   0xf   : > { %p465_p8 = scmp.lt.s32.totalorder %s4558_s24, 3 }
  0x11   : > { %p466_p9 = pnand %p4062_p7, %p465_p8 }
  0x13   : > { %469 = sbr.rel (%p466_p9) target bundleno = 3207 (0xc87), region = 84 }
  0x1a   : > { %s7053_s18 = sand.u32 1, %s4550_s22   ;;  %p515_p10 = scmp.lt.s32.totalorder %s4752_s25, 1  ;;  %v7059_v0 = vmov 0.0  }
  0x1b   : > { %s4783_s19 = sshll.u32 %s7053_s18, 6  ;;  %528 = vst [vmem:[#allocation2] sm:$0xff] %v7059_v0  ;;  %529 = vst [vmem:[#allocation2 + $0x20] sm:$0xff] %v7059_v0  ;;  %s7121_s18 = sld [smem:[#allocation43_spill]] }
  0x1c   : > { %530 = vst [vmem:[#allocation2 + $0x40] sm:$0xff] %v7059_v0  ;;  %531 = vst [vmem:[#allocation2 + $0x60] sm:$0xff] %v7059_v0  ;;  %s516_s20 = scalar_select %p515_p10, %s4752_s25, 1 }
  0x1d   : > { %532 = vst [vmem:[#allocation2 + $0x80] sm:$0xff] %v7059_v0  ;;  %533 = vst [vmem:[#allocation2 + $0xa0] sm:$0xff] %v7059_v0 }
  0x1e   : > { %534 = vst [vmem:[#allocation2 + $0xc0] sm:$0xff] %v7059_v0  ;;  %535 = vst [vmem:[#allocation2 + $0xe0] sm:$0xff] %v7059_v0  ;;  %s4116_s26 = sshll.u32 %s516_s20, 6 }
  0x1f   : > { %536 = vst [vmem:[#allocation2 + $0x100] sm:$0xff] %v7059_v0  ;;  %537 = vst [vmem:[#allocation2 + $0x120] sm:$0xff] %v7059_v0 }
  0x20   : > { %538 = vst [vmem:[#allocation2 + $0x140] sm:$0xff] %v7059_v0  ;;  %539 = vst [vmem:[#allocation2 + $0x160] sm:$0xff] %v7059_v0 }
  0x21   : > { %540 = vst [vmem:[#allocation2 + $0x18] sm:$0xff] %v7059_v0  ;;  %541 = vst [vmem:[#allocation2 + $0x38] sm:$0xff] %v7059_v0  ;;  %s519_s30 = scalar_lea.vmem %s7121_s18, %s4116_s26  ;;  %s4898_s18 = smov 0  }
  0x22   : > { %542 = vst [vmem:[#allocation2 + $0x58] sm:$0xff] %v7059_v0  ;;  %543 = vst [vmem:[#allocation2 + $0x78] sm:$0xff] %v7059_v0  ;;  %v4847_v1 = vld [vmem:[%s519_s30] sm:$0xff]  ;;  %v4849_v2 = vld [vmem:[%s519_s30 + $0x8] sm:$0xff] }
  0x23   : > { %544 = vst [vmem:[#allocation2 + $0x98] sm:$0xff] %v7059_v0  ;;  %545 = vst [vmem:[#allocation2 + $0xb8] sm:$0xff] %v7059_v0  ;;  %v4851_v3 = vld [vmem:[%s519_s30 + $0x10] sm:$0xff]  ;;  %v4853_v4 = vld [vmem:[%s519_s30 + $0x18] sm:$0xff] }
  0x24   : > { %546 = vst [vmem:[#allocation2 + $0xd8] sm:$0xff] %v7059_v0  ;;  %547 = vst [vmem:[#allocation2 + $0xf8] sm:$0xff] %v7059_v0  ;;  %v4855_v5 = vld [vmem:[%s519_s30 + $0x20] sm:$0xff]  ;;  %v4857_v6 = vld [vmem:[%s519_s30 + $0x28] sm:$0xff]  ;;  %v584_v7 = vadd.f32 %v4851_v3, %v4847_v1  ;;  %v593_v9 = vadd.f32 %v4853_v4, %v4849_v2 }
  0x25   : > { %548 = vst [vmem:[#allocation2 + $0x118] sm:$0xff] %v7059_v0  ;;  %549 = vst [vmem:[#allocation2 + $0x138] sm:$0xff] %v7059_v0  ;;  %v4861_v8 = vld [vmem:[%s519_s30 + $0x30] sm:$0xff]  ;;  %v4865_v10 = vld [vmem:[%s519_s30 + $0x38] sm:$0xff]  ;;  %s4896_s30 = scalar_lea.vmem [#allocation4], %s4783_s19 }
  0x26   : > { %550 = vst [vmem:[#allocation2 + $0x158] sm:$0xff] %v7059_v0  ;;  %551 = vst [vmem:[#allocation2 + $0x178] sm:$0xff] %v7059_v0  ;;  %v585_v11 = vadd.f32 %v584_v7, %v4855_v5  ;;  %v594_v12 = vadd.f32 %v593_v9, %v4857_v6 }
  0x27   : > { %552 = vst [vmem:[#allocation3] sm:$0xff] %v7059_v0  ;;  %553 = vst [vmem:[#allocation3 + $0x20] sm:$0xff] %v7059_v0 }
  0x28   : > { %554 = vst [vmem:[#allocation3 + $0x40] sm:$0xff] %v7059_v0  ;;  %555 = vst [vmem:[#allocation3 + $0x60] sm:$0xff] %v7059_v0  ;;  %v586_v13 = vadd.f32 %v585_v11, %v4861_v8  ;;  %v595_v14 = vadd.f32 %v594_v12, %v4865_v10 }
  0x29   : > { %556 = vst [vmem:[#allocation3 + $0x80] sm:$0xff] %v7059_v0  ;;  %557 = vst [vmem:[#allocation3 + $0xa0] sm:$0xff] %v7059_v0 }
  0x2a   : > { %558 = vst [vmem:[#allocation3 + $0xc0] sm:$0xff] %v7059_v0  ;;  %559 = vst [vmem:[#allocation3 + $0xe0] sm:$0xff] %v7059_v0  ;;  %v587_v15 = vrot.slane %v586_v13, 4  ;;  %v596_v16 = vrot.slane %v595_v14, 4 }
  0x2b   : > { %560 = vst [vmem:[#allocation3 + $0x100] sm:$0xff] %v7059_v0  ;;  %561 = vst [vmem:[#allocation3 + $0x120] sm:$0xff] %v7059_v0 }
  0x2c   : > { %562 = vst [vmem:[#allocation3 + $0x140] sm:$0xff] %v7059_v0  ;;  %563 = vst [vmem:[#allocation3 + $0x160] sm:$0xff] %v7059_v0  ;;  %v588_v17 = vadd.f32 %v587_v15, %v586_v13  ;;  %v597_v18 = vadd.f32 %v596_v16, %v595_v14 }
  0x2d   : > { %564 = vst [vmem:[#allocation3 + $0x180] sm:$0xff] %v7059_v0  ;;  %565 = vst [vmem:[#allocation3 + $0x1a0] sm:$0xff] %v7059_v0 }
  0x2e   : > { %566 = vst [vmem:[#allocation3 + $0x1c0] sm:$0xff] %v7059_v0  ;;  %567 = vst [vmem:[#allocation3 + $0x1e0] sm:$0xff] %v7059_v0  ;;  %v589_v19 = vrot.slane %v588_v17, 2  ;;  %v598_v20 = vrot.slane %v597_v18, 2 }
  0x2f   : > { %568 = vst [vmem:[#allocation3 + $0x18] sm:$0xff] %v7059_v0  ;;  %569 = vst [vmem:[#allocation3 + $0x38] sm:$0xff] %v7059_v0 }
  0x30   : > { %570 = vst [vmem:[#allocation3 + $0x58] sm:$0xff] %v7059_v0  ;;  %571 = vst [vmem:[#allocation3 + $0x78] sm:$0xff] %v7059_v0  ;;  %v590_v21 = vadd.f32 %v589_v19, %v588_v17  ;;  %v599_v22 = vadd.f32 %v598_v20, %v597_v18 }
  0x31   : > { %572 = vst [vmem:[#allocation3 + $0x98] sm:$0xff] %v7059_v0  ;;  %573 = vst [vmem:[#allocation3 + $0xb8] sm:$0xff] %v7059_v0 }
  0x32   : > { %574 = vst [vmem:[#allocation3 + $0xd8] sm:$0xff] %v7059_v0  ;;  %575 = vst [vmem:[#allocation3 + $0xf8] sm:$0xff] %v7059_v0  ;;  %v591_v23 = vrot.slane %v590_v21, 1  ;;  %v600_v24 = vrot.slane %v599_v22, 1 }
  0x33   : > { %576 = vst [vmem:[#allocation3 + $0x118] sm:$0xff] %v7059_v0  ;;  %577 = vst [vmem:[#allocation3 + $0x138] sm:$0xff] %v7059_v0 }
  0x34   : > { %578 = vst [vmem:[#allocation3 + $0x158] sm:$0xff] %v7059_v0  ;;  %579 = vst [vmem:[#allocation3 + $0x178] sm:$0xff] %v7059_v0  ;;  %v592_v25 = vadd.f32 %v591_v23, %v590_v21  ;;  %v601_v26 = vadd.f32 %v600_v24, %v599_v22 }
  0x35   : > { %580 = vst [vmem:[#allocation3 + $0x198] sm:$0xff] %v7059_v0  ;;  %581 = vst [vmem:[#allocation3 + $0x1b8] sm:$0xff] %v7059_v0 }
  0x36   : > { %582 = vst [vmem:[#allocation3 + $0x1d8] sm:$0xff] %v7059_v0  ;;  %583 = vst [vmem:[#allocation3 + $0x1f8] sm:$0xff] %v7059_v0  ;;  %v603_v27 = vmul.f32 0.03125, %v592_v25  ;;  %v604_v28 = vmul.f32 0.03125, %v601_v26 }
  0x37   : > { %7122 = vst [vmem:[#allocation10_spill] sm:$0xff] %v4847_v1  ;;  %7123 = vst [vmem:[#allocation11_spill] sm:$0xff] %v4849_v2 }
  0x38   : > { %7124 = vst [vmem:[#allocation12_spill] sm:$0xff] %v4851_v3  ;;  %7125 = vst [vmem:[#allocation13_spill] sm:$0xff] %v4853_v4  ;;  %v605_v29 = vsub.f32 %v4847_v1, %v603_v27  ;;  %v607_v30 = vsub.f32 %v4851_v3, %v603_v27  ;;  %v609_v31 = vsub.f32 %v4855_v5, %v603_v27 }
  0x39   : > { %7126 = vst [vmem:[#allocation14_spill] sm:$0xff] %v4855_v5  ;;  %7127 = vst [vmem:[#allocation15_spill] sm:$0xff] %v4857_v6  ;;  %v611_v32 = vsub.f32 %v4861_v8, %v603_v27  ;;  %v606_v33 = vsub.f32 %v4849_v2, %v604_v28  ;;  %v608_v34 = vsub.f32 %v4853_v4, %v604_v28 }
  0x3a   : > { %7128 = vst [vmem:[#allocation16_spill] sm:$0xff] %v4861_v8  ;;  %7129 = vst [vmem:[#allocation17_spill] sm:$0xff] %v4865_v10  ;;  %v610_v35 = vsub.f32 %v4857_v6, %v604_v28  ;;  %v612_v36 = vsub.f32 %v4865_v10, %v604_v28  ;;  %v613_v37 = vmul.f32 %v605_v29, %v605_v29 }
  0x3b   : > { %v615_v38 = vmul.f32 %v607_v30, %v607_v30  ;;  %v617_v39 = vmul.f32 %v609_v31, %v609_v31  ;;  %v614_v40 = vmul.f32 %v606_v33, %v606_v33  ;;  %v616_v41 = vmul.f32 %v608_v34, %v608_v34 }
  0x3c   : > { %v618_v42 = vmul.f32 %v610_v35, %v610_v35  ;;  %v619_v43 = vmul.f32 %v611_v32, %v611_v32  ;;  %v620_v45 = vmul.f32 %v612_v36, %v612_v36 }
  0x3d   : > { %v621_v44 = vadd.f32 %v615_v38, %v613_v37  ;;  %v630_v46 = vadd.f32 %v616_v41, %v614_v40 }
  0x3f   : > { %v622_v47 = vadd.f32 %v621_v44, %v617_v39  ;;  %v631_v48 = vadd.f32 %v630_v46, %v618_v42 }
  0x41   : > { %v623_v49 = vadd.f32 %v622_v47, %v619_v43  ;;  %v632_v50 = vadd.f32 %v631_v48, %v620_v45 }
  0x43   : > { %v624_v51 = vrot.slane %v623_v49, 4  ;;  %v633_v52 = vrot.slane %v632_v50, 4 }
  0x45   : > { %v625_v53 = vadd.f32 %v624_v51, %v623_v49  ;;  %v634_v54 = vadd.f32 %v633_v52, %v632_v50 }
  0x47   : > { %v626_v55 = vrot.slane %v625_v53, 2  ;;  %v635_v56 = vrot.slane %v634_v54, 2 }
  0x49   : > { %v627_v57 = vadd.f32 %v626_v55, %v625_v53  ;;  %v636_v58 = vadd.f32 %v635_v56, %v634_v54 }
  0x4b   : > { %v628_v59 = vrot.slane %v627_v57, 1  ;;  %v637_v60 = vrot.slane %v636_v58, 1 }
  0x4d   : > { %v629_v61 = vadd.f32 %v628_v59, %v627_v57  ;;  %v638_v62 = vadd.f32 %v637_v60, %v636_v58 }
  0x4f   : > { %v639_v63 = vmul.f32 0.03125, %v629_v61  ;;  %v640_v7 = vmul.f32 0.03125, %v638_v62 }
  0x51   : > { %v641_v9 = vadd.f32 1e-05, %v639_v63  ;;  %v642_v11 = vadd.f32 1e-05, %v640_v7 }
  0x53   : > { %4354 = vrsqrt.f32 %v641_v9 }
  0x54   : > { %4356 = vrsqrt.f32 %v642_v11 }
  0x5d   : > { %v4355_v12 = vpop.eup %4354 }
  0x5e   : > { %v4357_v13 = vpop.eup %4356  ;;  %v4879_v14 = vmul.f32 %v4355_v12, %v605_v29  ;;  %v4881_v15 = vmul.f32 %v4355_v12, %v607_v30  ;;  %v4883_v16 = vmul.f32 %v4355_v12, %v609_v31  ;;  %v4885_v17 = vmul.f32 %v4355_v12, %v611_v32 }
  0x5f   : > { %v4887_v18 = vmul.f32 %v4357_v13, %v606_v33  ;;  %v4889_v19 = vmul.f32 %v4357_v13, %v608_v34  ;;  %v4891_v20 = vmul.f32 %v4357_v13, %v610_v35  ;;  %v4893_v21 = vmul.f32 %v4357_v13, %v612_v36 }
  0x60   : > { %7130 = vst [vmem:[#allocation18_spill] sm:$0xff] %v4879_v14  ;;  %7131 = vst [vmem:[#allocation19_spill] sm:$0xff] %v4881_v15 }
  0x61   : > { %7132 = vst [vmem:[#allocation20_spill] sm:$0xff] %v4883_v16  ;;  %7133 = vst [vmem:[#allocation21_spill] sm:$0xff] %v4885_v17 }
  0x62   : > { %7134 = vst [vmem:[#allocation22_spill] sm:$0xff] %v4887_v18  ;;  %7135 = vst [vmem:[#allocation23_spill] sm:$0xff] %v4889_v19 }
  0x63   : > { %7136 = vst [vmem:[#allocation24_spill] sm:$0xff] %v4891_v20  ;;  %7137 = vst [vmem:[#allocation25_spill] sm:$0xff] %v4893_v21 }
  0x64 LB: >> { %v4605_v24 = vmov 0   ;;  %v4606_v25 = vmov 4   ;;  %s4910_s19 = sshll.u32 %s4562_s18, 5  ;;  %s7144_s2 = sld [smem:[#allocation44_spill]]  ;;  %v4607_v30 = vmov 0.0   ;;  %vm690_vm0 = vcmask 261120   ;;  %s4562_s18 = sphi %s4898_s18, %s658_s18  }
  0x65   : >> { %4358 = vset.pattern.permute.xlu1 %v4605_v24  ;;  %4359 = vset.pattern.permute.xlu0 %v4606_v25  ;;  %s4925_s27 = scalar_lea.vmem %s7039_s3, %s4910_s19  ;;  %v885_v38 = vlaneseq  ;;  %s838_s20 = scalar_lea.vmem %s7040_s4, %s4910_s19  ;;  %v883_v46 = vld [vmem:[%s7051_s15] sm:$0x3]  ;;  %v4073_v52 = vld [vmem:[%s7051_s15 + $0x2] sm:$0x3]  ;;  %v4610_v54 = vmov 1   ;;  %v4612_v58 = vmov 2  }
  0x66   : >> { %v4928_v29 = vld [vmem:[%s4925_s27] sm:$0xff]  ;;  %767 = vmatprep.mubr.f32.mxu0 %v4607_v30  ;;  %779 = vmatprep.mubr.f32.mxu1 %v4607_v30  ;;  %v4937_v32 = vld [vmem:[%s4925_s27 + $0x18] sm:$0xff]  ;;  %v4943_v35 = vld [vmem:[%s4925_s27 + $0x8] sm:$0xff]  ;;  %s7069_s29 = smov 112   ;;  %s7071_s26 = smov 113   ;;  %v4614_v62 = vmov 3  }
  0x67   : >> { %v7140_v14 = vld [vmem:[#allocation18_spill] sm:$0xff]  ;;  %v7141_v15 = vld [vmem:[#allocation19_spill] sm:$0xff]  ;;  %812 = vperm.xlu0 %4359, %v4928_v29   ;;  %v4950_v40 = vld [vmem:[%s4925_s27 + $0x10] sm:$0xff]  ;;  %v886_v41 = vshrl.u32 %v885_v38, 7  ;;  %s7057_s27 = smov 111   ;;  %s4615_s23 = smov 1  }
  0x68   : >> { %v4124_v23 = vpack.c.bf16 %v7141_v15, %v7140_v14  ;;  %v7145_v16 = vld [vmem:[#allocation20_spill] sm:$0xff]  ;;  %v7146_v17 = vld [vmem:[#allocation21_spill] sm:$0xff]  ;;  %v839_v43 = vld [vmem:[%s838_s20] sm:$0xff]  ;;  %v4616_v11 = vmov 5   ;;  %v4617_v13 = vmov 6   ;;  %vm1018_vm1 = vcmask 916480  }
  0x69   : >> { %v7138_v18 = vld [vmem:[#allocation22_spill] sm:$0xff]  ;;  %v7139_v19 = vld [vmem:[#allocation23_spill] sm:$0xff]  ;;  %v4128_v27 = vpack.c.bf16 %v7146_v17, %v7145_v16  ;;  %v4958_v44 = vsub.s32 0, %v886_v41  ;;  %v841_v47 = vld [vmem:[%s838_s20 + $0x10] sm:$0xff]  ;;  %v4964_v49 = vsub.s32 1, %v886_v41  ;;  %vm1260_vm2 = vcmask 1039360  }
  0x6a   : >> { %v4122_v22 = vpack.c.bf16 %v7139_v19, %v7138_v18  ;;  %v7142_v20 = vld [vmem:[#allocation24_spill] sm:$0xff]  ;;  %v7143_v21 = vld [vmem:[#allocation25_spill] sm:$0xff]  ;;  %s4916_s28 = scalar_lea.vmem %s7144_s2, %s4910_s19  ;;  %s660_s2 = scalar_lea.vmem %s7037_s1, %s4910_s19  ;;  %v840_v45 = vld [vmem:[%s838_s20 + $0x8] sm:$0xff]  ;;  %vm897_vm3 = vcmask 908288   ;;  %vm1139_vm4 = vcmask 924672   ;;  %vm1341_vm5 = vcmask 7168  }
  0x6b   : >> { %v4126_v26 = vpack.c.bf16 %v7143_v21, %v7142_v20  ;;  %v668_v28 = vld [vmem:[%s4916_s28 + $0x10] sm:$0xff]  ;;  %v669_v31 = vld [vmem:[%s4916_s28 + $0x18] sm:$0xff]  ;;  %v661_v33 = vld [vmem:[%s660_s2] sm:$0xff]  ;;  %827 = vperm.xlu0 %4359, %v4937_v32   ;;  %7147 = vst [vmem:[#allocation26_spill] sm:$0xff] %v4958_v44  ;;  %v888_v48 = vrot.slane %v883_v46, %v4958_v44  ;;  %v892_v51 = vrot.slane %v883_v46, %v4964_v49  ;;  %vm1220_vm6 = vcmask 121856   ;;  %s658_s18 = sadd.s32 1, %s4562_s18  }
  0x6c   : >> { %4123 = vmatprep.subr.bf16.mxu0 %v4122_v22  ;;  %4170 = vmatprep.subr.bf16.mxu1 %v4122_v22  ;;  %v663_v34 = vld [vmem:[%s660_s2 + $0x10] sm:$0xff]  ;;  %v662_v36 = vld [vmem:[%s660_s2 + $0x8] sm:$0xff]  ;;  %v664_v37 = vld [vmem:[%s660_s2 + $0x18] sm:$0xff]  ;;  %7148 = vst [vmem:[#allocation27_spill] sm:$0xff] %v4964_v49  ;;  %v1009_v53 = vrot.slane %v4073_v52, %v4958_v44  ;;  %v1013_v55 = vrot.slane %v4073_v52, %v4964_v49  ;;  %s792_s2 = sshra.s32 %s4910_s19, 3  ;;  %s4618_s19 = smov 17  }
  0x6d   : >> { %4125 = vmatpush1.bf16.msra.mxu0 %v4124_v23  ;;  %4172 = vmatpush1.bf16.msra.mxu1 %v4124_v23  ;;  %v666_v39 = vld [vmem:[%s4916_s28] sm:$0xff]  ;;  %v667_v42 = vld [vmem:[%s4916_s28 + $0x8] sm:$0xff]  ;;  %v842_v50 = vld [vmem:[%s838_s20 + $0x18] sm:$0xff]  ;;  %s4613_s20 = smov 127   ;;  %s4117_s28 = sshll.u32 %s792_s2, 5  ;;  %vm978_vm7 = vcmask 138240  }
  0x6e   : >> { %4127 = vmatprep.subr.bf16.mxu0 %v4126_v26  ;;  %4171 = vmatprep.subr.bf16.mxu1 %v4126_v26  ;;  %v4074_v56 = vld [vmem:[%s7051_s15 + $0x4] sm:$0x3]  ;;  %v4075_v59 = vld [vmem:[%s7051_s15 + $0x6] sm:$0x3]  ;;  %v4076_v63 = vld [vmem:[%s7051_s15 + $0x8] sm:$0x3] }
  0x6f   : >> { %682 = vperm.xlu1 %4358, %v668_v28   ;;  %4361 = vset.pattern.permute.xlu0 %v4605_v24  ;;  %v1134_v57 = vrot.slane %v4074_v56, %v4964_v49  ;;  %v1130_v60 = vrot.slane %v4074_v56, %v4958_v44  ;;  %v1251_v61 = vrot.slane %v4075_v59, %v4958_v44  ;;  %s4619_s2 = smov 16   ;;  %vm1099_vm8 = vcmask 130048   ;;  %p655_p11 = scmp.ge.s32.totalorder %s658_s18, 3  }
  0x70   : >> { %672 = vperm.xlu0 %4361, %v666_v39   ;;  %v1388_v7 = vrot.slane %v4076_v63, %v4964_v49  ;;  %v1255_v9 = vrot.slane %v4075_v59, %v4964_v49  ;;  %v1384_v12 = vrot.slane %v4076_v63, %v4958_v44 }
  0x71   : >> { %4129 = vmatpush1.bf16.msra.mxu0 %v4128_v27  ;;  %4173 = vmatpush1.bf16.msra.mxu1 %v4128_v27 }
  0x73   : >> { %687 = vperm.xlu1 %4358, %v669_v31  }
  0x74   : >> { %4067 = vmatmul.mubr.msk.f32.vlgmr.msra.gmra.mrb[0].mxu0 %vm690_vm0, %v661_v33  ;;  %4069 = vmatmul.mubr.msk.f32.vlgmr.msra.gmra.mrb[0].mxu1 %vm690_vm0, %v663_v34 }
  0x75   : >> { %773 = vmatprep.mubr.f32.mxu0 %v4607_v30  ;;  %785 = vmatprep.mubr.f32.mxu1 %v4607_v30 }
  0x76   : >> { %677 = vperm.xlu0 %4361, %v667_v42  }
  0x77   : >> { %4360 = vset.pattern.permute.xlu1 %v4606_v25 }
  0x78   : >> { %817 = vperm.xlu1 %4360, %v4943_v35   ;;  %4068 = vmatmul.mubr.msk.f32.gmra.mrb[2].mxu0 %vm690_vm0, %v662_v36 }
  0x79   : >> { %4070 = vmatmul.mubr.msk.f32.gmra.mrb[2].mxu1 %vm690_vm0, %v664_v37 }
  0x7a   : >> { %850 = vperm.xlu0 %4361, %v840_v45  }
  0x7c   : >> { %822 = vperm.xlu1 %4360, %v4950_v40  }
  0x7e   : >> { %893 = vrot.lane.b32.xlu0 %v888_v48, %s7057_s27 }
  0x80   : >> { %4362 = vset.pattern.permute.xlu1 %v4605_v24 }
  0x81   : >> { %845 = vperm.xlu1 %4362, %v839_v43  }
  0x82   : >> { %915 = vperm.xlu0 %4361, %v4928_v29  }
  0x85   : >> { %855 = vperm.xlu1 %4362, %v841_v47  }
  0x86   : >> { %923 = vperm.xlu0 %4361, %v4950_v40  }
  0x89   : >> { %860 = vperm.xlu1 %4362, %v842_v50  }
  0x8a   : >> { %1014 = vrot.lane.b32.xlu0 %v1009_v53, %s7069_s29 }
  0x8b   : >> { %4363 = vset.pattern.permute.xlu0 %v4610_v54 }
  0x8d   : >> { %895 = vrot.lane.b32.xlu1 %v892_v51, %s7057_s27  ;;  %s5038_s27 = scalar_lea.vmem [#allocation2], %s4117_s28  ;;  %s4620_s28 = smov 15  }
  0x8e   : >> { %1036 = vperm.xlu0 %4363, %v4928_v29   ;;  %v5041_v34 = vld [vmem:[%s5038_s27] sm:$0xff]  ;;  %v5177_v19 = vld [vmem:[%s5038_s27 + $0x58] sm:$0xff] }
  0x8f   : >> { %v5050_v39 = vld [vmem:[%s5038_s27 + $0x40] sm:$0xff]  ;;  %7153 = vst [vmem:[#allocation32_spill] sm:$0xff] %v5177_v19  ;;  %v5189_v6 = vld [vmem:[%s5038_s27 + $0x78] sm:$0xff] }
  0x90   : >> { %v874_v47 = vld [vmem:[%s5038_s27 + $0x20] sm:$0xff]  ;;  %7154 = vst [vmem:[#allocation33_spill] sm:$0xff] %v5189_v6 }
  0x91   : >> { %919 = vperm.xlu1 %4362, %v4943_v35   ;;  %v880_v53 = vld [vmem:[%s5038_s27 + $0x60] sm:$0xff] }
  0x92   : >> { %1048 = vperm.xlu0 %4363, %v4937_v32  }
  0x95   : >> { %927 = vperm.xlu1 %4362, %v4937_v32  }
  0x96   : >> { %1137 = vrot.lane.b32.xlu0 %v1134_v57, %s7071_s26 }
  0x97   : >> { %4366 = vset.pattern.permute.xlu0 %v4612_v58 }
  0x99   : >> { %1016 = vrot.lane.b32.xlu1 %v1013_v55, %s7069_s29 }
  0x9a   : >> { %4364 = vset.pattern.permute.xlu1 %v4610_v54  ;;  %1161 = vperm.xlu0 %4366, %v4943_v35  }
  0x9d   : >> { %1040 = vperm.xlu1 %4364, %v4943_v35  }
  0x9e   : >> { %1256 = vrot.lane.b32.xlu0 %v1251_v61, %s4613_s20 }
  0x9f   : >> { %4367 = vset.pattern.permute.xlu0 %v4614_v62 }
  0xa1   : >> { %1044 = vperm.xlu1 %4364, %v4950_v40  }
  0xa2   : >> { %1278 = vperm.xlu0 %4367, %v4928_v29  }
  0xa5   : >> { %1135 = vrot.lane.b32.xlu1 %v1130_v60, %s7071_s26 }
  0xa6   : >> { %4365 = vset.pattern.permute.xlu1 %v4612_v58  ;;  %1290 = vperm.xlu0 %4367, %v4937_v32  }
  0xa9   : >> { %1157 = vperm.xlu1 %4365, %v4928_v29  }
  0xaa   : >> { %1391 = vrot.lane.b32.xlu0 %v1388_v7, %s4615_s23 }
  0xab   : >> { %4370 = vset.pattern.permute.xlu0 %v4616_v11 }
  0xad   : >> { %1165 = vperm.xlu1 %4365, %v4950_v40  }
  0xae   : >> { %1414 = vperm.xlu0 %4370, %v4943_v35  }
  0xb1   : >> { %1169 = vperm.xlu1 %4365, %v4937_v32  }
  0xb2   : >> { %4371 = vset.pattern.permute.xlu0 %v4617_v13 }
  0xb5   : >> { %1258 = vrot.lane.b32.xlu1 %v1255_v9, %s4613_s20 }
  0xb6   : >> { %4368 = vset.pattern.permute.xlu1 %v4614_v62 }
  0xb9   : >> { %1282 = vperm.xlu1 %4368, %v4943_v35  }
  0xbd   : >> { %1286 = vperm.xlu1 %4368, %v4950_v40  }
  0xc1   : >> { %1389 = vrot.lane.b32.xlu1 %v1384_v12, %s4615_s23 }
  0xc2   : >> { %4369 = vset.pattern.permute.xlu1 %v4616_v11 }
  0xc5   : >> { %1410 = vperm.xlu1 %4369, %v4928_v29  }
  0xc9   : >> { %1418 = vperm.xlu1 %4369, %v4950_v40  }
  0xcd   : >> { %1422 = vperm.xlu1 %4369, %v4937_v32  }
  0xd1   : >> { %4372 = vset.pattern.permute.xlu1 %v4617_v13 }
  0xe6   : >> { %v5019_v23 = vpop.permute.xlu0 %812 }
  0xea   : >> { %v5023_v25 = vpop.permute.xlu0 %827 }
  0xeb   : >> { %7149 = vst [vmem:[#allocation28_spill] sm:$0xff] %v5023_v25 }
  0xee   : >> { %v5017_v22 = vpop.permute.xlu1 %682 }
  0xef   : >> { %v5027_v27 = vpop.permute.xlu0 %672 }
  0xf2   : >> { %v5021_v24 = vpop.permute.xlu1 %687 }
  0xf5   : >> { %v5032_v30 = vpop.permute.xlu0 %677 }
  0xf7   : >> { %v5025_v26 = vpop.permute.xlu1 %817 }
  0xf8   : >> { %7150 = vst [vmem:[#allocation29_spill] sm:$0xff] %v5025_v26 }
  0xf9   : >> { %v5036_v33 = vpop.permute.xlu0 %850 }
  0xfa   : >> { %7151 = vst [vmem:[#allocation30_spill] sm:$0xff] %v5036_v33 }
  0xfb   : >> { %v5030_v28 = vpop.permute.xlu1 %822 }
  0xfd   : >> { %v5045_v37 = vpop.permute.xlu0 %893 }
  0xfe   : >> { %v902_v38 = vmul.f32 %v5045_v37, %v5041_v34  ;;  %v908_v45 = vmul.f32 %v5045_v37, %v5050_v39  ;;  %v905_v51 = vmul.f32 %v5045_v37, %v874_v47  ;;  %v911_v56 = vmul.f32 %v5045_v37, %v880_v53 }
 0x100   : >> { %v5034_v31 = vpop.permute.xlu1 %845 }
 0x101   : >> { %v5054_v42 = vpop.permute.xlu0 %915 }
 0x102   : >> { %v930_v43 = vmul.f32 %v5054_v42, %v902_v38 }
 0x104   : >> { %v5043_v36 = vpop.permute.xlu1 %855  ;;  %954 = vrot.lane.b32.xlu0 %v930_v43, %s4618_s19 }
 0x105   : >> { %v5063_v48 = vpop.permute.xlu0 %923 }
 0x106   : >> { %v936_v50 = vmul.f32 %v5063_v48, %v908_v45 }
 0x108   : >> { %v5052_v41 = vpop.permute.xlu1 %860  ;;  %966 = vrot.lane.b32.xlu0 %v936_v50, %s4618_s19 }
 0x109   : >> { %7152 = vst [vmem:[#allocation31_spill] sm:$0xff] %v5052_v41  ;;  %v5071_v54 = vpop.permute.xlu0 %1014  ;;  %v4621_v41 = vmov 7  }
 0x10a   : >> { %v1023_v57 = vmul.f32 %v5071_v54, %v5041_v34  ;;  %v1026_v7 = vmul.f32 %v5071_v54, %v874_v47  ;;  %v1032_v13 = vmul.f32 %v5071_v54, %v880_v53  ;;  %v1029_v38 = vmul.f32 %v5071_v54, %v5050_v39 }
 0x10c   : >> { %v5060_v46 = vpop.permute.xlu1 %895 }
 0x10d   : >> { %v5080_v59 = vpop.permute.xlu0 %1036 }
 0x10e   : >> { %v1051_v61 = vmul.f32 %v5080_v59, %v1023_v57 }
 0x110   : >> { %v5068_v52 = vpop.permute.xlu1 %919 }
 0x111   : >> { %v933_v55 = vmul.f32 %v5068_v52, %v905_v51  ;;  %v5087_v63 = vpop.permute.xlu0 %1048 }
 0x112   : >> { %v1060_v50 = vmul.f32 %v5087_v63, %v1032_v13 }
 0x113   : >> { %960 = vrot.lane.b32.xlu1 %v933_v55, %s4618_s19 }
 0x114   : >> { %v5078_v58 = vpop.permute.xlu1 %927 }
 0x115   : >> { %v939_v60 = vmul.f32 %v5078_v58, %v911_v56  ;;  %v5093_v11 = vpop.permute.xlu0 %1137 }
 0x117   : >> { %972 = vrot.lane.b32.xlu1 %v939_v60, %s4618_s19 }
 0x118   : >> { %v5085_v62 = vpop.permute.xlu1 %1016 }
 0x119   : >> { %v5104_v51 = vpop.permute.xlu0 %1161 }
 0x11b   : >> { %1075 = vrot.lane.b32.xlu1 %v1051_v61, %s4619_s2 }
 0x11c   : >> { %v5091_v9 = vpop.permute.xlu1 %1040 }
 0x11d   : >> { %v1054_v12 = vmul.f32 %v5091_v9, %v1026_v7  ;;  %v5114_v61 = vpop.permute.xlu0 %1256 }
 0x11f   : >> { %1081 = vrot.lane.b32.xlu0 %v1054_v12, %s4619_s2 }
 0x120   : >> { %v5100_v43 = vpop.permute.xlu1 %1044 }
 0x121   : >> { %v1057_v45 = vmul.f32 %v5100_v43, %v1029_v38 }
 0x123   : >> { %1087 = vrot.lane.b32.xlu1 %v1057_v45, %s4619_s2  ;;  %1093 = vrot.lane.b32.xlu0 %v1060_v50, %s4619_s2  ;;  %v5126_v50 = vpop.permute.xlu0 %1278 }
 0x124   : >> { %v5108_v55 = vpop.permute.xlu1 %1135 }
 0x125   : >> { %v1147_v56 = vmul.f32 %v5108_v55, %v874_v47  ;;  %v1144_v60 = vmul.f32 %v5108_v55, %v5041_v34  ;;  %v1150_v13 = vmul.f32 %v5108_v55, %v5050_v39 }
 0x127   : >> { %v1175_v57 = vmul.f32 %v5104_v51, %v1147_v56  ;;  %v1153_v56 = vmul.f32 %v5108_v55, %v880_v53 }
 0x128   : >> { %v5116_v7 = vpop.permute.xlu1 %1157 }
 0x129   : >> { %1202 = vrot.lane.b32.xlu1 %v1175_v57, %s4620_s28  ;;  %v1172_v12 = vmul.f32 %v5116_v7, %v1144_v60  ;;  %v1265_v60 = vmul.f32 %v5114_v61, %v5041_v34  ;;  %v1274_v34 = vmul.f32 %v5114_v61, %v880_v53 }
 0x12b   : >> { %1196 = vrot.lane.b32.xlu0 %v1172_v12, %s4620_s28  ;;  %v5136_v12 = vpop.permute.xlu0 %1290 }
 0x12c   : >> { %v5123_v38 = vpop.permute.xlu1 %1165  ;;  %v1302_v17 = vmul.f32 %v5136_v12, %v1274_v34 }
 0x12d   : >> { %v1178_v45 = vmul.f32 %v5123_v38, %v1150_v13  ;;  %v1293_v13 = vmul.f32 %v5126_v50, %v1265_v60  ;;  %v1271_v60 = vmul.f32 %v5114_v61, %v5050_v39 }
 0x12f   : >> { %1208 = vrot.lane.b32.xlu0 %v1178_v45, %s4620_s28  ;;  %v1268_v45 = vmul.f32 %v5114_v61, %v874_v47  ;;  %v5143_v15 = vpop.permute.xlu0 %1391 }
 0x130   : >> { %v5130_v0 = vpop.permute.xlu1 %1169  ;;  %v1405_v20 = vmul.f32 %v5143_v15, %v5177_v19 }
 0x131   : >> { %v1181_v57 = vmul.f32 %v5130_v0, %v1153_v56 }
 0x133   : >> { %1214 = vrot.lane.b32.xlu1 %v1181_v57, %s4620_s28  ;;  %v5150_v57 = vld [vmem:[%s5038_s27 + $0x38] sm:$0xff] }
 0x134   : >> { %v5138_v14 = vpop.permute.xlu1 %1258  ;;  %v1402_v18 = vmul.f32 %v5143_v15, %v5150_v57 }
 0x137   : >> { %1317 = vrot.lane.b32.xlu1 %v1293_v13, %s4615_s23 }
 0x138   : >> { %v5145_v16 = vpop.permute.xlu1 %1282 }
 0x139   : >> { %v1296_v56 = vmul.f32 %v5145_v16, %v1268_v45  ;;  %v5161_v45 = vpop.permute.xlu0 %1414 }
 0x13a   : >> { %v1430_v39 = vmul.f32 %v5161_v45, %v1402_v18 }
 0x13b   : >> { %1323 = vrot.lane.b32.xlu0 %v1296_v56, %s4615_s23  ;;  %v5168_v56 = vld [vmem:[%s5038_s27 + $0x18] sm:$0xff] }
 0x13c   : >> { %v5155_v13 = vpop.permute.xlu1 %1286  ;;  %v1399_v34 = vmul.f32 %v5143_v15, %v5168_v56 }
 0x13d   : >> { %v1299_v47 = vmul.f32 %v5155_v13, %v1271_v60 }
 0x13f   : >> { %1329 = vrot.lane.b32.xlu1 %v1299_v47, %s4615_s23  ;;  %1335 = vrot.lane.b32.xlu0 %v1302_v17, %s4615_s23 }
 0x140   : >> { %v5165_v53 = vpop.permute.xlu1 %1389 }
 0x143   : >> { %1459 = vrot.lane.b32.xlu1 %v1430_v39, %s4613_s20 }
 0x144   : >> { %v5174_v60 = vpop.permute.xlu1 %1410 }
 0x145   : >> { %v1427_v47 = vmul.f32 %v5174_v60, %v1399_v34 }
 0x147   : >> { %1453 = vrot.lane.b32.xlu0 %v1427_v47, %s4613_s20  ;;  %v769_v17 = vpop.f32.mrb[0].mxu0  ;;  %v781_v21 = vpop.f32.mrb[0].mxu1  ;;  %v1408_v47 = vmul.f32 %v5143_v15, %v5189_v6  ;;  %v4622_v6 = vmov 8  }
 0x148   : >> { %v5183_v10 = vpop.permute.xlu1 %1418  ;;  %v771_v18 = vpop.f32.mrb[1].mxu0  ;;  %v5224_v25 = vadd.f32 %v781_v21, %v5017_v22  ;;  %v5238_v21 = vsel %vm1260_vm2, %v5114_v61, %v5138_v14  ;;  %v898_v61 = vsel %vm897_vm3, %v5045_v37, %v5060_v46 }
 0x149   : >> { %v5185_v39 = vpop.f32.mrb[1].mxu1  ;;  %v1433_v8 = vmul.f32 %v5183_v10, %v1405_v20  ;;  %v5213_v20 = vadd.f32 %v769_v17, %v5027_v27  ;;  %v5263_v37 = vadd.f32 %v771_v18, %v5027_v27 }
 0x14a   : >> { %v909_v19 = vmul.f32 %v898_v61, %v5224_v25  ;;  %v5277_v27 = vadd.f32 %v5185_v39, %v5017_v22 }
 0x14b   : >> { %1465 = vrot.lane.b32.xlu0 %v1433_v8, %s4613_s20  ;;  %v5192_v5 = vpop.f32.mrb[2].mxu0  ;;  %v4077_v8 = vld [vmem:[%s7051_s15 + $0xa] sm:$0x3]  ;;  %v1025_v39 = vmul.f32 %v5085_v62, %v5263_v37 }
 0x14c   : >> { %v5194_v34 = vpop.f32.mrb[2].mxu1  ;;  %v5198_v4 = vpop.permute.xlu1 %1422 }
 0x14d   : >> { %v5200_v2 = vpop.f32.mrb[3].mxu0  ;;  %v5202_v3 = vpop.f32.mrb[3].mxu1  ;;  %v1436_v1 = vmul.f32 %v5198_v4, %v1408_v47  ;;  %v5221_v47 = vsel %vm1018_vm1, %v5071_v54, %v5085_v62  ;;  %v1266_v54 = vmul.f32 %v5238_v21, %v5213_v20 }
 0x14e   : >> { %v1024_v17 = vmul.f32 %v5221_v47, %v5213_v20  ;;  %v1030_v26 = vmul.f32 %v5221_v47, %v5224_v25 }
 0x14f   : >> { %1529 = vperm.xlu0 %4371, %v4928_v29   ;;  %1471 = vrot.lane.b32.xlu1 %v1436_v1, %s4613_s20  ;;  %v1503_v1 = vrot.slane %v4077_v8, %v4958_v44 }
 0x150   : >> { %v1052_v33 = vmul.f32 %v5080_v59, %v1024_v17  ;;  %v1272_v17 = vmul.f32 %v5238_v21, %v5224_v25 }
 0x153   : >> { %1541 = vperm.xlu0 %4371, %v4937_v32   ;;  %1533 = vperm.xlu1 %4372, %v4943_v35  }
 0x157   : >> { %4374 = vset.pattern.permute.xlu0 %v4621_v41  ;;  %1537 = vperm.xlu1 %4372, %v4950_v40  }
 0x158   : >> { %1652 = vperm.xlu0 %4374, %v4943_v35  }
 0x15b   : >> { %4373 = vset.pattern.permute.xlu1 %v4621_v41  ;;  %v1058_v41 = vmul.f32 %v5100_v43, %v1030_v26  ;;  %v903_v26 = vmul.f32 %v898_v61, %v5213_v20 }
 0x15c   : >> { %1508 = vrot.lane.b32.xlu0 %v1503_v1, %s4620_s28  ;;  %1648 = vperm.xlu1 %4373, %v4928_v29   ;;  %v1507_v1 = vrot.slane %v4077_v8, %v4964_v49  ;;  %v1397_v8 = vmul.f32 %v5165_v53, %v5213_v20 }
 0x15d   : >> { %4375 = vset.pattern.permute.xlu0 %v4622_v6 }
 0x160   : >> { %1077 = vrot.lane.b32.xlu0 %v1052_v33, %s4619_s2  ;;  %1656 = vperm.xlu1 %4373, %v4950_v40   ;;  %v1294_v33 = vmul.f32 %v5126_v50, %v1266_v54  ;;  %v931_v54 = vmul.f32 %v5054_v42, %v903_v26 }
 0x164   : >> { %1089 = vrot.lane.b32.xlu0 %v1058_v41, %s4619_s2  ;;  %1660 = vperm.xlu1 %4373, %v4937_v32   ;;  %v1300_v41 = vmul.f32 %v5155_v13, %v1272_v17  ;;  %v937_v17 = vmul.f32 %v5063_v48, %v909_v19 }
 0x168   : >> { %1319 = vrot.lane.b32.xlu0 %v1294_v33, %s4615_s23  ;;  %1510 = vrot.lane.b32.xlu1 %v1507_v1, %s4620_s28  ;;  %v1425_v1 = vmul.f32 %v5174_v60, %v1397_v8  ;;  %v1403_v33 = vmul.f32 %v5165_v53, %v5224_v25 }
 0x169   : >> { %4376 = vset.pattern.permute.xlu1 %v4622_v6  ;;  %v1140_v6 = vsel %vm1139_vm4, %v5108_v55, %v5093_v11 }
 0x16a   : >> { %v1145_v26 = vmul.f32 %v1140_v6, %v5213_v20  ;;  %v1431_v18 = vmul.f32 %v5183_v10, %v1403_v33  ;;  %v1151_v55 = vmul.f32 %v1140_v6, %v5224_v25  ;;  %v1146_v33 = vmul.f32 %v5093_v11, %v5263_v37 }
 0x16c   : >> { %1331 = vrot.lane.b32.xlu0 %v1300_v41, %s4615_s23  ;;  %956 = vrot.lane.b32.xlu1 %v931_v54, %s4618_s19  ;;  %v904_v41 = vmul.f32 %v5060_v46, %v5263_v37  ;;  %v1173_v8 = vmul.f32 %v5116_v7, %v1145_v26  ;;  %v910_v54 = vmul.f32 %v5060_v46, %v5277_v27 }
 0x16d   : >> { %v1179_v22 = vmul.f32 %v5123_v38, %v1151_v55  ;;  %v5304_v26 = vadd.f32 %v5192_v5, %v5032_v30 }
 0x16e   : >> { %v932_v19 = vmul.f32 %v5054_v42, %v904_v41  ;;  %v1031_v42 = vmul.f32 %v5085_v62, %v5277_v27 }
 0x170   : >> { %1449 = vrot.lane.b32.xlu0 %v1425_v1, %s4613_s20  ;;  %968 = vrot.lane.b32.xlu1 %v937_v17, %s4618_s19  ;;  %v938_v1 = vmul.f32 %v5063_v48, %v910_v54  ;;  %v1053_v17 = vmul.f32 %v5080_v59, %v1025_v39  ;;  %v1152_v48 = vmul.f32 %v5093_v11, %v5277_v27 }
 0x171   : >> { %v1059_v41 = vmul.f32 %v5100_v43, %v1031_v42  ;;  %v1267_v59 = vmul.f32 %v5138_v14, %v5263_v37  ;;  %v1273_v43 = vmul.f32 %v5138_v14, %v5277_v27  ;;  %v1148_v39 = vmul.f32 %v1140_v6, %v5304_v26 }
 0x172   : >> { %v1180_v5 = vmul.f32 %v5123_v38, %v1152_v48  ;;  %v1393_v38 = vsel %vm1341_vm5, %v5165_v53, %v5143_v15  ;;  %v5342_v15 = vadd.f32 %v5200_v2, %v5032_v30  ;;  %v1027_v42 = vmul.f32 %v5221_v47, %v5304_v26 }
 0x173   : >> { %v1295_v55 = vmul.f32 %v5126_v50, %v1267_v59  ;;  %v1398_v50 = vmul.f32 %v1393_v38, %v5263_v37  ;;  %v1269_v48 = vmul.f32 %v5238_v21, %v5304_v26 }
 0x174   : >> { %1461 = vrot.lane.b32.xlu0 %v1431_v18, %s4613_s20  ;;  %1198 = vrot.lane.b32.xlu1 %v1173_v8, %s4620_s28  ;;  %v1174_v18 = vmul.f32 %v5116_v7, %v1146_v33  ;;  %v5316_v8 = vadd.f32 %v5194_v34, %v5021_v24  ;;  %v906_v7 = vmul.f32 %v898_v61, %v5304_v26 }
 0x175   : >> { %v1301_v34 = vmul.f32 %v5155_v13, %v1273_v43  ;;  %v1176_v13 = vmul.f32 %v5104_v51, %v1148_v39  ;;  %v1028_v30 = vmul.f32 %v5085_v62, %v5342_v15  ;;  %v1297_v59 = vmul.f32 %v5145_v16, %v1269_v48 }
 0x176   : >> { %v912_v54 = vmul.f32 %v898_v61, %v5316_v8  ;;  %v1404_v61 = vmul.f32 %v1393_v38, %v5277_v27  ;;  %v1154_v33 = vmul.f32 %v1140_v6, %v5316_v8  ;;  %v1055_v6 = vmul.f32 %v5091_v9, %v1027_v42 }
 0x177   : >> { %v907_v39 = vmul.f32 %v5060_v46, %v5342_v15 }
 0x178   : >> { %958 = vrot.lane.b32.xlu0 %v932_v19, %s4618_s19  ;;  %1210 = vrot.lane.b32.xlu1 %v1179_v22, %s4620_s28  ;;  %v934_v19 = vmul.f32 %v5068_v52, %v906_v7  ;;  %v940_v22 = vmul.f32 %v5078_v58, %v912_v54  ;;  %v1182_v2 = vmul.f32 %v5130_v0, %v1154_v33 }
 0x17c   : >> { %970 = vrot.lane.b32.xlu0 %v938_v1, %s4618_s19  ;;  %1079 = vrot.lane.b32.xlu1 %v1053_v17, %s4619_s2  ;;  %v1426_v1 = vmul.f32 %v5174_v60, %v1398_v50  ;;  %v1432_v17 = vmul.f32 %v5183_v10, %v1404_v61  ;;  %v5353_v60 = vadd.f32 %v5202_v3, %v5021_v24 }
 0x17d   : >> { %v1033_v10 = vmul.f32 %v5221_v47, %v5316_v8  ;;  %v935_v61 = vmul.f32 %v5068_v52, %v907_v39 }
 0x17e   : >> { %v1034_v3 = vmul.f32 %v5085_v62, %v5353_v60  ;;  %v5377_v62 = vpop.permute.xlu0 %954  ;;  %v1276_v7 = vmul.f32 %v5138_v14, %v5353_v60 }
 0x17f   : >> { %v1061_v24 = vmul.f32 %v5087_v63, %v1033_v10 }
 0x180   : >> { %1200 = vrot.lane.b32.xlu0 %v1174_v18, %s4620_s28  ;;  %1091 = vrot.lane.b32.xlu1 %v1059_v41, %s4619_s2  ;;  %v1056_v18 = vmul.f32 %v5091_v9, %v1028_v30  ;;  %v1062_v47 = vmul.f32 %v5087_v63, %v1034_v3  ;;  %v1270_v41 = vmul.f32 %v5138_v14, %v5342_v15 }
 0x181   : >> { %v1275_v9 = vmul.f32 %v5238_v21, %v5316_v8  ;;  %v1304_v43 = vmul.f32 %v5136_v12, %v1276_v7 }
 0x182   : >> { %v5389_v21 = vpop.permute.xlu0 %966 }
 0x183   : >> { %v1303_v63 = vmul.f32 %v5136_v12, %v1275_v9 }
 0x184   : >> { %1212 = vrot.lane.b32.xlu0 %v1180_v5, %s4620_s28  ;;  %1321 = vrot.lane.b32.xlu1 %v1295_v55, %s4615_s23  ;;  %v1298_v5 = vmul.f32 %v5145_v16, %v1270_v41  ;;  %v1400_v55 = vmul.f32 %v5165_v53, %v5304_v26  ;;  %v1406_v16 = vmul.f32 %v5165_v53, %v5316_v8 }
 0x185   : >> { %v5395_v54 = vpop.permute.xlu1 %960 }
 0x186   : >> { %v1428_v14 = vmul.f32 %v5161_v45, %v1400_v55  ;;  %v1434_v12 = vmul.f32 %v5198_v4, %v1406_v16 }
 0x188   : >> { %962 = vrot.lane.b32.xlu0 %v934_v19, %s4618_s19  ;;  %1333 = vrot.lane.b32.xlu1 %v1301_v34, %s4615_s23  ;;  %v1401_v19 = vmul.f32 %v1393_v38, %v5342_v15 }
 0x189   : >> { %v5408_v53 = vpop.permute.xlu1 %972 }
 0x18a   : >> { %v1429_v50 = vmul.f32 %v5161_v45, %v1401_v19  ;;  %v913_v45 = vmul.f32 %v5060_v46, %v5353_v60 }
 0x18c   : >> { %974 = vrot.lane.b32.xlu0 %v940_v22, %s4618_s19  ;;  %1451 = vrot.lane.b32.xlu1 %v1426_v1, %s4613_s20  ;;  %v1407_v22 = vmul.f32 %v1393_v38, %v5353_v60  ;;  %v941_v33 = vmul.f32 %v5078_v58, %v913_v45  ;;  %v1155_v58 = vmul.f32 %v5093_v11, %v5353_v60 }
 0x18d   : >> { %v5419_v38 = vpop.permute.xlu1 %1075 }
 0x18e   : >> { %v1435_v1 = vmul.f32 %v5198_v4, %v1407_v22  ;;  %v4078_v4 = vld [vmem:[%s7051_s15 + $0xc] sm:$0x3]  ;;  %v1183_v10 = vmul.f32 %v5130_v0, %v1155_v58 }
 0x18f   : >> { %v1622_v0 = vrot.slane %v4078_v4, %v4958_v44 }
 0x190   : >> { %1204 = vrot.lane.b32.xlu0 %v1176_v13, %s4620_s28  ;;  %1463 = vrot.lane.b32.xlu1 %v1432_v17, %s4613_s20  ;;  %v1149_v17 = vmul.f32 %v5093_v11, %v5342_v15 }
 0x191   : >> { %v5400_v34 = vpop.permute.xlu0 %1081 }
 0x192   : >> { %v1177_v52 = vmul.f32 %v5104_v51, %v1149_v17 }
 0x194   : >> { %1216 = vrot.lane.b32.xlu0 %v1182_v2, %s4620_s28  ;;  %1083 = vrot.lane.b32.xlu1 %v1055_v6, %s4619_s2  ;;  %v1626_v2 = vrot.slane %v4078_v4, %v4964_v49  ;;  %v834_v4 = vmul.f32 %v5030_v28, %v5224_v25 }
 0x195   : >> { %v5415_v13 = vpop.permute.xlu0 %1093  ;;  %v5431_v46 = vpop.permute.xlu1 %1087 }
 0x198   : >> { %1085 = vrot.lane.b32.xlu0 %v1056_v18, %s4619_s2  ;;  %1095 = vrot.lane.b32.xlu1 %v1061_v24, %s4619_s2 }
 0x19b   : >> { %v5444_v6 = vpop.permute.xlu1 %1202 }
 0x19c   : >> { %1097 = vrot.lane.b32.xlu0 %v1062_v47, %s4619_s2  ;;  %1325 = vrot.lane.b32.xlu1 %v1297_v59, %s4615_s23 }
 0x19d   : >> { %v5424_v42 = vpop.permute.xlu0 %1196 }
 0x1a0   : >> { %1327 = vrot.lane.b32.xlu0 %v1298_v5, %s4615_s23  ;;  %1337 = vrot.lane.b32.xlu1 %v1303_v63, %s4615_s23 }
 0x1a1   : >> { %v5442_v30 = vpop.permute.xlu0 %1208 }
 0x1a4   : >> { %1339 = vrot.lane.b32.xlu0 %v1304_v43, %s4615_s23  ;;  %1455 = vrot.lane.b32.xlu1 %v1428_v14, %s4613_s20  ;;  %s5961_s23 = smov (%p655_p11), 0  }
 0x1a5   : >> { %v5452_v51 = vpop.permute.xlu1 %1214 }
 0x1a8   : >> { %1457 = vrot.lane.b32.xlu0 %v1429_v50, %s4613_s20  ;;  %1467 = vrot.lane.b32.xlu1 %v1434_v12, %s4613_s20 }
 0x1a9   : >> { %v5458_v3 = vpop.permute.xlu1 %1317 }
 0x1ac   : >> { %1469 = vrot.lane.b32.xlu0 %v1435_v1, %s4613_s20  ;;  %964 = vrot.lane.b32.xlu1 %v935_v61, %s4618_s19  ;;  %v830_v1 = vmul.f32 %v5019_v23, %v5213_v20 }
 0x1b0   : >> { %1767 = vperm.xlu0 %4375, %v4928_v29   ;;  %976 = vrot.lane.b32.xlu1 %v941_v33, %s4618_s19  ;;  %v4079_v29 = vld [vmem:[%s7051_s15 + $0xe] sm:$0x3] }
 0x1b1   : >> { %v1745_v11 = vrot.slane %v4079_v29, %v4964_v49  ;;  %v5464_v48 = vpop.permute.xlu1 %1329  ;;  %v1741_v47 = vrot.slane %v4079_v29, %v4958_v44  ;;  %v863_v29 = vadd.f32 %v5034_v31, %v830_v1  ;;  %v867_v44 = vadd.f32 %v5043_v36, %v834_v4 }
 0x1b4   : >> { %1779 = vperm.xlu0 %4375, %v4937_v32   ;;  %1206 = vrot.lane.b32.xlu1 %v1177_v52, %s4620_s28  ;;  %v5450_v32 = vpop.permute.xlu0 %1323 }
 0x1b8   : >> { %1629 = vrot.lane.b32.xlu0 %v1626_v2, %s4619_s2  ;;  %1218 = vrot.lane.b32.xlu1 %v1183_v10, %s4620_s28  ;;  %v5456_v18 = vpop.permute.xlu0 %1335  ;;  %s7165_s28 = smov 111  }
 0x1bc   : >> { %1748 = vrot.lane.b32.xlu0 %v1745_v11, %s4618_s19  ;;  %1771 = vperm.xlu1 %4376, %v4943_v35   ;;  %v5462_v24 = vpop.permute.xlu0 %1453  ;;  %v5471_v35 = vpop.permute.xlu1 %1459 }
 0x1c0   : >> { %1775 = vperm.xlu1 %4376, %v4950_v40   ;;  %v5469_v41 = vpop.permute.xlu0 %1465 }
 0x1c1   : >> { %v5473_v9 = vpop.permute.xlu1 %1471 }
 0x1c4   : >> { %1627 = vrot.lane.b32.xlu1 %v1622_v0, %s4619_s2  ;;  %s7163_s2 = smov 112  }
 0x1c8   : >> { %1746 = vrot.lane.b32.xlu1 %v1741_v47, %s4618_s19  ;;  %s7155_s19 = smov 113  }
 0x1ce   : >> { %v1530_v59 = vpop.permute.xlu0 %1529 }
 0x1d2   : >> { %v5475_v40 = vpop.permute.xlu0 %1541  ;;  %v1534_v5 = vpop.permute.xlu1 %1533 }
 0x1d6   : >> { %v5477_v7 = vpop.permute.xlu1 %1537 }
 0x1d7   : >> { %v5479_v63 = vpop.permute.xlu0 %1652 }
 0x1db   : >> { %v1509_v55 = vpop.permute.xlu0 %1508  ;;  %v5481_v43 = vpop.permute.xlu1 %1648 }
 0x1dc   : >> { %v1516_v19 = vmul.f32 %v1509_v55, %v5213_v20  ;;  %v1519_v10 = vmul.f32 %v1509_v55, %v5304_v26 }
 0x1de   : >> { %v1544_v16 = vmul.f32 %v1530_v59, %v1516_v19 }
 0x1df   : >> { %v5484_v14 = vpop.permute.xlu0 %1077  ;;  %v5486_v50 = vpop.permute.xlu1 %1656 }
 0x1e0   : >> { %1568 = vrot.lane.b32.xlu1 %v1544_v16, %s7155_s19  ;;  %v1522_v16 = vmul.f32 %v1509_v55, %v5224_v25 }
 0x1e3   : >> { %v5489_v22 = vpop.permute.xlu0 %1089  ;;  %v5491_v12 = vpop.permute.xlu1 %1660 }
 0x1e4   : >> { %7156 = vst [vmem:[#allocation34_spill] sm:$0xff] %v5491_v12 }
 0x1e7   : >> { %v5493_v39 = vpop.permute.xlu0 %1319  ;;  %v5497_v61 = vpop.permute.xlu1 %1510 }
 0x1e8   : >> { %v1512_v45 = vsel %vm1220_vm6, %v1509_v55, %v5497_v61  ;;  %v1518_v33 = vmul.f32 %v5497_v61, %v5168_v56 }
 0x1e9   : >> { %v1517_v17 = vmul.f32 %v1512_v45, %v5263_v37  ;;  %v1520_v2 = vmul.f32 %v1512_v45, %v5342_v15 }
 0x1ea   : >> { %v1546_v58 = vmul.f32 %v1530_v59, %v1518_v33  ;;  %v1100_v33 = vsel %vm1099_vm8, %v5419_v38, %v5484_v14  ;;  %v1104_v38 = vsel %vm1099_vm8, %v5431_v46, %v5489_v22 }
 0x1eb   : >> { %v5506_v52 = vpop.permute.xlu0 %1331  ;;  %v957_v11 = vpop.permute.xlu1 %956  ;;  %v1545_v0 = vmul.f32 %v1530_v59, %v1517_v17  ;;  %v1548_v49 = vmul.f32 %v1534_v5, %v1520_v2  ;;  %v1521_v59 = vmul.f32 %v5497_v61, %v5150_v57  ;;  %v1547_v17 = vmul.f32 %v1534_v5, %v1519_v10  ;;  %v7157_v2 = vld [vmem:[#allocation32_spill] sm:$0xff] }
 0x1ec   : >> { %v979_v47 = vsel %vm978_vm7, %v5377_v62, %v957_v11  ;;  %1572 = vrot.lane.b32.xlu1 %v1546_v58, %s7155_s19  ;;  %v1524_v4 = vmul.f32 %v5497_v61, %v7157_v2  ;;  %v1550_v10 = vmul.f32 %v5477_v7, %v1522_v16 }
 0x1ed   : >> { %v995_v19 = vadd.f32 %v979_v47, %v863_v29  ;;  %1570 = vrot.lane.b32.xlu0 %v1545_v0, %s7155_s19 }
 0x1ef   : >> { %v5519_v1 = vpop.permute.xlu0 %1449  ;;  %v969_v62 = vpop.permute.xlu1 %968  ;;  %v1116_v58 = vadd.f32 %v1100_v33, %v995_v19  ;;  %v1549_v33 = vmul.f32 %v1534_v5, %v1521_v59  ;;  %v1342_v5 = vsel %vm1341_vm5, %v5458_v3, %v5493_v39  ;;  %v1552_v59 = vmul.f32 %v5477_v7, %v1524_v4 }
 0x1f0   : >> { %v983_v29 = vsel %vm978_vm7, %v5389_v21, %v969_v62  ;;  %1576 = vrot.lane.b32.xlu1 %v1548_v49, %s7155_s19  ;;  %v1523_v21 = vmul.f32 %v1512_v45, %v5277_v27  ;;  %v831_v49 = vmul.f32 %v5019_v23, %v5263_v37  ;;  %v835_v3 = vmul.f32 %v5030_v28, %v5277_v27 }
 0x1f1   : >> { %v999_v0 = vadd.f32 %v983_v29, %v867_v44  ;;  %1574 = vrot.lane.b32.xlu0 %v1547_v17, %s7155_s19  ;;  %v1525_v17 = vmul.f32 %v1509_v55, %v5316_v8  ;;  %v1526_v29 = vmul.f32 %v1512_v45, %v5353_v60  ;;  %v1346_v45 = vsel %vm1341_vm5, %v5464_v48, %v5506_v52 }
 0x1f2   : >> { %v864_v55 = vadd.f32 %v5034_v31, %v831_v49  ;;  %v868_v48 = vadd.f32 %v5043_v36, %v835_v3 }
 0x1f3   : >> { %v5533_v47 = vpop.permute.xlu0 %1461  ;;  %v1199_v19 = vpop.permute.xlu1 %1198  ;;  %v1120_v12 = vadd.f32 %v1104_v38, %v999_v0  ;;  %v1551_v38 = vmul.f32 %v5477_v7, %v1523_v21  ;;  %v1554_v7 = vmul.f32 %v5475_v40, %v1526_v29  ;;  %v1553_v4 = vmul.f32 %v5475_v40, %v1525_v17 }
 0x1f4   : >> { %v1221_v44 = vsel %vm1220_vm6, %v5424_v42, %v1199_v19  ;;  %1580 = vrot.lane.b32.xlu1 %v1550_v10, %s7155_s19 }
 0x1f5   : >> { %v1237_v46 = vadd.f32 %v1221_v44, %v1116_v58  ;;  %1578 = vrot.lane.b32.xlu0 %v1549_v33, %s7155_s19 }
 0x1f7   : >> { %v959_v16 = vpop.permute.xlu0 %958  ;;  %v1211_v0 = vpop.permute.xlu1 %1210  ;;  %v1358_v23 = vadd.f32 %v1342_v5, %v1237_v46 }
 0x1f8   : >> { %v980_v42 = vsel %vm978_vm7, %v957_v11, %v959_v16  ;;  %v1225_v58 = vsel %vm1220_vm6, %v5442_v30, %v1211_v0  ;;  %1584 = vrot.lane.b32.xlu1 %v1552_v59, %s7155_s19  ;;  %v7158_v30 = vld [vmem:[#allocation33_spill] sm:$0xff] }
 0x1f9   : >> { %v1241_v10 = vadd.f32 %v1225_v58, %v1120_v12  ;;  %1582 = vrot.lane.b32.xlu0 %v1551_v38, %s7155_s19  ;;  %v1527_v33 = vmul.f32 %v5497_v61, %v7158_v30  ;;  %v996_v21 = vadd.f32 %v980_v42, %v864_v55 }
 0x1fb   : >> { %v971_v11 = vpop.permute.xlu0 %970  ;;  %v1080_v44 = vpop.permute.xlu1 %1079  ;;  %v1362_v28 = vadd.f32 %v1346_v45, %v1241_v10  ;;  %v1555_v16 = vmul.f32 %v5475_v40, %v1527_v33 }
 0x1fc   : >> { %v984_v31 = vsel %vm978_vm7, %v969_v62, %v971_v11  ;;  %v1101_v12 = vsel %vm1099_vm8, %v5484_v14, %v1080_v44  ;;  %1588 = vrot.lane.b32.xlu1 %v1554_v7, %s7155_s19  ;;  %v7159_v7 = vld [vmem:[#allocation29_spill] sm:$0xff] }
 0x1fd   : >> { %v1117_v49 = vadd.f32 %v1101_v12, %v996_v21  ;;  %1586 = vrot.lane.b32.xlu0 %v1553_v4, %s7155_s19  ;;  %v1000_v17 = vadd.f32 %v984_v31, %v868_v48  ;;  %v832_v4 = vmul.f32 %v7159_v7, %v5304_v26  ;;  %v7160_v12 = vld [vmem:[#allocation30_spill] sm:$0xff]  ;;  %v7161_v48 = vld [vmem:[#allocation28_spill] sm:$0xff] }
 0x1ff   : >> { %v1201_v46 = vpop.permute.xlu0 %1200  ;;  %v1092_v61 = vpop.permute.xlu1 %1091 }
 0x200   : >> { %v1222_v5 = vsel %vm1220_vm6, %v1199_v19, %v1201_v46  ;;  %v1105_v59 = vsel %vm1099_vm8, %v5489_v22, %v1092_v61 }
 0x201   : >> { %v1238_v62 = vadd.f32 %v1222_v5, %v1117_v49  ;;  %v1121_v29 = vadd.f32 %v1105_v59, %v1000_v17  ;;  %1590 = vrot.lane.b32.xlu0 %v1555_v16, %s7155_s19  ;;  %v836_v49 = vmul.f32 %v7161_v48, %v5316_v8 }
 0x203   : >> { %v1213_v14 = vpop.permute.xlu0 %1212  ;;  %v1322_v42 = vpop.permute.xlu1 %1321 }
 0x204   : >> { %v1226_v36 = vsel %vm1220_vm6, %v1211_v0, %v1213_v14  ;;  %v1343_v58 = vsel %vm1341_vm5, %v5493_v39, %v1322_v42 }
 0x205   : >> { %v1242_v38 = vadd.f32 %v1226_v36, %v1121_v29  ;;  %v1359_v55 = vadd.f32 %v1343_v58, %v1238_v62 }
 0x207   : >> { %v963_v19 = vpop.permute.xlu0 %962  ;;  %v1334_v3 = vpop.permute.xlu1 %1333 }
 0x208   : >> { %v1347_v40 = vsel %vm1341_vm5, %v5506_v52, %v1334_v3  ;;  %v981_v52 = vsel %vm978_vm7, %v5395_v54, %v963_v19 }
 0x209   : >> { %v1363_v10 = vadd.f32 %v1347_v40, %v1242_v38 }
 0x20b   : >> { %v5581_v45 = vpop.permute.xlu0 %974  ;;  %v1452_v22 = vpop.permute.xlu1 %1451 }
 0x20c   : >> { %v1473_v11 = vsel %vm1260_vm2, %v5519_v1, %v1452_v22  ;;  %v1474_v0 = vsel %vm1260_vm2, %v1452_v22, %v5462_v24  ;;  %v865_v24 = vadd.f32 %v7160_v12, %v832_v4  ;;  %v985_v54 = vsel %vm978_vm7, %v5408_v53, %v5581_v45 }
 0x20d   : >> { %v5589_v39 = vadd.f32 %v1473_v11, %v1358_v23  ;;  %v5591_v33 = vadd.f32 %v1474_v0, %v1359_v55 }
 0x20e   : >> { %v997_v5 = vadd.f32 %v981_v52, %v865_v24 }
 0x20f   : >> { %v1205_v21 = vpop.permute.xlu0 %1204  ;;  %v1464_v31 = vpop.permute.xlu1 %1463 }
 0x210   : >> { %v1477_v44 = vsel %vm1260_vm2, %v5533_v47, %v1464_v31  ;;  %v1478_v1 = vsel %vm1260_vm2, %v1464_v31, %v5469_v41  ;;  %v7162_v41 = vld [vmem:[#allocation31_spill] sm:$0xff]  ;;  %v1223_v59 = vsel %vm1220_vm6, %v5444_v6, %v1205_v21 }
 0x211   : >> { %v5602_v23 = vadd.f32 %v1477_v44, %v1362_v28  ;;  %v5604_v46 = vadd.f32 %v1478_v1, %v1363_v10  ;;  %v869_v16 = vadd.f32 %v7162_v41, %v836_v49  ;;  %v833_v1 = vmul.f32 %v7159_v7, %v5342_v15 }
 0x213   : >> { %v1217_v17 = vpop.permute.xlu0 %1216  ;;  %v1084_v61 = vpop.permute.xlu1 %1083  ;;  %v1001_v29 = vadd.f32 %v985_v54, %v869_v16 }
 0x214   : >> { %v1102_v47 = vsel %vm1099_vm8, %v5400_v34, %v1084_v61  ;;  %v1227_v53 = vsel %vm1220_vm6, %v5452_v51, %v1217_v17 }
 0x215   : >> { %v1118_v62 = vadd.f32 %v1102_v47, %v997_v5 }
 0x217   : >> { %v1086_v28 = vpop.permute.xlu0 %1085  ;;  %v1096_v36 = vpop.permute.xlu1 %1095  ;;  %v1239_v42 = vadd.f32 %v1223_v59, %v1118_v62 }
 0x218   : >> { %v1103_v14 = vsel %vm1099_vm8, %v1084_v61, %v1086_v28  ;;  %v1106_v38 = vsel %vm1099_vm8, %v5415_v13, %v1096_v36  ;;  %v866_v61 = vadd.f32 %v7160_v12, %v833_v1 }
 0x219   : >> { %v1122_v58 = vadd.f32 %v1106_v38, %v1001_v29 }
 0x21b   : >> { %v1098_v34 = vpop.permute.xlu0 %1097  ;;  %v1326_v3 = vpop.permute.xlu1 %1325  ;;  %v1243_v40 = vadd.f32 %v1227_v53, %v1122_v58 }
 0x21c   : >> { %v1107_v55 = vsel %vm1099_vm8, %v1096_v36, %v1098_v34  ;;  %v1344_v6 = vsel %vm1341_vm5, %v5450_v32, %v1326_v3 }
 0x21d   : >> { %v1360_v10 = vadd.f32 %v1344_v6, %v1239_v42 }
 0x21f   : >> { %v1328_v22 = vpop.permute.xlu0 %1327  ;;  %v1338_v0 = vpop.permute.xlu1 %1337 }
 0x220   : >> { %v1345_v11 = vsel %vm1341_vm5, %v1326_v3, %v1328_v22  ;;  %v1348_v13 = vsel %vm1341_vm5, %v5456_v18, %v1338_v0  ;;  %v837_v18 = vmul.f32 %v7161_v48, %v5353_v60 }
 0x221   : >> { %v1364_v4 = vadd.f32 %v1348_v13, %v1243_v40 }
 0x222   : >> { %v870_v7 = vadd.f32 %v7162_v41, %v837_v18 }
 0x223   : >> { %v1340_v31 = vpop.permute.xlu0 %1339  ;;  %v1456_v52 = vpop.permute.xlu1 %1455 }
 0x224   : >> { %v1349_v51 = vsel %vm1341_vm5, %v1338_v0, %v1340_v31 }
 0x227   : >> { %v1458_v44 = vpop.permute.xlu0 %1457  ;;  %v1468_v32 = vpop.permute.xlu1 %1467 }
 0x228   : >> { %v1475_v24 = vsel %vm1260_vm2, %v1456_v52, %v1458_v44  ;;  %v1476_v41 = vsel %vm1260_vm2, %v1458_v44, %v5471_v35 }
 0x229   : >> { %v5629_v49 = vadd.f32 %v1475_v24, %v1360_v10 }
 0x22b   : >> { %v1470_v5 = vpop.permute.xlu0 %1469  ;;  %v965_v47 = vpop.permute.xlu1 %964 }
 0x22c   : >> { %v1479_v54 = vsel %vm1260_vm2, %v1468_v32, %v1470_v5  ;;  %v982_v62 = vsel %vm978_vm7, %v963_v19, %v965_v47 }
 0x22d   : >> { %v5635_v16 = vadd.f32 %v1479_v54, %v1364_v4  ;;  %v998_v59 = vadd.f32 %v982_v62, %v866_v61 }
 0x22f   : >> { %v977_v28 = vpop.permute.xlu1 %976  ;;  %v1119_v29 = vadd.f32 %v1103_v14, %v998_v59  ;;  %v5642_v53 = vpop.permute.xlu0 %1767 }
 0x230   : >> { %v986_v36 = vsel %vm978_vm7, %v5581_v45, %v977_v28 }
 0x231   : >> { %v1002_v42 = vadd.f32 %v986_v36, %v870_v7  ;;  %v7164_v36 = vld [vmem:[#allocation34_spill] sm:$0xff] }
 0x233   : >> { %v1207_v12 = vpop.permute.xlu1 %1206  ;;  %v1123_v38 = vadd.f32 %v1107_v55, %v1002_v42  ;;  %v1480_v55 = vsel %vm1260_vm2, %v1470_v5, %v5473_v9 }
 0x234   : >> { %v1224_v48 = vsel %vm1220_vm6, %v1205_v21, %v1207_v12  ;;  %v5653_v21 = vpop.permute.xlu0 %1779 }
 0x235   : >> { %v1240_v58 = vadd.f32 %v1224_v48, %v1119_v29 }
 0x237   : >> { %v1361_v34 = vadd.f32 %v1345_v11, %v1240_v58  ;;  %v1219_v3 = vpop.permute.xlu1 %1218 }
 0x238   : >> { %v1228_v19 = vsel %vm1220_vm6, %v1217_v17, %v1219_v3  ;;  %v1630_v11 = vpop.permute.xlu0 %1629 }
 0x239   : >> { %v1244_v40 = vadd.f32 %v1228_v19, %v1123_v38  ;;  %v5647_v14 = vadd.f32 %v1476_v41, %v1361_v34  ;;  %v1637_v4 = vmul.f32 %v1630_v11, %v5168_v56  ;;  %v1640_v1 = vmul.f32 %v1630_v11, %v5150_v57 }
 0x23a   : >> { %v1646_v28 = vmul.f32 %v1630_v11, %v7158_v30 }
 0x23b   : >> { %v1365_v6 = vadd.f32 %v1349_v51, %v1244_v40  ;;  %v5649_v45 = vpop.permute.xlu1 %1771  ;;  %v1665_v52 = vmul.f32 %v5481_v43, %v1637_v4  ;;  %v1668_v61 = vmul.f32 %v5479_v63, %v1640_v1 }
 0x23c   : >> { %v1749_v29 = vpop.permute.xlu0 %1748  ;;  %v1674_v58 = vmul.f32 %v7164_v36, %v1646_v28 }
 0x23d   : >> { %v5655_v10 = vadd.f32 %v1480_v55, %v1365_v6  ;;  %v1756_v34 = vmul.f32 %v1749_v29, %v5168_v56  ;;  %v1759_v40 = vmul.f32 %v1749_v29, %v5150_v57  ;;  %v1762_v57 = vmul.f32 %v1749_v29, %v7157_v2 }
 0x23f   : >> { %v5657_v22 = vpop.permute.xlu1 %1775  ;;  %v1787_v55 = vmul.f32 %v5649_v45, %v1759_v40 }
 0x243   : >> { %v1628_v17 = vpop.permute.xlu1 %1627 }
 0x244   : >> { %v1631_v0 = vsel %vm1099_vm8, %v1628_v17, %v1630_v11  ;;  %v1635_v35 = vmul.f32 %v1628_v17, %v5213_v20  ;;  %v1638_v9 = vmul.f32 %v1628_v17, %v5304_v26  ;;  %v1641_v32 = vmul.f32 %v1628_v17, %v5224_v25 }
 0x245   : >> { %v1636_v13 = vmul.f32 %v1631_v0, %v5263_v37  ;;  %v1639_v44 = vmul.f32 %v1631_v0, %v5342_v15  ;;  %v1642_v18 = vmul.f32 %v1631_v0, %v5277_v27  ;;  %v1644_v47 = vmul.f32 %v1628_v17, %v5316_v8 }
 0x246   : >> { %v1663_v31 = vmul.f32 %v5481_v43, %v1635_v35  ;;  %v1666_v24 = vmul.f32 %v5479_v63, %v1638_v9  ;;  %v1669_v54 = vmul.f32 %v5486_v50, %v1641_v32  ;;  %v1645_v7 = vmul.f32 %v1631_v0, %v5353_v60 }
 0x247   : >> { %v1664_v51 = vmul.f32 %v5481_v43, %v1636_v13  ;;  %v1667_v5 = vmul.f32 %v5479_v63, %v1639_v44  ;;  %v1643_v43 = vmul.f32 %v1630_v11, %v7157_v2  ;;  %v1670_v62 = vmul.f32 %v5486_v50, %v1642_v18  ;;  %v1747_v59 = vpop.permute.xlu1 %1746 }
 0x248   : >> { %1687 = vrot.lane.b32.xlu1 %v1663_v31, %s7163_s2  ;;  %v1672_v42 = vmul.f32 %v7164_v36, %v1644_v47  ;;  %v1750_v12 = vsel %vm978_vm7, %v1747_v59, %v1749_v29  ;;  %v1754_v38 = vmul.f32 %v1747_v59, %v5213_v20  ;;  %v1673_v48 = vmul.f32 %v7164_v36, %v1645_v7 }
 0x249   : >> { %1689 = vrot.lane.b32.xlu0 %v1664_v51, %s7163_s2  ;;  %v1671_v63 = vmul.f32 %v5486_v50, %v1643_v43  ;;  %v1755_v50 = vmul.f32 %v1750_v12, %v5263_v37  ;;  %v1757_v19 = vmul.f32 %v1747_v59, %v5304_v26  ;;  %v1784_v20 = vmul.f32 %v5642_v53, %v1756_v34 }
 0x24a   : >> { %v1782_v3 = vmul.f32 %v5642_v53, %v1754_v38  ;;  %v1758_v37 = vmul.f32 %v1750_v12, %v5342_v15  ;;  %v1760_v56 = vmul.f32 %v1747_v59, %v5224_v25  ;;  %v1761_v11 = vmul.f32 %v1750_v12, %v5277_v27 }
 0x24b   : >> { %v1783_v41 = vmul.f32 %v5642_v53, %v1755_v50  ;;  %v1785_v6 = vmul.f32 %v5649_v45, %v1757_v19  ;;  %v1763_v53 = vmul.f32 %v1747_v59, %v5316_v8  ;;  %v1790_v25 = vmul.f32 %v5657_v22, %v1762_v57 }
 0x24c   : >> { %1691 = vrot.lane.b32.xlu1 %v1665_v52, %s7163_s2  ;;  %v1786_v26 = vmul.f32 %v5649_v45, %v1758_v37  ;;  %v1788_v15 = vmul.f32 %v5657_v22, %v1760_v56  ;;  %v1789_v17 = vmul.f32 %v5657_v22, %v1761_v11  ;;  %v1764_v27 = vmul.f32 %v1750_v12, %v5353_v60 }
 0x24d   : >> { %1693 = vrot.lane.b32.xlu0 %v1666_v24, %s7163_s2  ;;  %v1765_v45 = vmul.f32 %v1749_v29, %v7158_v30  ;;  %v1791_v0 = vmul.f32 %v5653_v21, %v1763_v53 }
 0x24e   : >> { %v1792_v8 = vmul.f32 %v5653_v21, %v1764_v27 }
 0x24f   : >> { %v1793_v2 = vmul.f32 %v5653_v21, %v1765_v45 }
 0x250   : >> { %1695 = vrot.lane.b32.xlu1 %v1667_v5, %s7163_s2 }
 0x251   : >> { %1697 = vrot.lane.b32.xlu0 %v1668_v61, %s7163_s2 }
 0x252   : >> { %v1569_v22 = vpop.permute.xlu1 %1568 }
 0x254   : >> { %1699 = vrot.lane.b32.xlu1 %v1669_v54, %s7163_s2 }
 0x255   : >> { %1701 = vrot.lane.b32.xlu0 %v1670_v62, %s7163_s2 }
 0x258   : >> { %1703 = vrot.lane.b32.xlu1 %v1671_v63, %s7163_s2 }
 0x259   : >> { %1705 = vrot.lane.b32.xlu0 %v1672_v42, %s7163_s2 }
 0x25c   : >> { %1707 = vrot.lane.b32.xlu1 %v1673_v48, %s7163_s2 }
 0x25d   : >> { %1709 = vrot.lane.b32.xlu0 %v1674_v58, %s7163_s2 }
 0x25e   : >> { %v1573_v13 = vpop.permute.xlu1 %1572 }
 0x25f   : >> { %v1571_v35 = vpop.permute.xlu0 %1570 }
 0x260   : >> { %1806 = vrot.lane.b32.xlu1 %v1782_v3, %s7165_s28  ;;  %v1592_v59 = vsel %vm1139_vm4, %v1569_v22, %v1571_v35  ;;  %v1593_v29 = vsel %vm1139_vm4, %v1571_v35, %v1573_v13 }
 0x261   : >> { %1808 = vrot.lane.b32.xlu0 %v1783_v41, %s7165_s28  ;;  %v1608_v36 = vadd.f32 %v1592_v59, %v5589_v39  ;;  %v1609_v58 = vadd.f32 %v1593_v29, %v5591_v33 }
 0x262   : >> { %v1577_v4 = vpop.permute.xlu1 %1576 }
 0x263   : >> { %v1575_v60 = vpop.permute.xlu0 %1574 }
 0x264   : >> { %1810 = vrot.lane.b32.xlu1 %v1784_v20, %s7165_s28  ;;  %v1594_v34 = vsel %vm1139_vm4, %v1575_v60, %v1577_v4 }
 0x265   : >> { %1812 = vrot.lane.b32.xlu0 %v1785_v6, %s7165_s28  ;;  %v1610_v6 = vadd.f32 %v1594_v34, %v5629_v49 }
 0x266   : >> { %v1581_v31 = vpop.permute.xlu1 %1580 }
 0x267   : >> { %v1579_v30 = vpop.permute.xlu0 %1578 }
 0x268   : >> { %1814 = vrot.lane.b32.xlu1 %v1786_v26, %s7165_s28  ;;  %v1595_v19 = vsel %vm1139_vm4, %v1577_v4, %v1579_v30 }
 0x269   : >> { %1816 = vrot.lane.b32.xlu0 %v1787_v55, %s7165_s28  ;;  %v1611_v26 = vadd.f32 %v1595_v19, %v5647_v14 }
 0x26a   : >> { %v1585_v51 = vpop.permute.xlu1 %1584 }
 0x26b   : >> { %v1583_v9 = vpop.permute.xlu0 %1582 }
 0x26c   : >> { %1818 = vrot.lane.b32.xlu1 %v1788_v15, %s7165_s28  ;;  %v1596_v55 = vsel %vm1139_vm4, %v1581_v31, %v1583_v9  ;;  %v1597_v45 = vsel %vm1139_vm4, %v1583_v9, %v1585_v51 }
 0x26d   : >> { %1820 = vrot.lane.b32.xlu0 %v1789_v17, %s7165_s28  ;;  %v1613_v13 = vadd.f32 %v1597_v45, %v5604_v46 }
 0x26e   : >> { %v1589_v44 = vpop.permute.xlu1 %1588 }
 0x26f   : >> { %v1587_v52 = vpop.permute.xlu0 %1586 }
 0x270   : >> { %1822 = vrot.lane.b32.xlu1 %v1790_v25, %s7165_s28  ;;  %v1598_v4 = vsel %vm1139_vm4, %v1587_v52, %v1589_v44 }
 0x271   : >> { %1824 = vrot.lane.b32.xlu0 %v1791_v0, %s7165_s28  ;;  %v1612_v0 = vadd.f32 %v1596_v55, %v5602_v23  ;;  %v1614_v46 = vadd.f32 %v1598_v4, %v5635_v16 }
 0x273   : >> { %v1591_v1 = vpop.permute.xlu0 %1590 }
 0x274   : >> { %1826 = vrot.lane.b32.xlu1 %v1792_v8, %s7165_s28  ;;  %v1599_v31 = vsel %vm1139_vm4, %v1589_v44, %v1591_v1 }
 0x275   : >> { %1828 = vrot.lane.b32.xlu0 %v1793_v2, %s7165_s28  ;;  %v1615_v52 = vadd.f32 %v1599_v31, %v5655_v10 }
 0x2ba   : >> { %v1688_v24 = vpop.permute.xlu1 %1687 }
 0x2bb   : >> { %v1690_v32 = vpop.permute.xlu0 %1689 }
 0x2bc   : >> { %v1711_v28 = vsel %vm1018_vm1, %v1688_v24, %v1690_v32 }
 0x2bd   : >> { %v1727_v12 = vadd.f32 %v1711_v28, %v1608_v36 }
 0x2be   : >> { %v1692_v5 = vpop.permute.xlu1 %1691 }
 0x2bf   : >> { %v1694_v21 = vpop.permute.xlu0 %1693  ;;  %v1712_v38 = vsel %vm1018_vm1, %v1690_v32, %v1692_v5 }
 0x2c0   : >> { %v1728_v41 = vadd.f32 %v1712_v38, %v1609_v58 }
 0x2c2   : >> { %v1696_v61 = vpop.permute.xlu1 %1695 }
 0x2c3   : >> { %v1698_v18 = vpop.permute.xlu0 %1697  ;;  %v1713_v37 = vsel %vm1018_vm1, %v1694_v21, %v1696_v61 }
 0x2c4   : >> { %v1714_v33 = vsel %vm1018_vm1, %v1696_v61, %v1698_v18  ;;  %v1729_v11 = vadd.f32 %v1713_v37, %v1610_v6 }
 0x2c5   : >> { %v1730_v15 = vadd.f32 %v1714_v33, %v1611_v26 }
 0x2c6   : >> { %v1700_v43 = vpop.permute.xlu1 %1699 }
 0x2c7   : >> { %v1702_v54 = vpop.permute.xlu0 %1701 }
 0x2c8   : >> { %v1715_v25 = vsel %vm1018_vm1, %v1700_v43, %v1702_v54 }
 0x2c9   : >> { %v1731_v2 = vadd.f32 %v1715_v25, %v1612_v0 }
 0x2ca   : >> { %v1704_v47 = vpop.permute.xlu1 %1703 }
 0x2cb   : >> { %v1706_v62 = vpop.permute.xlu0 %1705  ;;  %v1716_v35 = vsel %vm1018_vm1, %v1702_v54, %v1704_v47 }
 0x2cc   : >> { %v1732_v23 = vadd.f32 %v1716_v35, %v1613_v13  ;;  %v1942_v35 = vld [vmem:[%s7041_s5] sm:$0xff] (%p655_p11)  ;;  %v1944_v13 = vld [vmem:[%s7041_s5 + $0x10] sm:$0xff] (%p655_p11) }
 0x2ce   : >> { %v1708_v63 = vpop.permute.xlu1 %1707 }
 0x2cf   : >> { %v1710_v7 = vpop.permute.xlu0 %1709  ;;  %v1717_v51 = vsel %vm1018_vm1, %v1706_v62, %v1708_v63 }
 0x2d0   : >> { %v1718_v5 = vsel %vm1018_vm1, %v1708_v63, %v1710_v7  ;;  %v1733_v61 = vadd.f32 %v1717_v51, %v1614_v46  ;;  %v7166_v63 = vmov (%p655_p11), 0.0  }
 0x2d1   : >> { %v1734_v1 = vadd.f32 %v1718_v5, %v1615_v52  ;;  %2202 = vmatprep.mubr.f32.mxu1 (%p655_p11), %v7166_v63 }
 0x2d2   : >> { %v1807_v42 = vpop.permute.xlu1 %1806 }
 0x2d3   : >> { %v1809_v48 = vpop.permute.xlu0 %1808 }
 0x2d4   : >> { %v1830_v50 = vsel %vm897_vm3, %v1807_v42, %v1809_v48 }
 0x2d5   : >> { %v1846_v3 = vadd.f32 %v1830_v50, %v1727_v12 }
 0x2d6   : >> { %v1811_v20 = vpop.permute.xlu1 %1810 }
 0x2d7   : >> { %1854 = vst [vmem:[%s5038_s27 + $0x8] sm:$0xff] %v1846_v3  ;;  %v1831_v39 = vsel %vm897_vm3, %v1809_v48, %v1811_v20  ;;  %v1813_v40 = vpop.permute.xlu0 %1812 }
 0x2d8   : >> { %v1847_v56 = vadd.f32 %v1831_v39, %v1728_v41 }
 0x2da   : >> { %1855 = vst [vmem:[%s5038_s27 + $0x10] sm:$0xff] %v1847_v56  ;;  %v1815_v57 = vpop.permute.xlu1 %1814 }
 0x2db   : >> { %v1832_v53 = vsel %vm897_vm3, %v1813_v40, %v1815_v57  ;;  %v1817_v17 = vpop.permute.xlu0 %1816 }
 0x2dc   : >> { %v1848_v27 = vadd.f32 %v1832_v53, %v1729_v11  ;;  %v1833_v49 = vsel %vm897_vm3, %v1815_v57, %v1817_v17  ;;  %v7088_v17 = vmov (%p655_p11), 0  }
 0x2dd   : >> { %v1849_v14 = vadd.f32 %v1833_v49, %v1730_v15  ;;  %4377 = vset.pattern.permute.xlu1 (%p655_p11), %v7088_v17  ;;  %4378 = vset.pattern.permute.xlu0 (%p655_p11), %v7088_v17 }
 0x2de   : >> { %1856 = vst [vmem:[%s5038_s27 + $0x28] sm:$0xff] %v1848_v27  ;;  %v1819_v8 = vpop.permute.xlu1 %1818 }
 0x2df   : >> { %1857 = vst [vmem:[%s5038_s27 + $0x30] sm:$0xff] %v1849_v14  ;;  %v1821_v22 = vpop.permute.xlu0 %1820 }
 0x2e0   : >> { %v1834_v60 = vsel %vm897_vm3, %v1819_v8, %v1821_v22 }
 0x2e1   : >> { %v1850_v30 = vadd.f32 %v1834_v60, %v1731_v2 }
 0x2e2   : >> { %v1823_v9 = vpop.permute.xlu1 %1822 }
 0x2e3   : >> { %1858 = vst [vmem:[%s5038_s27 + $0x48] sm:$0xff] %v1850_v30  ;;  %v1835_v24 = vsel %vm897_vm3, %v1821_v22, %v1823_v9  ;;  %v1825_v32 = vpop.permute.xlu0 %1824  ;;  %v1943_v30 = vld [vmem:[%s7041_s5 + $0x8] sm:$0xff] (%p655_p11) }
 0x2e4   : >> { %v1851_v21 = vadd.f32 %v1835_v24, %v1732_v23  ;;  %v1945_v24 = vld [vmem:[%s7041_s5 + $0x18] sm:$0xff] (%p655_p11) }
 0x2e5   : > { %657 = sbr.rel (!%p655_p11) target bundleno = 100 (0x64), region = 167 }
 0x2e6   : >> { %1859 = vst [vmem:[%s5038_s27 + $0x50] sm:$0xff] %v1851_v21  ;;  %v1827_v44 = vpop.permute.xlu1 %1826 }
 0x2e7   : >> { %v1836_v18 = vsel %vm897_vm3, %v1825_v32, %v1827_v44  ;;  %v1829_v43 = vpop.permute.xlu0 %1828 }
 0x2e8   : >> { %v1852_v54 = vadd.f32 %v1836_v18, %v1733_v61  ;;  %v1837_v47 = vsel %vm897_vm3, %v1827_v44, %v1829_v43 }
 0x2e9   : >> { %v1853_v62 = vadd.f32 %v1837_v47, %v1734_v1 }
 0x2ea   : >> { %1860 = vst [vmem:[%s5038_s27 + $0x68] sm:$0xff] %v1852_v54 }
 0x2eb   : >> { %1861 = vst [vmem:[%s5038_s27 + $0x70] sm:$0xff] %v1853_v62 }
 0x2f2   : > { %v5776_v16 = vld [vmem:[#allocation2 + $0x88] sm:$0xff]  ;;  %v5778_v10 = vld [vmem:[#allocation2 + $0x90] sm:$0xff] }
 0x2f3   : > { %v5780_v59 = vld [vmem:[#allocation2 + $0xc8] sm:$0xff]  ;;  %v1914_v7 = vmul.f32 %v5776_v16, %v5776_v16  ;;  %v1915_v28 = vmul.f32 %v5778_v10, %v5778_v10  ;;  %v5787_v29 = vld [vmem:[#allocation2 + $0xd0] sm:$0xff] }
 0x2f4   : > { %v1918_v36 = vmul.f32 %v5780_v59, %v5780_v59  ;;  %v5791_v42 = vld [vmem:[#allocation2 + $0xa8] sm:$0xff]  ;;  %v5793_v12 = vld [vmem:[#allocation2 + $0xb0] sm:$0xff]  ;;  %v1919_v38 = vmul.f32 %v5787_v29, %v5787_v29 }
 0x2f5   : > { %v1916_v48 = vmul.f32 %v5791_v42, %v5791_v42  ;;  %v1917_v58 = vmul.f32 %v5793_v12, %v5793_v12  ;;  %v5801_v50 = vld [vmem:[#allocation2 + $0xe8] sm:$0xff]  ;;  %v5803_v34 = vld [vmem:[#allocation2 + $0xf0] sm:$0xff]  ;;  %v1922_v19 = vadd.f32 %v1915_v28, %v1914_v7 }
 0x2f6   : > { %v5805_v3 = vld [vmem:[#allocation2 + $0x28] sm:$0xff]  ;;  %v1920_v41 = vmul.f32 %v5801_v50, %v5801_v50  ;;  %v1921_v20 = vmul.f32 %v5803_v34, %v5803_v34  ;;  %v5811_v37 = vld [vmem:[#allocation2 + $0x30] sm:$0xff]  ;;  %v1928_v6 = vadd.f32 %v1919_v38, %v1918_v36  ;;  %v2225_v36 = vld [vmem:[%s7043_s7] sm:$0xff] }
 0x2f7   : > { %v5813_v39 = vld [vmem:[#allocation2 + $0x8] sm:$0xff]  ;;  %v1863_v40 = vld [vmem:[#allocation2 + $0x10] sm:$0xff]  ;;  %1923 = vadd.xlane.f32.xlu0 %v1922_v19  ;;  %v1925_v33 = vadd.f32 %v1917_v58, %v1916_v48  ;;  %v1880_v11 = vmul.f32 %v5805_v3, %v5805_v3  ;;  %v1881_v57 = vmul.f32 %v5811_v37, %v5811_v37  ;;  %v2228_v48 = vld [vmem:[%s7043_s7 + $0x18] sm:$0xff] }
 0x2f8   : > { %v1878_v56 = vmul.f32 %v5813_v39, %v5813_v39  ;;  %v1879_v26 = vmul.f32 %v1863_v40, %v1863_v40  ;;  %1929 = vadd.xlane.f32.xlu1 %v1928_v6  ;;  %v1931_v55 = vadd.f32 %v1921_v20, %v1920_v41  ;;  %v1866_v61 = vld [vmem:[#allocation2 + $0x48] sm:$0xff]  ;;  %v1867_v44 = vld [vmem:[#allocation2 + $0x50] sm:$0xff] }
 0x2f9   : > { %v1889_v53 = vadd.f32 %v1881_v57, %v1880_v11  ;;  %v1882_v1 = vmul.f32 %v1866_v61, %v1866_v61  ;;  %v1883_v18 = vmul.f32 %v1867_v44, %v1867_v44  ;;  %v1868_v54 = vld [vmem:[#allocation2 + $0x68] sm:$0xff]  ;;  %v1869_v47 = vld [vmem:[#allocation2 + $0x70] sm:$0xff] }
 0x2fa   : > { %v1886_v15 = vadd.f32 %v1879_v26, %v1878_v56  ;;  %v1884_v62 = vmul.f32 %v1868_v54, %v1868_v54  ;;  %v1885_v7 = vmul.f32 %v1869_v47, %v1869_v47  ;;  %v2227_v38 = vld [vmem:[%s7043_s7 + $0x10] sm:$0xff] }
 0x2fb   : > { %1926 = vadd.xlane.f32.xlu0 %v1925_v33  ;;  %v1892_v43 = vadd.f32 %v1883_v18, %v1882_v1 }
 0x2fc   : > { %1932 = vadd.xlane.f32.xlu1 %v1931_v55  ;;  %v1895_v28 = vadd.f32 %v1885_v7, %v1884_v62 }
 0x2ff   : > { %1887 = vadd.xlane.f32.xlu0 %v1886_v15 }
 0x300   : > { %1890 = vadd.xlane.f32.xlu1 %v1889_v53 }
 0x384   : > { %v1924_v25 = vpop.xlane.xlu0 %1923 }
 0x385   : > { %v1934_v27 = vmax.f32 %v1924_v25, 1e-24  ;;  %v1930_v49 = vpop.xlane.xlu1 %1929 }
 0x386   : > { %v1936_v45 = vmax.f32 %v1930_v49, 1e-24 }
 0x387   : > { %4379 = vrsqrt.f32 %v1934_v27 }
 0x388   : > { %4381 = vrsqrt.f32 %v1936_v45  ;;  %v1927_v0 = vpop.xlane.xlu0 %1926 }
 0x389   : > { %v1935_v14 = vmax.f32 %v1927_v0, 1e-24  ;;  %v1933_v8 = vpop.xlane.xlu1 %1932 }
 0x38a   : > { %v1937_v2 = vmax.f32 %v1933_v8, 1e-24 }
 0x38b   : > { %4383 = vrsqrt.f32 %v1935_v14 }
 0x38c   : > { %4385 = vrsqrt.f32 %v1937_v2  ;;  %v1888_v31 = vpop.xlane.xlu0 %1887 }
 0x38d   : > { %v1898_v9 = vmax.f32 %v1888_v31, 1e-24  ;;  %v1891_v58 = vpop.xlane.xlu1 %1890 }
 0x38e   : > { %v1899_v26 = vmax.f32 %v1891_v58, 1e-24  ;;  %v2113_v58 = vld [vmem:[#allocation2 + $0x110] sm:$0xff] }
 0x38f   : > { %4387 = vrsqrt.f32 %v1898_v9 }
 0x390   : > { %4389 = vrsqrt.f32 %v1899_v26 }
 0x391   : > { %v4380_v22 = vpop.eup %4379 }
 0x392   : > { %v4382_v60 = vpop.eup %4381  ;;  %v1946_v4 = vmul.f32 %v4380_v22, %v1942_v35 }
 0x393   : > { %v1948_v23 = vmul.f32 %v4382_v60, %v1944_v13  ;;  %v1979_v60 = vld [vmem:[%s7044_s8 + $0x8] sm:$0xff] }
 0x394   : > { %1952 = vperm.xlu1 %4377, %v1946_v4  }
 0x395   : > { %v4384_v51 = vpop.eup %4383 }
 0x396   : > { %v4386_v32 = vpop.eup %4385  ;;  %v1947_v46 = vmul.f32 %v4384_v51, %v1943_v30  ;;  %v1980_v51 = vld [vmem:[%s7044_s8 + $0x10] sm:$0xff] }
 0x397   : > { %v1949_v5 = vmul.f32 %v4386_v32, %v1945_v24 }
 0x398   : > { %1962 = vperm.xlu1 %4377, %v1948_v23   ;;  %1957 = vperm.xlu0 %4378, %v1947_v46  }
 0x399   : > { %v4388_v21 = vpop.eup %4387 }
 0x39a   : > { %v1907_v52 = vmul.f32 %v4388_v21, %v1863_v40  ;;  %v1906_v27 = vmul.f32 %v4388_v21, %v5813_v39  ;;  %v1981_v21 = vld [vmem:[%s7044_s8 + $0x18] sm:$0xff] }
 0x39c   : > { %1967 = vperm.xlu1 %4377, %v1949_v5   ;;  %2046 = vmatprep.mubr.f32.mxu0 %v1907_v52 }
 0x3b7   : > { %1893 = vadd.xlane.f32.xlu0 %v1892_v43 }
 0x3c0   : > { %1896 = vadd.xlane.f32.xlu1 %v1895_v28 }
 0x3d1   : > { %2231 = vperm.xlu1 %4377, %v2225_v36  }
 0x3d5   : > { %2241 = vperm.xlu1 %4377, %v2227_v38  }
 0x3d9   : > { %2246 = vperm.xlu1 %4377, %v2228_v48  }
 0x413   : > { %v1953_v19 = vpop.permute.xlu1 %1952 }
 0x414   : > { %v1970_v40 = vmul.f32 %v1953_v19, %v5776_v16  ;;  %v1971_v6 = vmul.f32 %v1953_v19, %v5778_v10  ;;  %v2115_v19 = vld [vmem:[#allocation2 + $0x130] sm:$0xff] }
 0x417   : > { %v1963_v41 = vpop.permute.xlu1 %1962  ;;  %v1958_v20 = vpop.permute.xlu0 %1957 }
 0x418   : > { %v1972_v33 = vmul.f32 %v1958_v20, %v5791_v42  ;;  %v1973_v56 = vmul.f32 %v1958_v20, %v5793_v12  ;;  %v1975_v15 = vmul.f32 %v1963_v41, %v5787_v29  ;;  %v1974_v10 = vmul.f32 %v1963_v41, %v5780_v59  ;;  %v4390_v12 = vpop.eup %4389  ;;  %v2112_v20 = vld [vmem:[#allocation2 + $0x108] sm:$0xff] }
 0x419   : > { %v1909_v49 = vmul.f32 %v4390_v12, %v5811_v37  ;;  %v1908_v29 = vmul.f32 %v4390_v12, %v5805_v3  ;;  %v1978_v3 = vld [vmem:[%s7044_s8] sm:$0xff]  ;;  %v4138_v41 = vpack.c.bf16 %v2115_v19, %v2113_v58 }
 0x41a   : > { %v4130_v55 = vpack.c.bf16 %v1973_v56, %v1971_v6  ;;  %v4132_v11 = vpack.c.bf16 %v1972_v33, %v1970_v40  ;;  %v2114_v40 = vld [vmem:[#allocation2 + $0x128] sm:$0xff]  ;;  %v2117_v33 = vld [vmem:[#allocation2 + $0x150] sm:$0xff]  ;;  %v7167_v58 = vld [vmem:[#allocation10_spill] sm:$0xff] }
 0x41b   : > { %v1968_v57 = vpop.permute.xlu1 %1967  ;;  %v4140_v6 = vpack.c.bf16 %v2114_v40, %v2112_v20  ;;  %4174 = vmatprep.subr.bf16.mxu1 %v4138_v41  ;;  %v2119_v56 = vld [vmem:[#allocation2 + $0x170] sm:$0xff]  ;;  %v7171_v20 = vld [vmem:[#allocation11_spill] sm:$0xff] }
 0x41c   : > { %v1977_v53 = vmul.f32 %v1968_v57, %v5803_v34  ;;  %4131 = vmatprep.subr.bf16.mxu0 %v4130_v55  ;;  %v1976_v16 = vmul.f32 %v1968_v57, %v5801_v50  ;;  %v4142_v26 = vpack.c.bf16 %v2119_v56, %v2117_v33  ;;  %v2116_v55 = vld [vmem:[#allocation2 + $0x148] sm:$0xff] }
 0x41d   : > { %4133 = vmatpush1.bf16.xpose.msra.mxu0 %v4132_v11  ;;  %4176 = vmatpush1.bf16.msra.mxu1 %v4140_v6  ;;  %v2118_v11 = vld [vmem:[#allocation2 + $0x168] sm:$0xff] }
 0x41e   : > { %v4134_v25 = vpack.c.bf16 %v1977_v53, %v1975_v15  ;;  %v4136_v42 = vpack.c.bf16 %v1976_v16, %v1974_v10  ;;  %v4144_v57 = vpack.c.bf16 %v2118_v11, %v2116_v55  ;;  %4175 = vmatprep.subr.bf16.mxu1 %v4142_v26 }
 0x420   : > { %4135 = vmatprep.subr.bf16.mxu0 %v4134_v25 }
 0x421   : > { %4177 = vmatpush1.bf16.msra.mxu1 %v4144_v57 }
 0x425   : > { %4137 = vmatpush1.bf16.xpose.msra.mxu0 %v4136_v42 }
 0x426   : > { %4139 = vmatprep.subr.bf16.mxu0 %v4138_v41 }
 0x42c   : > { %2047 = vmatmul.mubr.f32.vlgmr.msra.gmra.mrb[0].mxu0 %v1906_v27 }
 0x42d   : > { %2051 = vmatprep.mubr.f32.mxu0 %v1909_v49  ;;  %4141 = vmatpush1.bf16.msra.mxu0 %v4140_v6  ;;  %v7173_v6 = vld [vmem:[#allocation13_spill] sm:$0xff] }
 0x42e   : > { %4143 = vmatprep.subr.bf16.mxu0 %v4142_v26 }
 0x430   : > { %2052 = vmatmul.mubr.f32.gmra.mrb[2].mxu0 %v1908_v29 }
 0x431   : > { %4145 = vmatpush1.bf16.msra.mxu0 %v4144_v57 }
 0x444   : > { %v1894_v34 = vpop.xlane.xlu0 %1893 }
 0x445   : > { %v1900_v45 = vmax.f32 %v1894_v34, 1e-24  ;;  %v2226_v34 = vld [vmem:[%s7043_s7 + $0x8] sm:$0xff] }
 0x447   : > { %4391 = vrsqrt.f32 %v1900_v45 }
 0x44d   : > { %v1897_v0 = vpop.xlane.xlu1 %1896 }
 0x44e   : > { %v1901_v50 = vmax.f32 %v1897_v0, 1e-24 }
 0x450   : > { %4393 = vrsqrt.f32 %v1901_v50 }
 0x451   : > { %v4392_v14 = vpop.eup %4391 }
 0x452   : > { %v1911_v59 = vmul.f32 %v4392_v14, %v1867_v44  ;;  %v1910_v8 = vmul.f32 %v4392_v14, %v1866_v61 }
 0x454   : > { %2056 = vmatprep.mubr.f32.mxu0 %v1911_v59 }
 0x455   : > { %2057 = vmatmul.mubr.f32.gmra.mrb[4].mxu0 %v1910_v8 }
 0x45a   : > { %v4394_v2 = vpop.eup %4393 }
 0x45b   : > { %v1913_v39 = vmul.f32 %v4394_v2, %v1869_v47  ;;  %v1912_v35 = vmul.f32 %v4394_v2, %v1868_v54 }
 0x45d   : > { %2061 = vmatprep.mubr.f32.mxu0 %v1913_v39 }
 0x45e   : > { %2062 = vmatmul.mubr.f32.gmra.mrb[6].mxu0 %v1912_v35 }
 0x45f   : > { %2196 = vmatprep.mubr.f32.mxu0 %v7166_v63 }
 0x4ff   : > { %v2048_v37 = vpop.f32.mrb[0].mxu0 }
 0x500   : > { %v2049_v22 = vadd.f32 %v2048_v37, %v1978_v3  ;;  %v2050_v13 = vpop.f32.mrb[1].mxu0 }
 0x502   : > { %v2068_v4 = vsel %vm690_vm0, %v2049_v22, -inf }
 0x503   : > { %v2053_v30 = vpop.f32.mrb[2].mxu0  ;;  %2069 = vmax.xlane.f32.xlu0 %v2068_v4 }
 0x504   : > { %v2054_v31 = vadd.f32 %v2053_v30, %v1979_v60  ;;  %v2055_v23 = vpop.f32.mrb[3].mxu0 }
 0x506   : > { %v2071_v9 = vsel %vm690_vm0, %v2054_v31, -inf }
 0x507   : > { %2072 = vmax.xlane.f32.xlu0 %v2071_v9 }
 0x528   : > { %v2058_v24 = vpop.f32.mrb[4].mxu0 }
 0x529   : > { %v2059_v32 = vadd.f32 %v2058_v24, %v1980_v51  ;;  %v2060_v46 = vpop.f32.mrb[5].mxu0 }
 0x52b   : > { %v2074_v5 = vsel %vm690_vm0, %v2059_v32, -inf }
 0x52c   : > { %2075 = vmax.xlane.f32.xlu0 %v2074_v5 }
 0x531   : > { %v2063_v52 = vpop.f32.mrb[6].mxu0 }
 0x532   : > { %v2064_v61 = vadd.f32 %v2063_v52, %v1981_v21  ;;  %v2065_v44 = vpop.f32.mrb[7].mxu0  ;;  %v2221_v21 = vld [vmem:[%s7042_s6] sm:$0xff]  ;;  %v2222_v52 = vld [vmem:[%s7042_s6 + $0x8] sm:$0xff] }
 0x533   : > { %v2224_v44 = vld [vmem:[%s7042_s6 + $0x18] sm:$0xff] }
 0x534   : > { %v2077_v1 = vsel %vm690_vm0, %v2064_v61, -inf }
 0x535   : > { %2078 = vmax.xlane.f32.xlu0 %v2077_v1  ;;  %v2232_v1 = vpop.permute.xlu1 %2231 }
 0x590   : > { %v2070_v18 = vpop.xlane.xlu0 %2069 }
 0x591   : > { %v2080_v43 = vsub.f32 %v2049_v22, %v2070_v18 }
 0x593   : > { %v2084_v54 = vmul.f32 1.442695, %v2080_v43 }
 0x594   : > { %v2073_v47 = vpop.xlane.xlu0 %2072 }
 0x595   : > { %4395 = vpow2.f32 %v2084_v54  ;;  %v2081_v62 = vsub.f32 %v2054_v31, %v2073_v47 }
 0x597   : > { %v2086_v7 = vmul.f32 1.442695, %v2081_v62 }
 0x599   : > { %4397 = vpow2.f32 %v2086_v7 }
 0x59f   : > { %v4396_v28 = vpop.eup %4395 }
 0x5a0   : > { %v2092_v36 = vsel %vm690_vm0, %v4396_v28, 0.0 }
 0x5a1   : > { %2093 = vadd.xlane.f32.xlu0 %v2092_v36 }
 0x5a3   : > { %v4398_v38 = vpop.eup %4397 }
 0x5a4   : > { %v2095_v48 = vsel %vm690_vm0, %v4398_v38, 0.0 }
 0x5a5   : > { %2096 = vadd.xlane.f32.xlu0 %v2095_v48 }
 0x5b9   : > { %v2076_v15 = vpop.xlane.xlu0 %2075 }
 0x5ba   : > { %v2082_v53 = vsub.f32 %v2059_v32, %v2076_v15 }
 0x5bc   : > { %v2088_v25 = vmul.f32 1.442695, %v2082_v53  ;;  %v7175_v53 = vld [vmem:[#allocation14_spill] sm:$0xff] }
 0x5be   : > { %4399 = vpow2.f32 %v2088_v25 }
 0x5c2   : > { %v2079_v16 = vpop.xlane.xlu0 %2078 }
 0x5c3   : > { %v2083_v10 = vsub.f32 %v2064_v61, %v2079_v16  ;;  %v2223_v61 = vld [vmem:[%s7042_s6 + $0x10] sm:$0xff] }
 0x5c5   : > { %v2090_v42 = vmul.f32 1.442695, %v2083_v10  ;;  %v7177_v10 = vld [vmem:[#allocation15_spill] sm:$0xff] }
 0x5c7   : > { %4401 = vpow2.f32 %v2090_v42 }
 0x5c8   : > { %v4400_v12 = vpop.eup %4399 }
 0x5c9   : > { %v2098_v27 = vsel %vm690_vm0, %v4400_v12, 0.0 }
 0x5ca   : > { %2099 = vadd.xlane.f32.xlu0 %v2098_v27 }
 0x5d1   : > { %v4402_v49 = vpop.eup %4401 }
 0x5d2   : > { %v2101_v29 = vsel %vm690_vm0, %v4402_v49, 0.0 }
 0x5d3   : > { %2102 = vadd.xlane.f32.xlu0 %v2101_v29 }
 0x5e9   : > { %2236 = vperm.xlu0 %4378, %v2226_v34  }
 0x62e   : > { %v2094_v45 = vpop.xlane.xlu0 %2093 }
 0x62f   : > { %4403 = vrcp.f32 %v2094_v45 }
 0x632   : > { %v2097_v0 = vpop.xlane.xlu0 %2096 }
 0x633   : > { %4405 = vrcp.f32 %v2097_v0  ;;  %v7179_v0 = vld [vmem:[#allocation16_spill] sm:$0xff] }
 0x639   : > { %v4404_v50 = vpop.eup %4403 }
 0x63a   : > { %v2108_v14 = vmul.f32 %v4404_v50, %v4396_v28 }
 0x63c   : > { %4080 = vmatmul.mubr.msk.f32.vlgmr.msra.gmra.mrb[8].mxu0 %vm690_vm0, %v2108_v14  ;;  %v7181_v14 = vld [vmem:[#allocation17_spill] sm:$0xff] }
 0x63d   : > { %v4406_v59 = vpop.eup %4405 }
 0x63e   : > { %v2109_v8 = vmul.f32 %v4406_v59, %v4398_v38  ;;  %v2242_v38 = vpop.permute.xlu1 %2241 }
 0x640   : > { %4081 = vmatmul.mubr.msk.f32.vlgmr.msra.gmra.mrb[0].mxu1 %vm690_vm0, %v2109_v8 }
 0x641   : > { %2208 = vmatprep.mubr.f32.mxu1 %v7166_v63 }
 0x642   : > { %v2247_v16 = vpop.permute.xlu1 %2246 }
 0x657   : > { %v2100_v2 = vpop.xlane.xlu0 %2099 }
 0x658   : > { %4407 = vrcp.f32 %v2100_v2 }
 0x660   : > { %v2103_v39 = vpop.xlane.xlu0 %2102 }
 0x661   : > { %4409 = vrcp.f32 %v2103_v39 }
 0x662   : > { %v4408_v35 = vpop.eup %4407 }
 0x663   : > { %v2110_v3 = vmul.f32 %v4408_v35, %v4400_v12 }
 0x665   : > { %4082 = vmatmul.mubr.msk.f32.gmra.mrb[2].mxu1 %vm690_vm0, %v2110_v3 }
 0x666   : > { %2214 = vmatprep.mubr.f32.mxu1 %v7166_v63 }
 0x668   : > { %v2237_v47 = vpop.permute.xlu0 %2236 }
 0x66b   : > { %v4410_v37 = vpop.eup %4409 }
 0x66c   : > { %v2111_v22 = vmul.f32 %v4410_v37, %v4402_v49 }
 0x66e   : > { %4083 = vmatmul.mubr.msk.f32.gmra.mrb[4].mxu1 %vm690_vm0, %v2111_v22 }
 0x66f   : > { %2325 = vmatprep.mubr.f32.mxu1 %v7166_v63 }
 0x70f   : > { %v2198_v13 = vpop.f32.mrb[8].mxu0 }
 0x710   : > { %v2200_v60 = vpop.f32.mrb[9].mxu0 }
 0x713   : > { %v2204_v4 = vpop.f32.mrb[0].mxu1 }
 0x714   : > { %v4148_v30 = vpack.c.bf16 %v2204_v4, %v2198_v13  ;;  %v2206_v31 = vpop.f32.mrb[1].mxu1 }
 0x715   : > { %v4146_v23 = vpack.c.bf16 %v2206_v31, %v2200_v60 }
 0x717   : > { %4147 = vmatprep.subr.bf16.mxu1 %v4146_v23 }
 0x718   : > { %4149 = vmatpush1.bf16.msra.mxu1 %v4148_v30 }
 0x738   : > { %v2210_v9 = vpop.f32.mrb[2].mxu1 }
 0x739   : > { %v2212_v51 = vpop.f32.mrb[3].mxu1 }
 0x741   : > { %v2216_v24 = vpop.f32.mrb[4].mxu1 }
 0x742   : > { %v4152_v32 = vpack.c.bf16 %v2216_v24, %v2210_v9  ;;  %v2218_v46 = vpop.f32.mrb[5].mxu1 }
 0x743   : > { %v4150_v5 = vpack.c.bf16 %v2218_v46, %v2212_v51 }
 0x745   : > { %4151 = vmatprep.subr.bf16.mxu1 %v4150_v5 }
 0x746   : > { %4153 = vmatpush1.bf16.msra.mxu1 %v4152_v32 }
 0x749   : > { %4084 = vmatmul.mubr.msk.f32.vlgmr.msra.gmra.mrb[6].mxu1 %vm690_vm0, %v2221_v21 }
 0x74a   : > { %2331 = vmatprep.mubr.f32.mxu1 %v7166_v63 }
 0x74d   : > { %4085 = vmatmul.mubr.msk.f32.gmra.mrb[8].mxu1 %vm690_vm0, %v2222_v52 }
 0x74e   : > { %2337 = vmatprep.mubr.f32.mxu1 %v7166_v63 }
 0x751   : > { %4086 = vmatmul.mubr.msk.f32.gmra.mrb[10].mxu1 %vm690_vm0, %v2223_v61 }
 0x752   : > { %2343 = vmatprep.mubr.f32.mxu1 %v7166_v63  ;;  %v7169_v63 = vld [vmem:[#allocation12_spill] sm:$0xff] }
 0x755   : > { %4087 = vmatmul.mubr.msk.f32.gmra.mrb[12].mxu1 %vm690_vm0, %v2224_v44 }
 0x81c   : > { %v2327_v18 = vpop.f32.mrb[6].mxu1 }
 0x81d   : > { %v2329_v43 = vpop.f32.mrb[7].mxu1  ;;  %v2328_v54 = vadd.f32 %v2327_v18, %v2232_v1 }
 0x81e   : > { %v2330_v62 = vadd.f32 %v2329_v43, %v2232_v1 }
 0x81f   : > { %v5906_v19 = vadd.f32 %v2328_v54, %v7167_v58 }
 0x820   : > { %v2333_v7 = vpop.f32.mrb[8].mxu1  ;;  %v5912_v40 = vadd.f32 %v2330_v62, %v7171_v20 }
 0x821   : > { %v2334_v28 = vadd.f32 %v2333_v7, %v2237_v47  ;;  %v2335_v36 = vpop.f32.mrb[9].mxu1  ;;  %7168 = vst [vmem:[#allocation18_spill] sm:$0xff] %v5906_v19 }
 0x822   : > { %v2336_v48 = vadd.f32 %v2335_v36, %v2237_v47  ;;  %7172 = vst [vmem:[#allocation20_spill] sm:$0xff] %v5912_v40 }
 0x823   : > { %v5909_v41 = vadd.f32 %v2334_v28, %v7169_v63 }
 0x824   : > { %v5915_v33 = vadd.f32 %v2336_v48, %v7173_v6  ;;  %v2339_v56 = vpop.f32.mrb[10].mxu1 }
 0x825   : > { %7170 = vst [vmem:[#allocation19_spill] sm:$0xff] %v5909_v41  ;;  %v2358_v26 = vadd.f32 %v5909_v41, %v5906_v19  ;;  %v2340_v55 = vadd.f32 %v2339_v56, %v2242_v38  ;;  %v2341_v11 = vpop.f32.mrb[11].mxu1 }
 0x826   : > { %7174 = vst [vmem:[#allocation21_spill] sm:$0xff] %v5915_v33  ;;  %v2367_v57 = vadd.f32 %v5915_v33, %v5912_v40  ;;  %v2342_v15 = vadd.f32 %v2341_v11, %v2242_v38 }
 0x827   : > { %v5922_v25 = vadd.f32 %v2340_v55, %v7175_v53 }
 0x828   : > { %v5925_v42 = vadd.f32 %v2342_v15, %v7177_v10  ;;  %v2345_v12 = vpop.f32.mrb[12].mxu1 }
 0x829   : > { %7176 = vst [vmem:[#allocation22_spill] sm:$0xff] %v5922_v25  ;;  %v2359_v27 = vadd.f32 %v2358_v26, %v5922_v25  ;;  %v2346_v49 = vadd.f32 %v2345_v12, %v2247_v16  ;;  %v2347_v29 = vpop.f32.mrb[13].mxu1 }
 0x82a   : > { %7178 = vst [vmem:[#allocation23_spill] sm:$0xff] %v5925_v42  ;;  %v2368_v34 = vadd.f32 %v2367_v57, %v5925_v42  ;;  %v2348_v45 = vadd.f32 %v2347_v29, %v2247_v16 }
 0x82b   : > { %v5930_v50 = vadd.f32 %v2346_v49, %v7179_v0 }
 0x82c   : > { %v5933_v59 = vadd.f32 %v2348_v45, %v7181_v14 }
 0x82d   : > { %7180 = vst [vmem:[#allocation24_spill] sm:$0xff] %v5930_v50  ;;  %v2360_v8 = vadd.f32 %v2359_v27, %v5930_v50 }
 0x82e   : > { %7182 = vst [vmem:[#allocation25_spill] sm:$0xff] %v5933_v59  ;;  %v2369_v2 = vadd.f32 %v2368_v34, %v5933_v59 }
 0x82f   : > { %v2361_v39 = vrot.slane %v2360_v8, 4 }
 0x830   : > { %v2370_v35 = vrot.slane %v2369_v2, 4 }
 0x831   : > { %v2362_v3 = vadd.f32 %v2361_v39, %v2360_v8 }
 0x832   : > { %v2371_v37 = vadd.f32 %v2370_v35, %v2369_v2 }
 0x833   : > { %v2363_v22 = vrot.slane %v2362_v3, 2 }
 0x834   : > { %v2372_v13 = vrot.slane %v2371_v37, 2 }
 0x835   : > { %v2364_v60 = vadd.f32 %v2363_v22, %v2362_v3 }
 0x836   : > { %v2373_v4 = vadd.f32 %v2372_v13, %v2371_v37 }
 0x837   : > { %v2365_v30 = vrot.slane %v2364_v60, 1 }
 0x838   : > { %v2374_v31 = vrot.slane %v2373_v4, 1 }
 0x839   : > { %v2366_v23 = vadd.f32 %v2365_v30, %v2364_v60 }
 0x83a   : > { %v2375_v9 = vadd.f32 %v2374_v31, %v2373_v4 }
 0x83b   : > { %v2376_v51 = vmul.f32 0.03125, %v2366_v23 }
 0x83c   : > { %v2377_v24 = vmul.f32 0.03125, %v2375_v9 }
 0x83d   : > { %v2378_v32 = vsub.f32 %v5906_v19, %v2376_v51  ;;  %v2380_v46 = vsub.f32 %v5909_v41, %v2376_v51  ;;  %v2382_v5 = vsub.f32 %v5922_v25, %v2376_v51  ;;  %v2384_v21 = vsub.f32 %v5930_v50, %v2376_v51 }
 0x83e   : > { %v2379_v52 = vsub.f32 %v5912_v40, %v2377_v24  ;;  %v2381_v61 = vsub.f32 %v5915_v33, %v2377_v24  ;;  %v2383_v44 = vsub.f32 %v5925_v42, %v2377_v24  ;;  %v2385_v1 = vsub.f32 %v5933_v59, %v2377_v24 }
 0x83f   : > { %v2386_v18 = vmul.f32 %v2378_v32, %v2378_v32  ;;  %v2388_v43 = vmul.f32 %v2380_v46, %v2380_v46  ;;  %v2390_v62 = vmul.f32 %v2382_v5, %v2382_v5  ;;  %v2392_v38 = vmul.f32 %v2384_v21, %v2384_v21 }
 0x840   : > { %v2387_v54 = vmul.f32 %v2379_v52, %v2379_v52  ;;  %v2389_v47 = vmul.f32 %v2381_v61, %v2381_v61  ;;  %v2391_v28 = vmul.f32 %v2383_v44, %v2383_v44  ;;  %v2393_v58 = vmul.f32 %v2385_v1, %v2385_v1 }
 0x841   : > { %v2394_v7 = vadd.f32 %v2388_v43, %v2386_v18 }
 0x842   : > { %v2403_v36 = vadd.f32 %v2389_v47, %v2387_v54 }
 0x843   : > { %v2395_v48 = vadd.f32 %v2394_v7, %v2390_v62 }
 0x844   : > { %v2404_v63 = vadd.f32 %v2403_v36, %v2391_v28 }
 0x845   : > { %v2396_v20 = vadd.f32 %v2395_v48, %v2392_v38 }
 0x846   : > { %v2405_v6 = vadd.f32 %v2404_v63, %v2393_v58 }
 0x847   : > { %v2397_v56 = vrot.slane %v2396_v20, 4 }
 0x848   : > { %v2406_v26 = vrot.slane %v2405_v6, 4 }
 0x849   : > { %v2398_v55 = vadd.f32 %v2397_v56, %v2396_v20 }
 0x84a   : > { %v2407_v11 = vadd.f32 %v2406_v26, %v2405_v6 }
 0x84b   : > { %v2399_v57 = vrot.slane %v2398_v55, 2 }
 0x84c   : > { %v2408_v15 = vrot.slane %v2407_v11, 2 }
 0x84d   : > { %v2400_v53 = vadd.f32 %v2399_v57, %v2398_v55 }
 0x84e   : > { %v2409_v16 = vadd.f32 %v2408_v15, %v2407_v11 }
 0x84f   : > { %v2401_v10 = vrot.slane %v2400_v53, 1 }
 0x850   : > { %v2410_v12 = vrot.slane %v2409_v16, 1 }
 0x851   : > { %v2402_v27 = vadd.f32 %v2401_v10, %v2400_v53 }
 0x852   : > { %v2411_v49 = vadd.f32 %v2410_v12, %v2409_v16 }
 0x853   : > { %v2412_v29 = vmul.f32 0.03125, %v2402_v27 }
 0x854   : > { %v2413_v34 = vmul.f32 0.03125, %v2411_v49 }
 0x855   : > { %v2414_v45 = vadd.f32 1e-05, %v2412_v29 }
 0x856   : > { %v2415_v0 = vadd.f32 1e-05, %v2413_v34 }
 0x857   : > { %4411 = vrsqrt.f32 %v2414_v45 }
 0x858   : > { %4413 = vrsqrt.f32 %v2415_v0 }
 0x861   : > { %v4412_v14 = vpop.eup %4411 }
 0x862   : > { %v4414_v8 = vpop.eup %4413  ;;  %v5945_v2 = vmul.f32 %v4412_v14, %v2378_v32  ;;  %v5947_v39 = vmul.f32 %v4412_v14, %v2380_v46  ;;  %v5949_v35 = vmul.f32 %v4412_v14, %v2382_v5  ;;  %v5951_v3 = vmul.f32 %v4412_v14, %v2384_v21 }
 0x863   : > { %v5953_v37 = vmul.f32 %v4414_v8, %v2379_v52  ;;  %v5955_v22 = vmul.f32 %v4414_v8, %v2381_v61  ;;  %v5957_v13 = vmul.f32 %v4414_v8, %v2383_v44  ;;  %v5959_v60 = vmul.f32 %v4414_v8, %v2385_v1 }
 0x864   : > { %7183 = vst [vmem:[#allocation10_spill] sm:$0xff] %v5945_v2  ;;  %7184 = vst [vmem:[#allocation12_spill] sm:$0xff] %v5947_v39 }
 0x865   : > { %7185 = vst [vmem:[#allocation11_spill] sm:$0xff] %v5949_v35  ;;  %7186 = vst [vmem:[#allocation13_spill] sm:$0xff] %v5951_v3 }
 0x866   : > { %7187 = vst [vmem:[#allocation14_spill] sm:$0xff] %v5953_v37  ;;  %7188 = vst [vmem:[#allocation15_spill] sm:$0xff] %v5955_v22 }
 0x867   : > { %7189 = vst [vmem:[#allocation16_spill] sm:$0xff] %v5957_v13  ;;  %7190 = vst [vmem:[#allocation17_spill] sm:$0xff] %v5959_v60 }
 0x868 LB: >> { %v4624_v31 = vmov 0   ;;  %v4625_v23 = vmov 4   ;;  %s5973_s19 = sshll.u32 %s4566_s23, 5  ;;  %v4626_v46 = vmov 0.0   ;;  %v2655_v28 = vld [vmem:[%s7051_s15] sm:$0x3]  ;;  %s4566_s23 = sphi %s5961_s23, %s2431_s23  }
 0x869   : >> { %4415 = vset.pattern.permute.xlu1 %v4624_v31  ;;  %4416 = vset.pattern.permute.xlu0 %v4625_v23  ;;  %s5979_s18 = scalar_lea.vmem %s7046_s10, %s5973_s19  ;;  %s5988_s26 = scalar_lea.vmem %s7047_s11, %s5973_s19  ;;  %v7199_v38 = vld [vmem:[#allocation26_spill] sm:$0xff]  ;;  %v7200_v63 = vld [vmem:[#allocation27_spill] sm:$0xff]  ;;  %v4629_v26 = vmov 1   ;;  %v4631_v15 = vmov 2   ;;  %v4633_v12 = vmov 3   ;;  %v4635_v34 = vmov 5  }
 0x86a   : >> { %v2441_v24 = vld [vmem:[%s5979_s18 + $0x10] sm:$0xff]  ;;  %v5991_v32 = vld [vmem:[%s5988_s26] sm:$0xff]  ;;  %2539 = vmatprep.mubr.f32.mxu0 %v4626_v46  ;;  %s2433_s28 = scalar_lea.vmem %s7045_s9, %s5973_s19  ;;  %2551 = vmatprep.mubr.f32.mxu1 %v4626_v46  ;;  %v2442_v5 = vld [vmem:[%s5979_s18 + $0x18] sm:$0xff]  ;;  %s2610_s20 = scalar_lea.vmem %s7048_s12, %s5973_s19  ;;  %v2660_v48 = vrot.slane %v2655_v28, %v7199_v38  ;;  %v2664_v20 = vrot.slane %v2655_v28, %v7200_v63  ;;  %v4636_v0 = vmov 6  }
 0x86b   : >> { %v7193_v2 = vld [vmem:[#allocation10_spill] sm:$0xff]  ;;  %v7194_v39 = vld [vmem:[#allocation12_spill] sm:$0xff]  ;;  %2455 = vperm.xlu1 %4415, %v2441_v24   ;;  %2584 = vperm.xlu0 %4416, %v5991_v32   ;;  %v6000_v21 = vld [vmem:[%s5988_s26 + $0x18] sm:$0xff]  ;;  %s7098_s29 = smov 112   ;;  %s4634_s27 = smov 1  }
 0x86c   : >> { %v4156_v30 = vpack.c.bf16 %v7194_v39, %v7193_v2  ;;  %v7197_v35 = vld [vmem:[#allocation11_spill] sm:$0xff]  ;;  %v7198_v3 = vld [vmem:[#allocation13_spill] sm:$0xff]  ;;  %v2434_v52 = vld [vmem:[%s2433_s28] sm:$0xff]  ;;  %s2564_s2 = sshra.s32 %s5973_s19, 3  ;;  %s4637_s19 = smov 17  }
 0x86d   : >> { %v7191_v37 = vld [vmem:[#allocation14_spill] sm:$0xff]  ;;  %v7192_v22 = vld [vmem:[#allocation15_spill] sm:$0xff]  ;;  %v4160_v51 = vpack.c.bf16 %v7198_v3, %v7197_v35  ;;  %v2436_v61 = vld [vmem:[%s2433_s28 + $0x10] sm:$0xff]  ;;  %s2431_s23 = sadd.s32 1, %s4566_s23  }
 0x86e   : >> { %v4154_v4 = vpack.c.bf16 %v7192_v22, %v7191_v37  ;;  %v7195_v13 = vld [vmem:[#allocation16_spill] sm:$0xff]  ;;  %v7196_v60 = vld [vmem:[#allocation17_spill] sm:$0xff]  ;;  %v6006_v44 = vld [vmem:[%s5988_s26 + $0x8] sm:$0xff]  ;;  %p2428_p12 = scmp.ge.s32.totalorder %s2431_s23, 4  }
 0x86f   : >> { %v4158_v9 = vpack.c.bf16 %v7196_v60, %v7195_v13  ;;  %2460 = vperm.xlu1 %4415, %v2442_v5   ;;  %2599 = vperm.xlu0 %4416, %v6000_v21   ;;  %v2435_v1 = vld [vmem:[%s2433_s28 + $0x8] sm:$0xff]  ;;  %v2437_v18 = vld [vmem:[%s2433_s28 + $0x18] sm:$0xff]  ;;  %v2439_v43 = vld [vmem:[%s5979_s18] sm:$0xff]  ;;  %s7100_s28 = smov 113  }
 0x870   : >> { %4155 = vmatprep.subr.bf16.mxu0 %v4154_v4  ;;  %4178 = vmatprep.subr.bf16.mxu1 %v4154_v4  ;;  %v6013_v54 = vld [vmem:[%s5988_s26 + $0x10] sm:$0xff]  ;;  %v2440_v47 = vld [vmem:[%s5979_s18 + $0x8] sm:$0xff]  ;;  %v2611_v62 = vld [vmem:[%s2610_s20] sm:$0xff]  ;;  %s7086_s18 = smov 111   ;;  %s4118_s26 = sshll.u32 %s2564_s2, 5 }
 0x871   : >> { %4157 = vmatpush1.bf16.msra.mxu0 %v4156_v30  ;;  %4180 = vmatpush1.bf16.msra.mxu1 %v4156_v30  ;;  %v2612_v7 = vld [vmem:[%s2610_s20 + $0x8] sm:$0xff]  ;;  %v2613_v36 = vld [vmem:[%s2610_s20 + $0x10] sm:$0xff]  ;;  %v2614_v58 = vld [vmem:[%s2610_s20 + $0x18] sm:$0xff]  ;;  %s4632_s20 = smov 127   ;;  %s4638_s2 = smov 16  }
 0x872   : >> { %4159 = vmatprep.subr.bf16.mxu0 %v4158_v9  ;;  %4179 = vmatprep.subr.bf16.mxu1 %v4158_v9  ;;  %v4095_v6 = vld [vmem:[%s7051_s15 + $0x2] sm:$0x3]  ;;  %v4096_v11 = vld [vmem:[%s7051_s15 + $0x4] sm:$0x3]  ;;  %v4097_v53 = vld [vmem:[%s7051_s15 + $0x6] sm:$0x3] }
 0x873   : >> { %4417 = vset.pattern.permute.xlu1 %v4625_v23  ;;  %4418 = vset.pattern.permute.xlu0 %v4624_v31  ;;  %v2781_v56 = vrot.slane %v4095_v6, %v7199_v38  ;;  %v2785_v55 = vrot.slane %v4095_v6, %v7200_v63  ;;  %v2906_v57 = vrot.slane %v4096_v11, %v7200_v63  ;;  %v4098_v27 = vld [vmem:[%s7051_s15 + $0x8] sm:$0x3] }
 0x874   : >> { %2589 = vperm.xlu1 %4417, %v6006_v44   ;;  %2445 = vperm.xlu0 %4418, %v2439_v43   ;;  %v2902_v16 = vrot.slane %v4096_v11, %v7199_v38  ;;  %v3023_v10 = vrot.slane %v4097_v53, %v7199_v38  ;;  %v3160_v49 = vrot.slane %v4098_v27, %v7200_v63 }
 0x875   : >> { %4161 = vmatpush1.bf16.msra.mxu0 %v4160_v51  ;;  %4181 = vmatpush1.bf16.msra.mxu1 %v4160_v51  ;;  %v3027_v29 = vrot.slane %v4097_v53, %v7200_v63  ;;  %v3156_v45 = vrot.slane %v4098_v27, %v7199_v38 }
 0x878   : >> { %4089 = vmatmul.mubr.msk.f32.vlgmr.msra.gmra.mrb[0].mxu0 %vm690_vm0, %v2434_v52  ;;  %4091 = vmatmul.mubr.msk.f32.vlgmr.msra.gmra.mrb[0].mxu1 %vm690_vm0, %v2436_v61 }
 0x879   : >> { %2545 = vmatprep.mubr.f32.mxu0 %v4626_v46  ;;  %2557 = vmatprep.mubr.f32.mxu1 %v4626_v46 }
 0x87a   : >> { %2594 = vperm.xlu1 %4417, %v6013_v54   ;;  %2450 = vperm.xlu0 %4418, %v2440_v47  }
 0x87c   : >> { %4090 = vmatmul.mubr.msk.f32.gmra.mrb[2].mxu0 %vm690_vm0, %v2435_v1  ;;  %4092 = vmatmul.mubr.msk.f32.gmra.mrb[2].mxu1 %vm690_vm0, %v2437_v18 }
 0x87e   : >> { %4419 = vset.pattern.permute.xlu1 %v4624_v31  ;;  %2622 = vperm.xlu0 %4418, %v2612_v7  }
 0x87f   : >> { %2617 = vperm.xlu1 %4419, %v2611_v62  }
 0x882   : >> { %2665 = vrot.lane.b32.xlu0 %v2660_v48, %s7086_s18 }
 0x883   : >> { %2627 = vperm.xlu1 %4419, %v2613_v36  }
 0x886   : >> { %2687 = vperm.xlu0 %4418, %v5991_v32  }
 0x887   : >> { %2632 = vperm.xlu1 %4419, %v2614_v58  }
 0x88a   : >> { %2695 = vperm.xlu0 %4418, %v6013_v54  }
 0x88b   : >> { %2667 = vrot.lane.b32.xlu1 %v2664_v20, %s7086_s18  ;;  %s6097_s18 = scalar_lea.vmem [#allocation3], %s4118_s26  ;;  %s4639_s26 = smov 15  }
 0x88c   : >> { %v6100_v5 = vld [vmem:[%s6097_s18] sm:$0xff]  ;;  %v6236_v37 = vld [vmem:[%s6097_s18 + $0x58] sm:$0xff] }
 0x88d   : >> { %v6109_v18 = vld [vmem:[%s6097_s18 + $0x40] sm:$0xff]  ;;  %7205 = vst [vmem:[#allocation39_spill] sm:$0xff] %v6236_v37  ;;  %v6246_v59 = vld [vmem:[%s6097_s18 + $0x78] sm:$0xff] }
 0x88e   : >> { %2786 = vrot.lane.b32.xlu0 %v2781_v56, %s7098_s29  ;;  %v2646_v36 = vld [vmem:[%s6097_s18 + $0x20] sm:$0xff]  ;;  %7206 = vst [vmem:[#allocation40_spill] sm:$0xff] %v6246_v59 }
 0x88f   : >> { %2691 = vperm.xlu1 %4419, %v6006_v44   ;;  %4420 = vset.pattern.permute.xlu0 %v4629_v26  ;;  %v2652_v56 = vld [vmem:[%s6097_s18 + $0x60] sm:$0xff] }
 0x892   : >> { %2808 = vperm.xlu0 %4420, %v5991_v32  }
 0x893   : >> { %2699 = vperm.xlu1 %4419, %v6000_v21  }
 0x896   : >> { %2820 = vperm.xlu0 %4420, %v6000_v21  }
 0x897   : >> { %2788 = vrot.lane.b32.xlu1 %v2785_v55, %s7098_s29 }
 0x898   : >> { %4421 = vset.pattern.permute.xlu1 %v4629_v26 }
 0x89a   : >> { %2909 = vrot.lane.b32.xlu0 %v2906_v57, %s7100_s28 }
 0x89b   : >> { %2812 = vperm.xlu1 %4421, %v6006_v44   ;;  %4423 = vset.pattern.permute.xlu0 %v4631_v15 }
 0x89e   : >> { %2933 = vperm.xlu0 %4423, %v6006_v44  }
 0x89f   : >> { %2816 = vperm.xlu1 %4421, %v6013_v54  }
 0x8a2   : >> { %3028 = vrot.lane.b32.xlu0 %v3023_v10, %s4632_s20 }
 0x8a3   : >> { %2907 = vrot.lane.b32.xlu1 %v2902_v16, %s7100_s28  ;;  %4424 = vset.pattern.permute.xlu0 %v4633_v12 }
 0x8a4   : >> { %4422 = vset.pattern.permute.xlu1 %v4631_v15 }
 0x8a6   : >> { %3050 = vperm.xlu0 %4424, %v5991_v32  }
 0x8a7   : >> { %2929 = vperm.xlu1 %4422, %v5991_v32  }
 0x8aa   : >> { %3062 = vperm.xlu0 %4424, %v6000_v21  }
 0x8ab   : >> { %2937 = vperm.xlu1 %4422, %v6013_v54  }
 0x8ae   : >> { %3163 = vrot.lane.b32.xlu0 %v3160_v49, %s4634_s27 }
 0x8af   : >> { %2941 = vperm.xlu1 %4422, %v6000_v21   ;;  %4427 = vset.pattern.permute.xlu0 %v4635_v34 }
 0x8b2   : >> { %3186 = vperm.xlu0 %4427, %v6006_v44  }
 0x8b3   : >> { %3030 = vrot.lane.b32.xlu1 %v3027_v29, %s4632_s20 }
 0x8b4   : >> { %4425 = vset.pattern.permute.xlu1 %v4633_v12 }
 0x8b6   : >> { %4428 = vset.pattern.permute.xlu0 %v4636_v0 }
 0x8b7   : >> { %3054 = vperm.xlu1 %4425, %v6006_v44  }
 0x8bb   : >> { %3058 = vperm.xlu1 %4425, %v6013_v54  }
 0x8bf   : >> { %3161 = vrot.lane.b32.xlu1 %v3156_v45, %s4634_s27 }
 0x8c0   : >> { %4426 = vset.pattern.permute.xlu1 %v4635_v34 }
 0x8c3   : >> { %3182 = vperm.xlu1 %4426, %v5991_v32  }
 0x8c7   : >> { %3190 = vperm.xlu1 %4426, %v6013_v54  }
 0x8cb   : >> { %3194 = vperm.xlu1 %4426, %v6000_v21  }
 0x8cf   : >> { %4429 = vset.pattern.permute.xlu1 %v4636_v0 }
 0x8ea   : >> { %v6076_v14 = vpop.permute.xlu1 %2455  ;;  %v6078_v8 = vpop.permute.xlu0 %2584 }
 0x8ee   : >> { %v6080_v4 = vpop.permute.xlu1 %2460  ;;  %v6082_v30 = vpop.permute.xlu0 %2599 }
 0x8ef   : >> { %7201 = vst [vmem:[#allocation35_spill] sm:$0xff] %v6082_v30 }
 0x8f3   : >> { %v6084_v31 = vpop.permute.xlu1 %2589  ;;  %v6086_v23 = vpop.permute.xlu0 %2445 }
 0x8f4   : >> { %7202 = vst [vmem:[#allocation36_spill] sm:$0xff] %v6084_v31 }
 0x8f9   : >> { %v6089_v9 = vpop.permute.xlu1 %2594  ;;  %v6091_v51 = vpop.permute.xlu0 %2450 }
 0x8fd   : >> { %v6095_v46 = vpop.permute.xlu0 %2622 }
 0x8fe   : >> { %v6093_v24 = vpop.permute.xlu1 %2617  ;;  %7203 = vst [vmem:[#allocation37_spill] sm:$0xff] %v6095_v46 }
 0x901   : >> { %v6104_v61 = vpop.permute.xlu0 %2665 }
 0x902   : >> { %v6102_v52 = vpop.permute.xlu1 %2627  ;;  %v2674_v1 = vmul.f32 %v6104_v61, %v6100_v5  ;;  %v2680_v7 = vmul.f32 %v6104_v61, %v6109_v18  ;;  %v2677_v20 = vmul.f32 %v6104_v61, %v2646_v36  ;;  %v2683_v11 = vmul.f32 %v6104_v61, %v2652_v56 }
 0x905   : >> { %v6113_v47 = vpop.permute.xlu0 %2687 }
 0x906   : >> { %v6111_v43 = vpop.permute.xlu1 %2632  ;;  %v2702_v62 = vmul.f32 %v6113_v47, %v2674_v1 }
 0x907   : >> { %7204 = vst [vmem:[#allocation38_spill] sm:$0xff] %v6111_v43  ;;  %v4640_v43 = vmov 7  }
 0x908   : >> { %2726 = vrot.lane.b32.xlu0 %v2702_v62, %s4637_s19 }
 0x909   : >> { %v6122_v48 = vpop.permute.xlu0 %2695 }
 0x90a   : >> { %v6119_v28 = vpop.permute.xlu1 %2667  ;;  %v2708_v58 = vmul.f32 %v6122_v48, %v2680_v7 }
 0x90c   : >> { %2738 = vrot.lane.b32.xlu0 %v2708_v58, %s4637_s19 }
 0x90d   : >> { %v6130_v26 = vpop.permute.xlu0 %2786 }
 0x90e   : >> { %v6127_v6 = vpop.permute.xlu1 %2691  ;;  %v2795_v57 = vmul.f32 %v6130_v26, %v6100_v5  ;;  %v2798_v49 = vmul.f32 %v6130_v26, %v2646_v36  ;;  %v2804_v0 = vmul.f32 %v6130_v26, %v2652_v56  ;;  %v2801_v1 = vmul.f32 %v6130_v26, %v6109_v18 }
 0x90f   : >> { %v2705_v55 = vmul.f32 %v6127_v6, %v2677_v20 }
 0x911   : >> { %2732 = vrot.lane.b32.xlu1 %v2705_v55, %s4637_s19  ;;  %v6139_v53 = vpop.permute.xlu0 %2808 }
 0x912   : >> { %v6137_v15 = vpop.permute.xlu1 %2699  ;;  %v2823_v10 = vmul.f32 %v6139_v53, %v2795_v57 }
 0x913   : >> { %v2711_v16 = vmul.f32 %v6137_v15, %v2683_v11 }
 0x915   : >> { %2744 = vrot.lane.b32.xlu1 %v2711_v16, %s4637_s19  ;;  %v6146_v27 = vpop.permute.xlu0 %2820 }
 0x916   : >> { %v6144_v12 = vpop.permute.xlu1 %2788  ;;  %v2832_v58 = vmul.f32 %v6146_v27, %v2804_v0 }
 0x919   : >> { %2847 = vrot.lane.b32.xlu1 %v2823_v10, %s4638_s2  ;;  %v6152_v34 = vpop.permute.xlu0 %2909 }
 0x91a   : >> { %v6150_v29 = vpop.permute.xlu1 %2812 }
 0x91b   : >> { %v2826_v45 = vmul.f32 %v6150_v29, %v2798_v49 }
 0x91d   : >> { %2853 = vrot.lane.b32.xlu0 %v2826_v45, %s4638_s2  ;;  %v6163_v20 = vpop.permute.xlu0 %2933 }
 0x91e   : >> { %v6159_v62 = vpop.permute.xlu1 %2816 }
 0x91f   : >> { %v2829_v7 = vmul.f32 %v6159_v62, %v2801_v1 }
 0x921   : >> { %2859 = vrot.lane.b32.xlu1 %v2829_v7, %s4638_s2  ;;  %2865 = vrot.lane.b32.xlu0 %v2832_v58, %s4638_s2  ;;  %v6173_v10 = vpop.permute.xlu0 %3028 }
 0x922   : >> { %v6167_v55 = vpop.permute.xlu1 %2907 }
 0x923   : >> { %v2919_v11 = vmul.f32 %v6167_v55, %v2646_v36  ;;  %v2916_v16 = vmul.f32 %v6167_v55, %v6100_v5  ;;  %v2922_v0 = vmul.f32 %v6167_v55, %v6109_v18 }
 0x925   : >> { %v2947_v57 = vmul.f32 %v6163_v20, %v2919_v11  ;;  %v6185_v58 = vpop.permute.xlu0 %3050  ;;  %v2925_v11 = vmul.f32 %v6167_v55, %v2652_v56 }
 0x926   : >> { %v6175_v49 = vpop.permute.xlu1 %2929 }
 0x927   : >> { %2974 = vrot.lane.b32.xlu1 %v2947_v57, %s4639_s26  ;;  %v2944_v45 = vmul.f32 %v6175_v49, %v2916_v16  ;;  %v3037_v16 = vmul.f32 %v6173_v10, %v6100_v5  ;;  %v3046_v5 = vmul.f32 %v6173_v10, %v2652_v56 }
 0x929   : >> { %2968 = vrot.lane.b32.xlu0 %v2944_v45, %s4639_s26  ;;  %v6195_v45 = vpop.permute.xlu0 %3062 }
 0x92a   : >> { %v6182_v1 = vpop.permute.xlu1 %2937  ;;  %v3074_v22 = vmul.f32 %v6195_v45, %v3046_v5 }
 0x92b   : >> { %v2950_v7 = vmul.f32 %v6182_v1, %v2922_v0  ;;  %v3065_v0 = vmul.f32 %v6185_v58, %v3037_v16  ;;  %v3043_v16 = vmul.f32 %v6173_v10, %v6109_v18 }
 0x92d   : >> { %2980 = vrot.lane.b32.xlu0 %v2950_v7, %s4639_s26  ;;  %v3040_v7 = vmul.f32 %v6173_v10, %v2646_v36  ;;  %v6202_v3 = vpop.permute.xlu0 %3163 }
 0x92e   : >> { %v6189_v17 = vpop.permute.xlu1 %2941  ;;  %v3177_v39 = vmul.f32 %v6202_v3, %v6236_v37 }
 0x92f   : >> { %v2953_v57 = vmul.f32 %v6189_v17, %v2925_v11 }
 0x931   : >> { %2986 = vrot.lane.b32.xlu1 %v2953_v57, %s4639_s26  ;;  %v6209_v57 = vld [vmem:[%s6097_s18 + $0x38] sm:$0xff] }
 0x932   : >> { %v6197_v2 = vpop.permute.xlu1 %3030  ;;  %v3174_v35 = vmul.f32 %v6202_v3, %v6209_v57 }
 0x935   : >> { %3089 = vrot.lane.b32.xlu1 %v3065_v0, %s4634_s27 }
 0x936   : >> { %v6204_v13 = vpop.permute.xlu1 %3054 }
 0x937   : >> { %v3068_v11 = vmul.f32 %v6204_v13, %v3040_v7  ;;  %v6220_v7 = vpop.permute.xlu0 %3186 }
 0x938   : >> { %v3202_v18 = vmul.f32 %v6220_v7, %v3174_v35 }
 0x939   : >> { %3095 = vrot.lane.b32.xlu0 %v3068_v11, %s4634_s27  ;;  %v6227_v11 = vld [vmem:[%s6097_s18 + $0x18] sm:$0xff] }
 0x93a   : >> { %v6214_v0 = vpop.permute.xlu1 %3058  ;;  %v3171_v5 = vmul.f32 %v6202_v3, %v6227_v11 }
 0x93b   : >> { %v3071_v36 = vmul.f32 %v6214_v0, %v3043_v16 }
 0x93d   : >> { %3101 = vrot.lane.b32.xlu1 %v3071_v36, %s4634_s27  ;;  %3107 = vrot.lane.b32.xlu0 %v3074_v22, %s4634_s27 }
 0x93e   : >> { %v6224_v56 = vpop.permute.xlu1 %3161 }
 0x941   : >> { %3231 = vrot.lane.b32.xlu1 %v3202_v18, %s4632_s20 }
 0x942   : >> { %v6233_v16 = vpop.permute.xlu1 %3182 }
 0x943   : >> { %v3199_v36 = vmul.f32 %v6233_v16, %v3171_v5 }
 0x945   : >> { %3225 = vrot.lane.b32.xlu0 %v3199_v36, %s4632_s20  ;;  %v3180_v36 = vmul.f32 %v6202_v3, %v6246_v59  ;;  %v4641_v59 = vmov 8  }
 0x946   : >> { %v6242_v33 = vpop.permute.xlu1 %3190 }
 0x947   : >> { %v3205_v41 = vmul.f32 %v6242_v33, %v3177_v39 }
 0x949   : >> { %3237 = vrot.lane.b32.xlu0 %v3205_v41, %s4632_s20  ;;  %v4099_v41 = vld [vmem:[%s7051_s15 + $0xa] sm:$0x3] }
 0x94a   : >> { %v6255_v40 = vpop.permute.xlu1 %3194 }
 0x94b   : >> { %v2541_v22 = vpop.f32.mrb[0].mxu0  ;;  %v2553_v60 = vpop.f32.mrb[0].mxu1  ;;  %v3208_v25 = vmul.f32 %v6255_v40, %v3180_v36  ;;  %v3275_v36 = vrot.slane %v4099_v41, %v7199_v38 }
 0x94c   : >> { %v2543_v35 = vpop.f32.mrb[1].mxu0  ;;  %v2555_v18 = vpop.f32.mrb[1].mxu1  ;;  %v6270_v39 = vadd.f32 %v2541_v22, %v6086_v23  ;;  %v6281_v30 = vadd.f32 %v2553_v60, %v6076_v14  ;;  %v6295_v60 = vsel %vm1260_vm2, %v6173_v10, %v6197_v2  ;;  %v2670_v10 = vsel %vm897_vm3, %v6104_v61, %v6119_v28 }
 0x94d   : >> { %3301 = vperm.xlu0 %4428, %v5991_v32   ;;  %3243 = vrot.lane.b32.xlu1 %v3208_v25, %s4632_s20  ;;  %v6278_v25 = vsel %vm1018_vm1, %v6130_v26, %v6144_v12  ;;  %v6320_v61 = vadd.f32 %v2543_v35, %v6086_v23  ;;  %v6333_v23 = vadd.f32 %v2555_v18, %v6076_v14 }
 0x94e   : >> { %v2796_v22 = vmul.f32 %v6278_v25, %v6270_v39  ;;  %v2802_v31 = vmul.f32 %v6278_v25, %v6281_v30  ;;  %v3038_v26 = vmul.f32 %v6295_v60, %v6270_v39  ;;  %v2681_v37 = vmul.f32 %v2670_v10, %v6281_v30 }
 0x94f   : >> { %v6249_v50 = vpop.f32.mrb[2].mxu0  ;;  %v6251_v5 = vpop.f32.mrb[2].mxu1  ;;  %v2797_v18 = vmul.f32 %v6144_v12, %v6320_v61 }
 0x950   : >> { %v6257_v19 = vpop.f32.mrb[3].mxu0  ;;  %v6259_v42 = vpop.f32.mrb[3].mxu1  ;;  %v2824_v46 = vmul.f32 %v6139_v53, %v2796_v22  ;;  %v3044_v22 = vmul.f32 %v6295_v60, %v6281_v30 }
 0x951   : >> { %3313 = vperm.xlu0 %4428, %v6000_v21   ;;  %3305 = vperm.xlu1 %4429, %v6006_v44  }
 0x955   : >> { %4431 = vset.pattern.permute.xlu0 %v4640_v43  ;;  %3309 = vperm.xlu1 %4429, %v6013_v54  }
 0x956   : >> { %3424 = vperm.xlu0 %4431, %v6006_v44  }
 0x959   : >> { %4430 = vset.pattern.permute.xlu1 %v4640_v43  ;;  %v2830_v43 = vmul.f32 %v6159_v62, %v2802_v31  ;;  %v2675_v31 = vmul.f32 %v2670_v10, %v6270_v39 }
 0x95a   : >> { %3280 = vrot.lane.b32.xlu0 %v3275_v36, %s4639_s26  ;;  %3420 = vperm.xlu1 %4430, %v5991_v32   ;;  %v3279_v36 = vrot.slane %v4099_v41, %v7200_v63  ;;  %v3169_v41 = vmul.f32 %v6224_v56, %v6270_v39 }
 0x95b   : >> { %4432 = vset.pattern.permute.xlu0 %v4641_v59 }
 0x95e   : >> { %2849 = vrot.lane.b32.xlu0 %v2824_v46, %s4638_s2  ;;  %3428 = vperm.xlu1 %4430, %v6013_v54   ;;  %v3066_v46 = vmul.f32 %v6185_v58, %v3038_v26  ;;  %v2703_v26 = vmul.f32 %v6113_v47, %v2675_v31 }
 0x962   : >> { %2861 = vrot.lane.b32.xlu0 %v2830_v43, %s4638_s2  ;;  %3432 = vperm.xlu1 %4430, %v6000_v21   ;;  %v3072_v43 = vmul.f32 %v6214_v0, %v3044_v22  ;;  %v2709_v22 = vmul.f32 %v6122_v48, %v2681_v37 }
 0x966   : >> { %3091 = vrot.lane.b32.xlu0 %v3066_v46, %s4634_s27  ;;  %3282 = vrot.lane.b32.xlu1 %v3279_v36, %s4639_s26  ;;  %v3197_v46 = vmul.f32 %v6233_v16, %v3169_v41  ;;  %v3175_v36 = vmul.f32 %v6224_v56, %v6281_v30 }
 0x967   : >> { %4433 = vset.pattern.permute.xlu1 %v4641_v59  ;;  %v2912_v59 = vsel %vm1139_vm4, %v6167_v55, %v6152_v34 }
 0x968   : >> { %v2917_v31 = vmul.f32 %v2912_v59, %v6270_v39  ;;  %v3203_v35 = vmul.f32 %v6242_v33, %v3175_v36  ;;  %v2923_v55 = vmul.f32 %v2912_v59, %v6281_v30  ;;  %v2918_v36 = vmul.f32 %v6152_v34, %v6320_v61 }
 0x96a   : >> { %3103 = vrot.lane.b32.xlu0 %v3072_v43, %s4634_s27  ;;  %2728 = vrot.lane.b32.xlu1 %v2703_v26, %s4637_s19  ;;  %v2676_v43 = vmul.f32 %v6119_v28, %v6320_v61  ;;  %v2945_v41 = vmul.f32 %v6175_v49, %v2917_v31  ;;  %v2682_v26 = vmul.f32 %v6119_v28, %v6333_v23 }
 0x96b   : >> { %v2951_v14 = vmul.f32 %v6182_v1, %v2923_v55  ;;  %v6360_v31 = vadd.f32 %v6249_v50, %v6091_v51 }
 0x96c   : >> { %v2704_v37 = vmul.f32 %v6113_v47, %v2676_v43  ;;  %v2803_v47 = vmul.f32 %v6144_v12, %v6333_v23 }
 0x96e   : >> { %3221 = vrot.lane.b32.xlu0 %v3197_v46, %s4632_s20  ;;  %2740 = vrot.lane.b32.xlu1 %v2709_v22, %s4637_s19  ;;  %v2710_v46 = vmul.f32 %v6122_v48, %v2682_v26  ;;  %v2825_v22 = vmul.f32 %v6139_v53, %v2797_v18  ;;  %v2924_v48 = vmul.f32 %v6152_v34, %v6333_v23 }
 0x96f   : >> { %v2831_v43 = vmul.f32 %v6159_v62, %v2803_v47  ;;  %v3039_v53 = vmul.f32 %v6197_v2, %v6320_v61  ;;  %v3045_v62 = vmul.f32 %v6197_v2, %v6333_v23  ;;  %v2920_v18 = vmul.f32 %v2912_v59, %v6360_v31 }
 0x970   : >> { %v2952_v50 = vmul.f32 %v6182_v1, %v2924_v48  ;;  %v2799_v47 = vmul.f32 %v6278_v25, %v6360_v31  ;;  %v3041_v48 = vmul.f32 %v6295_v60, %v6360_v31 }
 0x971   : >> { %v3067_v55 = vmul.f32 %v6185_v58, %v3039_v53  ;;  %v3073_v1 = vmul.f32 %v6214_v0, %v3045_v62  ;;  %v2948_v0 = vmul.f32 %v6163_v20, %v2920_v18 }
 0x972   : >> { %3233 = vrot.lane.b32.xlu0 %v3203_v35, %s4632_s20  ;;  %2970 = vrot.lane.b32.xlu1 %v2945_v41, %s4639_s26  ;;  %v2946_v35 = vmul.f32 %v6175_v49, %v2918_v36  ;;  %v6372_v41 = vadd.f32 %v6251_v5, %v6080_v4  ;;  %v2678_v49 = vmul.f32 %v2670_v10, %v6360_v31 }
 0x973   : >> { %v3165_v5 = vsel %vm1341_vm5, %v6224_v56, %v6202_v3  ;;  %v6398_v3 = vadd.f32 %v6257_v19, %v6091_v51  ;;  %v3069_v53 = vmul.f32 %v6204_v13, %v3041_v48 }
 0x974   : >> { %v2684_v26 = vmul.f32 %v2670_v10, %v6372_v41  ;;  %v3176_v10 = vmul.f32 %v3165_v5, %v6333_v23  ;;  %v2926_v36 = vmul.f32 %v2912_v59, %v6372_v41  ;;  %v2827_v59 = vmul.f32 %v6150_v29, %v2799_v47 }
 0x975   : >> { %v2800_v51 = vmul.f32 %v6144_v12, %v6398_v3  ;;  %v2679_v18 = vmul.f32 %v6119_v28, %v6398_v3 }
 0x976   : >> { %2730 = vrot.lane.b32.xlu0 %v2704_v37, %s4637_s19  ;;  %2982 = vrot.lane.b32.xlu1 %v2951_v14, %s4639_s26  ;;  %v2706_v37 = vmul.f32 %v6127_v6, %v2678_v49  ;;  %v3170_v14 = vmul.f32 %v3165_v5, %v6320_v61  ;;  %v2712_v58 = vmul.f32 %v6137_v15, %v2684_v26 }
 0x977   : >> { %v2954_v19 = vmul.f32 %v6189_v17, %v2926_v36 }
 0x97a   : >> { %2742 = vrot.lane.b32.xlu0 %v2710_v46, %s4637_s19  ;;  %2851 = vrot.lane.b32.xlu1 %v2825_v22, %s4638_s2  ;;  %v3198_v46 = vmul.f32 %v6233_v16, %v3170_v14  ;;  %v3204_v22 = vmul.f32 %v6242_v33, %v3176_v10  ;;  %v6409_v16 = vadd.f32 %v6259_v42, %v6080_v4 }
 0x97b   : >> { %v2805_v33 = vmul.f32 %v6278_v25, %v6372_v41  ;;  %v2707_v10 = vmul.f32 %v6127_v6, %v2679_v18 }
 0x97c   : >> { %v2806_v42 = vmul.f32 %v6144_v12, %v6409_v16  ;;  %v6433_v12 = vpop.permute.xlu0 %2726  ;;  %v3048_v49 = vmul.f32 %v6197_v2, %v6409_v16 }
 0x97d   : >> { %v2833_v4 = vmul.f32 %v6146_v27, %v2805_v33 }
 0x97e   : >> { %2972 = vrot.lane.b32.xlu0 %v2946_v35, %s4639_s26  ;;  %2863 = vrot.lane.b32.xlu1 %v2831_v43, %s4638_s2  ;;  %v2828_v35 = vmul.f32 %v6150_v29, %v2800_v51  ;;  %v2834_v25 = vmul.f32 %v6146_v27, %v2806_v42  ;;  %v3042_v43 = vmul.f32 %v6197_v2, %v6398_v3 }
 0x97f   : >> { %v3047_v29 = vmul.f32 %v6295_v60, %v6372_v41  ;;  %v3076_v62 = vmul.f32 %v6195_v45, %v3048_v49 }
 0x980   : >> { %v6445_v60 = vpop.permute.xlu0 %2738 }
 0x981   : >> { %v3075_v27 = vmul.f32 %v6195_v45, %v3047_v29 }
 0x982   : >> { %2984 = vrot.lane.b32.xlu0 %v2952_v50, %s4639_s26  ;;  %3093 = vrot.lane.b32.xlu1 %v3067_v55, %s4634_s27  ;;  %v3070_v50 = vmul.f32 %v6204_v13, %v3042_v43  ;;  %v3172_v55 = vmul.f32 %v6224_v56, %v6360_v31  ;;  %v3178_v13 = vmul.f32 %v6224_v56, %v6372_v41 }
 0x983   : >> { %v6451_v26 = vpop.permute.xlu1 %2732 }
 0x984   : >> { %v3200_v2 = vmul.f32 %v6220_v7, %v3172_v55  ;;  %v3206_v45 = vmul.f32 %v6255_v40, %v3178_v13 }
 0x986   : >> { %2734 = vrot.lane.b32.xlu0 %v2706_v37, %s4637_s19  ;;  %3105 = vrot.lane.b32.xlu1 %v3073_v1, %s4634_s27  ;;  %v3173_v37 = vmul.f32 %v3165_v5, %v6398_v3 }
 0x987   : >> { %v6464_v56 = vpop.permute.xlu1 %2744 }
 0x988   : >> { %v3201_v14 = vmul.f32 %v6220_v7, %v3173_v37  ;;  %v2685_v7 = vmul.f32 %v6119_v28, %v6409_v16 }
 0x98a   : >> { %2746 = vrot.lane.b32.xlu0 %v2712_v58, %s4637_s19  ;;  %3223 = vrot.lane.b32.xlu1 %v3198_v46, %s4632_s20  ;;  %v3179_v58 = vmul.f32 %v3165_v5, %v6409_v16  ;;  %v2713_v36 = vmul.f32 %v6137_v15, %v2685_v7  ;;  %v2927_v15 = vmul.f32 %v6152_v34, %v6409_v16 }
 0x98b   : >> { %v6475_v5 = vpop.permute.xlu1 %2847 }
 0x98c   : >> { %v3207_v46 = vmul.f32 %v6255_v40, %v3179_v58  ;;  %v4100_v40 = vld [vmem:[%s7051_s15 + $0xc] sm:$0x3]  ;;  %v2955_v33 = vmul.f32 %v6189_v17, %v2927_v15 }
 0x98d   : >> { %v3394_v17 = vrot.slane %v4100_v40, %v7199_v38 }
 0x98e   : >> { %2976 = vrot.lane.b32.xlu0 %v2948_v0, %s4639_s26  ;;  %3235 = vrot.lane.b32.xlu1 %v3204_v22, %s4632_s20  ;;  %v2921_v22 = vmul.f32 %v6152_v34, %v6398_v3 }
 0x98f   : >> { %v6456_v1 = vpop.permute.xlu0 %2853 }
 0x990   : >> { %v2949_v6 = vmul.f32 %v6163_v20, %v2921_v22 }
 0x992   : >> { %2988 = vrot.lane.b32.xlu0 %v2954_v19, %s4639_s26  ;;  %2855 = vrot.lane.b32.xlu1 %v2827_v59, %s4638_s2  ;;  %v3398_v19 = vrot.slane %v4100_v40, %v7200_v63 }
 0x993   : >> { %v6471_v0 = vpop.permute.xlu0 %2865  ;;  %v6487_v28 = vpop.permute.xlu1 %2859 }
 0x996   : >> { %2857 = vrot.lane.b32.xlu0 %v2828_v35, %s4638_s2  ;;  %2867 = vrot.lane.b32.xlu1 %v2833_v4, %s4638_s2 }
 0x999   : >> { %v6500_v59 = vpop.permute.xlu1 %2974 }
 0x99a   : >> { %2869 = vrot.lane.b32.xlu0 %v2834_v25, %s4638_s2  ;;  %3097 = vrot.lane.b32.xlu1 %v3069_v53, %s4634_s27 }
 0x99b   : >> { %v6480_v47 = vpop.permute.xlu0 %2968 }
 0x99e   : >> { %3099 = vrot.lane.b32.xlu0 %v3070_v50, %s4634_s27  ;;  %3109 = vrot.lane.b32.xlu1 %v3075_v27, %s4634_s27 }
 0x99f   : >> { %v6498_v51 = vpop.permute.xlu0 %2980 }
 0x9a2   : >> { %3111 = vrot.lane.b32.xlu0 %v3076_v62, %s4634_s27  ;;  %3227 = vrot.lane.b32.xlu1 %v3200_v2, %s4632_s20 }
 0x9a3   : >> { %v6508_v20 = vpop.permute.xlu1 %2986 }
 0x9a6   : >> { %3229 = vrot.lane.b32.xlu0 %v3201_v14, %s4632_s20  ;;  %3239 = vrot.lane.b32.xlu1 %v3206_v45, %s4632_s20 }
 0x9a7   : >> { %v6514_v42 = vpop.permute.xlu1 %3089 }
 0x9aa   : >> { %3241 = vrot.lane.b32.xlu0 %v3207_v46, %s4632_s20  ;;  %2736 = vrot.lane.b32.xlu1 %v2707_v10, %s4637_s19  ;;  %v2602_v46 = vmul.f32 %v6078_v8, %v6270_v39 }
 0x9ae   : >> { %3539 = vperm.xlu0 %4432, %v5991_v32   ;;  %2748 = vrot.lane.b32.xlu1 %v2713_v36, %s4637_s19  ;;  %v4101_v32 = vld [vmem:[%s7051_s15 + $0xe] sm:$0x3] }
 0x9af   : >> { %v3517_v34 = vrot.slane %v4101_v32, %v7200_v63  ;;  %v6520_v48 = vpop.permute.xlu1 %3101  ;;  %v3513_v25 = vrot.slane %v4101_v32, %v7199_v38  ;;  %v2606_v32 = vmul.f32 %v6089_v9, %v6281_v30 }
 0x9b1   : >> { %v2639_v63 = vadd.f32 %v6102_v52, %v2606_v32 }
 0x9b2   : >> { %3551 = vperm.xlu0 %4432, %v6000_v21   ;;  %2978 = vrot.lane.b32.xlu1 %v2949_v6, %s4639_s26  ;;  %v6506_v21 = vpop.permute.xlu0 %3095 }
 0x9b6   : >> { %3401 = vrot.lane.b32.xlu0 %v3398_v19, %s4638_s2  ;;  %2990 = vrot.lane.b32.xlu1 %v2955_v33, %s4639_s26  ;;  %v6512_v35 = vpop.permute.xlu0 %3107  ;;  %v2635_v19 = vadd.f32 %v6093_v24, %v2602_v46  ;;  %s7219_s26 = smov 111  }
 0x9ba   : >> { %3520 = vrot.lane.b32.xlu0 %v3517_v34, %s4637_s19  ;;  %3543 = vperm.xlu1 %4433, %v6006_v44   ;;  %v6518_v4 = vpop.permute.xlu0 %3225  ;;  %v6527_v44 = vpop.permute.xlu1 %3231 }
 0x9be   : >> { %3547 = vperm.xlu1 %4433, %v6013_v54   ;;  %v6525_v43 = vpop.permute.xlu0 %3237 }
 0x9bf   : >> { %v6529_v29 = vpop.permute.xlu1 %3243 }
 0x9c2   : >> { %3399 = vrot.lane.b32.xlu1 %v3394_v17, %s4638_s2  ;;  %s7216_s2 = smov 112  }
 0x9c6   : >> { %3518 = vrot.lane.b32.xlu1 %v3513_v25, %s4637_s19  ;;  %s7208_s19 = smov 113  }
 0x9cc   : >> { %v3302_v53 = vpop.permute.xlu0 %3301 }
 0x9d0   : >> { %v6531_v54 = vpop.permute.xlu0 %3313  ;;  %v3306_v50 = vpop.permute.xlu1 %3305 }
 0x9d4   : >> { %v3310_v49 = vpop.permute.xlu1 %3309 }
 0x9d5   : >> { %v6533_v27 = vpop.permute.xlu0 %3424 }
 0x9d9   : >> { %v3281_v55 = vpop.permute.xlu0 %3280  ;;  %v6535_v62 = vpop.permute.xlu1 %3420 }
 0x9da   : >> { %v3288_v37 = vmul.f32 %v3281_v55, %v6270_v39  ;;  %v3291_v33 = vmul.f32 %v3281_v55, %v6360_v31 }
 0x9dc   : >> { %v3316_v13 = vmul.f32 %v3302_v53, %v3288_v37 }
 0x9dd   : >> { %v6538_v2 = vpop.permute.xlu0 %2849  ;;  %v6540_v14 = vpop.permute.xlu1 %3428 }
 0x9de   : >> { %7207 = vst [vmem:[#allocation41_spill] sm:$0xff] %v6540_v14  ;;  %3340 = vrot.lane.b32.xlu1 %v3316_v13, %s7208_s19  ;;  %v3294_v13 = vmul.f32 %v3281_v55, %v6281_v30  ;;  %v2872_v46 = vsel %vm1099_vm8, %v6475_v5, %v6538_v2 }
 0x9e1   : >> { %v6543_v58 = vpop.permute.xlu0 %2861  ;;  %v6545_v45 = vpop.permute.xlu1 %3432 }
 0x9e2   : >> { %7209 = vst [vmem:[#allocation42_spill] sm:$0xff] %v6545_v45  ;;  %v2876_v5 = vsel %vm1099_vm8, %v6487_v28, %v6543_v58  ;;  %v3297_v28 = vmul.f32 %v3281_v55, %v6372_v41 }
 0x9e5   : >> { %v6547_v18 = vpop.permute.xlu0 %3091  ;;  %v3283_v10 = vpop.permute.xlu1 %3282 }
 0x9e6   : >> { %v3284_v7 = vsel %vm1220_vm6, %v3281_v55, %v3283_v10  ;;  %v3290_v36 = vmul.f32 %v3283_v10, %v6227_v11  ;;  %v2607_v55 = vmul.f32 %v6089_v9, %v6333_v23 }
 0x9e7   : >> { %v3289_v22 = vmul.f32 %v3284_v7, %v6320_v61  ;;  %v3292_v15 = vmul.f32 %v3284_v7, %v6398_v3 }
 0x9e8   : >> { %v3318_v6 = vmul.f32 %v3302_v53, %v3290_v36 }
 0x9e9   : >> { %v6554_v40 = vpop.permute.xlu0 %3103  ;;  %v2729_v34 = vpop.permute.xlu1 %2728  ;;  %v3317_v17 = vmul.f32 %v3302_v53, %v3289_v22  ;;  %v3320_v38 = vmul.f32 %v3306_v50, %v3292_v15  ;;  %v3293_v53 = vmul.f32 %v3283_v10, %v6209_v57  ;;  %v7210_v15 = vld [vmem:[#allocation39_spill] sm:$0xff] }
 0x9ea   : >> { %v2751_v25 = vsel %vm978_vm7, %v6433_v12, %v2729_v34  ;;  %3344 = vrot.lane.b32.xlu1 %v3318_v6, %s7208_s19  ;;  %v3319_v12 = vmul.f32 %v3306_v50, %v3291_v33 }
 0x9eb   : >> { %v2767_v37 = vadd.f32 %v2751_v25, %v2635_v19  ;;  %3342 = vrot.lane.b32.xlu0 %v3317_v17, %s7208_s19  ;;  %v3296_v17 = vmul.f32 %v3283_v10, %v7210_v15  ;;  %v3322_v25 = vmul.f32 %v3310_v49, %v3294_v13  ;;  %v3321_v33 = vmul.f32 %v3306_v50, %v3293_v53 }
 0x9ec   : >> { %v3114_v50 = vsel %vm1341_vm5, %v6514_v42, %v6547_v18 }
 0x9ed   : >> { %v6569_v36 = vpop.permute.xlu0 %3221  ;;  %v2741_v22 = vpop.permute.xlu1 %2740  ;;  %v2888_v45 = vadd.f32 %v2872_v46, %v2767_v37  ;;  %v3295_v46 = vmul.f32 %v3284_v7, %v6333_v23  ;;  %v3324_v53 = vmul.f32 %v3310_v49, %v3296_v17  ;;  %v3325_v17 = vmul.f32 %v6531_v54, %v3297_v28 }
 0x9ee   : >> { %v2755_v6 = vsel %vm978_vm7, %v6445_v60, %v2741_v22  ;;  %3348 = vrot.lane.b32.xlu1 %v3320_v38, %s7208_s19 }
 0x9ef   : >> { %v2771_v19 = vadd.f32 %v2755_v6, %v2639_v63  ;;  %3346 = vrot.lane.b32.xlu0 %v3319_v12, %s7208_s19  ;;  %v2603_v63 = vmul.f32 %v6078_v8, %v6320_v61  ;;  %v3298_v12 = vmul.f32 %v3284_v7, %v6409_v16  ;;  %v3118_v7 = vsel %vm1341_vm5, %v6520_v48, %v6554_v40 }
 0x9f1   : >> { %v6581_v32 = vpop.permute.xlu0 %3233  ;;  %v2971_v14 = vpop.permute.xlu1 %2970  ;;  %v2892_v37 = vadd.f32 %v2876_v5, %v2771_v19  ;;  %v3323_v19 = vmul.f32 %v3310_v49, %v3295_v46  ;;  %v3326_v49 = vmul.f32 %v6531_v54, %v3298_v12 }
 0x9f2   : >> { %v2993_v38 = vsel %vm1220_vm6, %v6480_v47, %v2971_v14  ;;  %3352 = vrot.lane.b32.xlu1 %v3322_v25, %s7208_s19 }
 0x9f3   : >> { %v3009_v60 = vadd.f32 %v2993_v38, %v2888_v45  ;;  %3350 = vrot.lane.b32.xlu0 %v3321_v33, %s7208_s19  ;;  %v2636_v45 = vadd.f32 %v6093_v24, %v2603_v63 }
 0x9f5   : >> { %v2731_v13 = vpop.permute.xlu0 %2730  ;;  %v2983_v6 = vpop.permute.xlu1 %2982  ;;  %v3130_v5 = vadd.f32 %v3114_v50, %v3009_v60 }
 0x9f6   : >> { %v2752_v47 = vsel %vm978_vm7, %v2729_v34, %v2731_v13  ;;  %v2997_v8 = vsel %vm1220_vm6, %v6498_v51, %v2983_v6  ;;  %3356 = vrot.lane.b32.xlu1 %v3324_v53, %s7208_s19  ;;  %v7211_v51 = vld [vmem:[#allocation40_spill] sm:$0xff] }
 0x9f7   : >> { %v3013_v42 = vadd.f32 %v2997_v8, %v2892_v37  ;;  %3354 = vrot.lane.b32.xlu0 %v3323_v19, %s7208_s19  ;;  %v3299_v25 = vmul.f32 %v3283_v10, %v7211_v51  ;;  %v2768_v33 = vadd.f32 %v2752_v47, %v2636_v45  ;;  %v2640_v37 = vadd.f32 %v6102_v52, %v2607_v55 }
 0x9f9   : >> { %v2743_v34 = vpop.permute.xlu0 %2742  ;;  %v2852_v9 = vpop.permute.xlu1 %2851  ;;  %v3134_v38 = vadd.f32 %v3118_v7, %v3013_v42  ;;  %v3327_v50 = vmul.f32 %v6531_v54, %v3299_v25 }
 0x9fa   : >> { %v2756_v46 = vsel %vm978_vm7, %v2741_v22, %v2743_v34  ;;  %v2873_v24 = vsel %vm1099_vm8, %v6538_v2, %v2852_v9  ;;  %3360 = vrot.lane.b32.xlu1 %v3326_v49, %s7208_s19  ;;  %v7212_v34 = vld [vmem:[#allocation36_spill] sm:$0xff]  ;;  %v7213_v9 = vld [vmem:[#allocation37_spill] sm:$0xff] }
 0x9fb   : >> { %v2889_v48 = vadd.f32 %v2873_v24, %v2768_v33  ;;  %3358 = vrot.lane.b32.xlu0 %v3325_v17, %s7208_s19  ;;  %v2772_v60 = vadd.f32 %v2756_v46, %v2640_v37  ;;  %v2604_v49 = vmul.f32 %v7212_v34, %v6360_v31  ;;  %v7214_v24 = vld [vmem:[#allocation35_spill] sm:$0xff] }
 0x9fc   : >> { %v2608_v37 = vmul.f32 %v7214_v24, %v6372_v41 }
 0x9fd   : >> { %v2973_v63 = vpop.permute.xlu0 %2972  ;;  %v2864_v10 = vpop.permute.xlu1 %2863 }
 0x9fe   : >> { %v2994_v28 = vsel %vm1220_vm6, %v2971_v14, %v2973_v63  ;;  %v2877_v13 = vsel %vm1099_vm8, %v6543_v58, %v2864_v10 }
 0x9ff   : >> { %v3010_v22 = vadd.f32 %v2994_v28, %v2889_v48  ;;  %v2893_v53 = vadd.f32 %v2877_v13, %v2772_v60  ;;  %3362 = vrot.lane.b32.xlu0 %v3327_v50, %s7208_s19 }
 0xa01   : >> { %v2985_v2 = vpop.permute.xlu0 %2984  ;;  %v3094_v12 = vpop.permute.xlu1 %3093 }
 0xa02   : >> { %v2998_v52 = vsel %vm1220_vm6, %v2983_v6, %v2985_v2  ;;  %v3115_v19 = vsel %vm1341_vm5, %v6547_v18, %v3094_v12 }
 0xa03   : >> { %v3014_v47 = vadd.f32 %v2998_v52, %v2893_v53  ;;  %v3131_v8 = vadd.f32 %v3115_v19, %v3010_v22 }
 0xa05   : >> { %v2735_v14 = vpop.permute.xlu0 %2734  ;;  %v3106_v55 = vpop.permute.xlu1 %3105 }
 0xa06   : >> { %v3119_v54 = vsel %vm1341_vm5, %v6554_v40, %v3106_v55  ;;  %v2753_v40 = vsel %vm978_vm7, %v6451_v26, %v2735_v14 }
 0xa07   : >> { %v3135_v45 = vadd.f32 %v3119_v54, %v3014_v47 }
 0xa09   : >> { %v6625_v42 = vpop.permute.xlu0 %2746  ;;  %v3224_v58 = vpop.permute.xlu1 %3223 }
 0xa0a   : >> { %v3245_v7 = vsel %vm1260_vm2, %v6569_v36, %v3224_v58  ;;  %v3246_v6 = vsel %vm1260_vm2, %v3224_v58, %v6518_v4  ;;  %v2637_v4 = vadd.f32 %v7213_v9, %v2604_v49  ;;  %v2757_v26 = vsel %vm978_vm7, %v6464_v56, %v6625_v42 }
 0xa0b   : >> { %v6633_v18 = vadd.f32 %v3245_v7, %v3130_v5  ;;  %v6635_v17 = vadd.f32 %v3246_v6, %v3131_v8 }
 0xa0c   : >> { %v2769_v60 = vadd.f32 %v2753_v40, %v2637_v4 }
 0xa0d   : >> { %v2977_v25 = vpop.permute.xlu0 %2976  ;;  %v3236_v33 = vpop.permute.xlu1 %3235 }
 0xa0e   : >> { %v3249_v46 = vsel %vm1260_vm2, %v6581_v32, %v3236_v33  ;;  %v3250_v36 = vsel %vm1260_vm2, %v3236_v33, %v6525_v43  ;;  %v7215_v43 = vld [vmem:[#allocation38_spill] sm:$0xff]  ;;  %v2995_v22 = vsel %vm1220_vm6, %v6500_v59, %v2977_v25 }
 0xa0f   : >> { %v6646_v5 = vadd.f32 %v3249_v46, %v3134_v38  ;;  %v6648_v48 = vadd.f32 %v3250_v36, %v3135_v45  ;;  %v2641_v10 = vadd.f32 %v7215_v43, %v2608_v37  ;;  %v2605_v46 = vmul.f32 %v7212_v34, %v6398_v3 }
 0xa11   : >> { %v2989_v63 = vpop.permute.xlu0 %2988  ;;  %v2856_v28 = vpop.permute.xlu1 %2855  ;;  %v2773_v13 = vadd.f32 %v2757_v26, %v2641_v10 }
 0xa12   : >> { %v2874_v32 = vsel %vm1099_vm8, %v6456_v1, %v2856_v28  ;;  %v2999_v56 = vsel %vm1220_vm6, %v6508_v20, %v2989_v63 }
 0xa13   : >> { %v2890_v50 = vadd.f32 %v2874_v32, %v2769_v60  ;;  %v2609_v60 = vmul.f32 %v7214_v24, %v6409_v16 }
 0xa15   : >> { %v2858_v38 = vpop.permute.xlu0 %2857  ;;  %v2868_v2 = vpop.permute.xlu1 %2867  ;;  %v3011_v52 = vadd.f32 %v2995_v22, %v2890_v50  ;;  %v2642_v34 = vadd.f32 %v7215_v43, %v2609_v60 }
 0xa16   : >> { %v2875_v53 = vsel %vm1099_vm8, %v2856_v28, %v2858_v38  ;;  %v2878_v12 = vsel %vm1099_vm8, %v6471_v0, %v2868_v2  ;;  %v2638_v28 = vadd.f32 %v7213_v9, %v2605_v46 }
 0xa17   : >> { %v2894_v47 = vadd.f32 %v2878_v12, %v2773_v13 }
 0xa19   : >> { %v2870_v1 = vpop.permute.xlu0 %2869  ;;  %v3098_v8 = vpop.permute.xlu1 %3097  ;;  %v3015_v55 = vadd.f32 %v2999_v56, %v2894_v47 }
 0xa1a   : >> { %v2879_v19 = vsel %vm1099_vm8, %v2868_v2, %v2870_v1  ;;  %v3116_v59 = vsel %vm1341_vm5, %v6506_v21, %v3098_v8 }
 0xa1b   : >> { %v3132_v54 = vadd.f32 %v3116_v59, %v3011_v52 }
 0xa1d   : >> { %v3100_v45 = vpop.permute.xlu0 %3099  ;;  %v3110_v7 = vpop.permute.xlu1 %3109 }
 0xa1e   : >> { %v3117_v58 = vsel %vm1341_vm5, %v3098_v8, %v3100_v45  ;;  %v3120_v0 = vsel %vm1341_vm5, %v6512_v35, %v3110_v7 }
 0xa1f   : >> { %v3136_v6 = vadd.f32 %v3120_v0, %v3015_v55 }
 0xa21   : >> { %v3112_v49 = vpop.permute.xlu0 %3111  ;;  %v3228_v33 = vpop.permute.xlu1 %3227 }
 0xa22   : >> { %v3121_v20 = vsel %vm1341_vm5, %v3110_v7, %v3112_v49 }
 0xa25   : >> { %v3230_v40 = vpop.permute.xlu0 %3229  ;;  %v3240_v21 = vpop.permute.xlu1 %3239 }
 0xa26   : >> { %v3247_v36 = vsel %vm1260_vm2, %v3228_v33, %v3230_v40  ;;  %v3248_v43 = vsel %vm1260_vm2, %v3230_v40, %v6527_v44 }
 0xa27   : >> { %v6673_v4 = vadd.f32 %v3247_v36, %v3132_v54 }
 0xa29   : >> { %v3242_v37 = vpop.permute.xlu0 %3241  ;;  %v2737_v26 = vpop.permute.xlu1 %2736 }
 0xa2a   : >> { %v3251_v35 = vsel %vm1260_vm2, %v3240_v21, %v3242_v37  ;;  %v2754_v10 = vsel %vm978_vm7, %v2735_v14, %v2737_v26 }
 0xa2b   : >> { %v6679_v32 = vadd.f32 %v3251_v35, %v3136_v6  ;;  %v2770_v50 = vadd.f32 %v2754_v10, %v2638_v28  ;;  %v7217_v35 = vld [vmem:[#allocation41_spill] sm:$0xff] }
 0xa2d   : >> { %v2749_v22 = vpop.permute.xlu1 %2748  ;;  %v2891_v38 = vadd.f32 %v2875_v53, %v2770_v50  ;;  %v6686_v9 = vpop.permute.xlu0 %3539 }
 0xa2e   : >> { %v2758_v13 = vsel %vm978_vm7, %v6625_v42, %v2749_v22 }
 0xa2f   : >> { %v2774_v2 = vadd.f32 %v2758_v13, %v2642_v34  ;;  %v7218_v13 = vld [vmem:[#allocation42_spill] sm:$0xff] }
 0xa31   : >> { %v2979_v52 = vpop.permute.xlu1 %2978  ;;  %v2895_v24 = vadd.f32 %v2879_v19, %v2774_v2  ;;  %v3252_v19 = vsel %vm1260_vm2, %v3242_v37, %v6529_v29 }
 0xa32   : >> { %v2996_v12 = vsel %vm1220_vm6, %v2977_v25, %v2979_v52  ;;  %v6697_v25 = vpop.permute.xlu0 %3551 }
 0xa33   : >> { %v3012_v47 = vadd.f32 %v2996_v12, %v2891_v38 }
 0xa35   : >> { %v3133_v56 = vadd.f32 %v3117_v58, %v3012_v47  ;;  %v2991_v1 = vpop.permute.xlu1 %2990 }
 0xa36   : >> { %v3000_v14 = vsel %vm1220_vm6, %v2989_v63, %v2991_v1  ;;  %v3402_v45 = vpop.permute.xlu0 %3401 }
 0xa37   : >> { %v3016_v8 = vadd.f32 %v3000_v14, %v2895_v24  ;;  %v6691_v53 = vadd.f32 %v3248_v43, %v3133_v56  ;;  %v3409_v0 = vmul.f32 %v3402_v45, %v6227_v11  ;;  %v3412_v40 = vmul.f32 %v3402_v45, %v6209_v57 }
 0xa38   : >> { %v3418_v22 = vmul.f32 %v3402_v45, %v7211_v51 }
 0xa39   : >> { %v3137_v55 = vadd.f32 %v3121_v20, %v3016_v8  ;;  %v6693_v42 = vpop.permute.xlu1 %3543  ;;  %v3437_v20 = vmul.f32 %v6535_v62, %v3409_v0  ;;  %v3440_v37 = vmul.f32 %v6533_v27, %v3412_v40 }
 0xa3a   : >> { %v3521_v38 = vpop.permute.xlu0 %3520  ;;  %v3446_v47 = vmul.f32 %v7218_v13, %v3418_v22 }
 0xa3b   : >> { %v6699_v59 = vadd.f32 %v3252_v19, %v3137_v55  ;;  %v3528_v1 = vmul.f32 %v3521_v38, %v6227_v11  ;;  %v3531_v55 = vmul.f32 %v3521_v38, %v6209_v57  ;;  %v3534_v57 = vmul.f32 %v3521_v38, %v7210_v15 }
 0xa3d   : >> { %v6701_v54 = vpop.permute.xlu1 %3547 }
 0xa41   : >> { %v3400_v63 = vpop.permute.xlu1 %3399 }
 0xa42   : >> { %v3403_v58 = vsel %vm1099_vm8, %v3400_v63, %v3402_v45  ;;  %v3407_v44 = vmul.f32 %v3400_v63, %v6270_v39  ;;  %v3410_v29 = vmul.f32 %v3400_v63, %v6360_v31  ;;  %v3413_v36 = vmul.f32 %v3400_v63, %v6281_v30 }
 0xa43   : >> { %v3408_v7 = vmul.f32 %v3403_v58, %v6320_v61  ;;  %v3411_v33 = vmul.f32 %v3403_v58, %v6398_v3  ;;  %v3414_v60 = vmul.f32 %v3403_v58, %v6333_v23  ;;  %v3416_v26 = vmul.f32 %v3400_v63, %v6372_v41 }
 0xa44   : >> { %v3435_v6 = vmul.f32 %v6535_v62, %v3407_v44  ;;  %v3438_v46 = vmul.f32 %v6533_v27, %v3410_v29  ;;  %v3441_v28 = vmul.f32 %v7217_v35, %v3413_v36  ;;  %v3417_v34 = vmul.f32 %v3403_v58, %v6409_v16 }
 0xa45   : >> { %v3436_v49 = vmul.f32 %v6535_v62, %v3408_v7  ;;  %v3439_v21 = vmul.f32 %v6533_v27, %v3411_v33  ;;  %v3415_v62 = vmul.f32 %v3402_v45, %v7210_v15  ;;  %v3442_v10 = vmul.f32 %v7217_v35, %v3414_v60  ;;  %v3519_v50 = vpop.permute.xlu1 %3518 }
 0xa46   : >> { %3459 = vrot.lane.b32.xlu1 %v3435_v6, %s7216_s2  ;;  %v3444_v2 = vmul.f32 %v7218_v13, %v3416_v26  ;;  %v3522_v52 = vsel %vm978_vm7, %v3519_v50, %v3521_v38  ;;  %v3526_v24 = vmul.f32 %v3519_v50, %v6270_v39  ;;  %v3445_v12 = vmul.f32 %v7218_v13, %v3417_v34 }
 0xa47   : >> { %3461 = vrot.lane.b32.xlu0 %v3436_v49, %s7216_s2  ;;  %v3443_v27 = vmul.f32 %v7217_v35, %v3415_v62  ;;  %v3527_v56 = vmul.f32 %v3522_v52, %v6320_v61  ;;  %v3529_v43 = vmul.f32 %v3519_v50, %v6360_v31  ;;  %v3556_v39 = vmul.f32 %v6686_v9, %v3528_v1 }
 0xa48   : >> { %v3554_v14 = vmul.f32 %v6686_v9, %v3526_v24  ;;  %v3530_v61 = vmul.f32 %v3522_v52, %v6398_v3  ;;  %v3532_v11 = vmul.f32 %v3519_v50, %v6281_v30  ;;  %v3559_v45 = vmul.f32 %v6693_v42, %v3531_v55 }
 0xa49   : >> { %v3555_v8 = vmul.f32 %v6686_v9, %v3527_v56  ;;  %v3557_v19 = vmul.f32 %v6693_v42, %v3529_v43  ;;  %v3533_v63 = vmul.f32 %v3522_v52, %v6333_v23  ;;  %v3535_v9 = vmul.f32 %v3519_v50, %v6372_v41 }
 0xa4a   : >> { %3463 = vrot.lane.b32.xlu1 %v3437_v20, %s7216_s2  ;;  %v3558_v31 = vmul.f32 %v6693_v42, %v3530_v61  ;;  %v3560_v3 = vmul.f32 %v6701_v54, %v3532_v11  ;;  %v3562_v30 = vmul.f32 %v6701_v54, %v3534_v57  ;;  %v3536_v23 = vmul.f32 %v3522_v52, %v6409_v16 }
 0xa4b   : >> { %3465 = vrot.lane.b32.xlu0 %v3438_v46, %s7216_s2  ;;  %v3561_v58 = vmul.f32 %v6701_v54, %v3533_v63  ;;  %v3537_v42 = vmul.f32 %v3521_v38, %v7211_v51  ;;  %v3563_v44 = vmul.f32 %v6697_v25, %v3535_v9 }
 0xa4c   : >> { %v3564_v41 = vmul.f32 %v6697_v25, %v3536_v23 }
 0xa4d   : >> { %v3565_v15 = vmul.f32 %v6697_v25, %v3537_v42 }
 0xa4e   : >> { %3467 = vrot.lane.b32.xlu1 %v3439_v21, %s7216_s2 }
 0xa4f   : >> { %3469 = vrot.lane.b32.xlu0 %v3440_v37, %s7216_s2 }
 0xa50   : >> { %v3341_v54 = vpop.permute.xlu1 %3340 }
 0xa52   : >> { %3471 = vrot.lane.b32.xlu1 %v3441_v28, %s7216_s2 }
 0xa53   : >> { %3473 = vrot.lane.b32.xlu0 %v3442_v10, %s7216_s2 }
 0xa56   : >> { %3475 = vrot.lane.b32.xlu1 %v3443_v27, %s7216_s2 }
 0xa57   : >> { %3477 = vrot.lane.b32.xlu0 %v3444_v2, %s7216_s2 }
 0xa5a   : >> { %3479 = vrot.lane.b32.xlu1 %v3445_v12, %s7216_s2 }
 0xa5b   : >> { %3481 = vrot.lane.b32.xlu0 %v3446_v47, %s7216_s2 }
 0xa5c   : >> { %v3345_v0 = vpop.permute.xlu1 %3344 }
 0xa5d   : >> { %v3343_v7 = vpop.permute.xlu0 %3342 }
 0xa5e   : >> { %3578 = vrot.lane.b32.xlu1 %v3554_v14, %s7219_s26  ;;  %v3364_v50 = vsel %vm1139_vm4, %v3341_v54, %v3343_v7  ;;  %v3365_v38 = vsel %vm1139_vm4, %v3343_v7, %v3345_v0 }
 0xa5f   : >> { %3580 = vrot.lane.b32.xlu0 %v3555_v8, %s7219_s26  ;;  %v3380_v13 = vadd.f32 %v3364_v50, %v6633_v18  ;;  %v3381_v47 = vadd.f32 %v3365_v38, %v6635_v17  ;;  %v6824_v50 = vmov (%p2428_p12), 0.0   ;;  %v6832_v38 = vmov (%p2428_p12), 0.0  }
 0xa60   : >> { %v3349_v6 = vpop.permute.xlu1 %3348 }
 0xa61   : >> { %v3347_v16 = vpop.permute.xlu0 %3346 }
 0xa62   : >> { %3582 = vrot.lane.b32.xlu1 %v3556_v39, %s7219_s26  ;;  %v3366_v1 = vsel %vm1139_vm4, %v3347_v16, %v3349_v6 }
 0xa63   : >> { %3584 = vrot.lane.b32.xlu0 %v3557_v19, %s7219_s26  ;;  %v3382_v19 = vadd.f32 %v3366_v1, %v6673_v4 }
 0xa64   : >> { %v3353_v29 = vpop.permute.xlu1 %3352 }
 0xa65   : >> { %v3351_v51 = vpop.permute.xlu0 %3350 }
 0xa66   : >> { %3586 = vrot.lane.b32.xlu1 %v3558_v31, %s7219_s26  ;;  %v3367_v43 = vsel %vm1139_vm4, %v3349_v6, %v3351_v51 }
 0xa67   : >> { %3588 = vrot.lane.b32.xlu0 %v3559_v45, %s7219_s26  ;;  %v3383_v31 = vadd.f32 %v3367_v43, %v6691_v53 }
 0xa68   : >> { %v3357_v20 = vpop.permute.xlu1 %3356 }
 0xa69   : >> { %v3355_v49 = vpop.permute.xlu0 %3354 }
 0xa6a   : >> { %3590 = vrot.lane.b32.xlu1 %v3560_v3, %s7219_s26  ;;  %v3368_v45 = vsel %vm1139_vm4, %v3353_v29, %v3355_v49  ;;  %v3369_v42 = vsel %vm1139_vm4, %v3355_v49, %v3357_v20 }
 0xa6b   : >> { %3592 = vrot.lane.b32.xlu0 %v3561_v58, %s7219_s26  ;;  %v3385_v0 = vadd.f32 %v3369_v42, %v6648_v48 }
 0xa6c   : >> { %v3361_v40 = vpop.permute.xlu1 %3360 }
 0xa6d   : >> { %v3359_v33 = vpop.permute.xlu0 %3358 }
 0xa6e   : >> { %3594 = vrot.lane.b32.xlu1 %v3562_v30, %s7219_s26  ;;  %v3370_v6 = vsel %vm1139_vm4, %v3359_v33, %v3361_v40 }
 0xa6f   : >> { %3596 = vrot.lane.b32.xlu0 %v3563_v44, %s7219_s26  ;;  %v3384_v44 = vadd.f32 %v3368_v45, %v6646_v5  ;;  %v3386_v48 = vadd.f32 %v3370_v6, %v6679_v32  ;;  %v6820_v32 = vmov (%p2428_p12), 0.0  }
 0xa71   : >> { %v3363_v46 = vpop.permute.xlu0 %3362 }
 0xa72   : >> { %3598 = vrot.lane.b32.xlu1 %v3564_v41, %s7219_s26  ;;  %v3371_v29 = vsel %vm1139_vm4, %v3361_v40, %v3363_v46 }
 0xa73   : >> { %3600 = vrot.lane.b32.xlu0 %v3565_v15, %s7219_s26  ;;  %v3387_v33 = vadd.f32 %v3371_v29, %v6699_v59  ;;  %v6822_v59 = vmov (%p2428_p12), 0.0  }
 0xab8   : >> { %v3460_v36 = vpop.permute.xlu1 %3459 }
 0xab9   : >> { %v3462_v21 = vpop.permute.xlu0 %3461 }
 0xaba   : >> { %v3483_v22 = vsel %vm1018_vm1, %v3460_v36, %v3462_v21 }
 0xabb   : >> { %v3499_v52 = vadd.f32 %v3483_v22, %v3380_v13  ;;  %v6830_v22 = vmov (%p2428_p12), 0.0   ;;  %v6834_v13 = vmov (%p2428_p12), 0.0  }
 0xabc   : >> { %v3464_v37 = vpop.permute.xlu1 %3463 }
 0xabd   : >> { %v3466_v25 = vpop.permute.xlu0 %3465  ;;  %v3484_v24 = vsel %vm1018_vm1, %v3462_v21, %v3464_v37 }
 0xabe   : >> { %v3500_v8 = vadd.f32 %v3484_v24, %v3381_v47 }
 0xac0   : >> { %v3468_v60 = vpop.permute.xlu1 %3467 }
 0xac1   : >> { %v3470_v62 = vpop.permute.xlu0 %3469  ;;  %v3485_v61 = vsel %vm1018_vm1, %v3466_v25, %v3468_v60 }
 0xac2   : >> { %v3486_v17 = vsel %vm1018_vm1, %v3468_v60, %v3470_v62  ;;  %v3501_v63 = vadd.f32 %v3485_v61, %v3382_v19 }
 0xac3   : >> { %v3502_v3 = vadd.f32 %v3486_v17, %v3383_v31 }
 0xac4   : >> { %v3472_v35 = vpop.permute.xlu1 %3471 }
 0xac5   : >> { %v3474_v28 = vpop.permute.xlu0 %3473 }
 0xac6   : >> { %v3487_v30 = vsel %vm1018_vm1, %v3472_v35, %v3474_v28 }
 0xac7   : >> { %v3503_v15 = vadd.f32 %v3487_v30, %v3384_v44 }
 0xac8   : >> { %v3476_v26 = vpop.permute.xlu1 %3475 }
 0xac9   : >> { %v3478_v10 = vpop.permute.xlu0 %3477  ;;  %v3488_v7 = vsel %vm1018_vm1, %v3474_v28, %v3476_v26 }
 0xaca   : >> { %v3504_v5 = vadd.f32 %v3488_v7, %v3385_v0 }
 0xacc   : >> { %v3480_v27 = vpop.permute.xlu1 %3479 }
 0xacd   : >> { %v3482_v34 = vpop.permute.xlu0 %3481  ;;  %v3489_v20 = vsel %vm1018_vm1, %v3478_v10, %v3480_v27 }
 0xace   : >> { %v3490_v37 = vsel %vm1018_vm1, %v3480_v27, %v3482_v34  ;;  %v3505_v60 = vadd.f32 %v3489_v20, %v3386_v48  ;;  %v6826_v27 = vmov (%p2428_p12), 0.0   ;;  %v6828_v34 = vmov (%p2428_p12), 0.0  }
 0xacf   : >> { %v3506_v46 = vadd.f32 %v3490_v37, %v3387_v33 }
 0xad0   : >> { %v3579_v2 = vpop.permute.xlu1 %3578 }
 0xad1   : >> { %v3581_v12 = vpop.permute.xlu0 %3580 }
 0xad2   : >> { %v3602_v56 = vsel %vm897_vm3, %v3579_v2, %v3581_v12 }
 0xad3   : >> { %v3618_v14 = vadd.f32 %v3602_v56, %v3499_v52 }
 0xad4   : >> { %v3583_v39 = vpop.permute.xlu1 %3582 }
 0xad5   : >> { %3626 = vst [vmem:[%s6097_s18 + $0x8] sm:$0xff] %v3618_v14  ;;  %v3603_v18 = vsel %vm897_vm3, %v3581_v12, %v3583_v39  ;;  %v3585_v55 = vpop.permute.xlu0 %3584 }
 0xad6   : >> { %v3619_v11 = vadd.f32 %v3603_v18, %v3500_v8 }
 0xad8   : >> { %3627 = vst [vmem:[%s6097_s18 + $0x10] sm:$0xff] %v3619_v11  ;;  %v3587_v57 = vpop.permute.xlu1 %3586 }
 0xad9   : >> { %v3604_v9 = vsel %vm897_vm3, %v3585_v55, %v3587_v57  ;;  %v3589_v58 = vpop.permute.xlu0 %3588 }
 0xada   : >> { %v3620_v23 = vadd.f32 %v3604_v9, %v3501_v63  ;;  %v3605_v4 = vsel %vm897_vm3, %v3587_v57, %v3589_v58 }
 0xadb   : >> { %v3621_v53 = vadd.f32 %v3605_v4, %v3502_v3 }
 0xadc   : >> { %3628 = vst [vmem:[%s6097_s18 + $0x28] sm:$0xff] %v3620_v23  ;;  %v3591_v41 = vpop.permute.xlu1 %3590 }
 0xadd   : >> { %3629 = vst [vmem:[%s6097_s18 + $0x30] sm:$0xff] %v3621_v53  ;;  %v3593_v54 = vpop.permute.xlu0 %3592 }
 0xade   : >> { %v3606_v16 = vsel %vm897_vm3, %v3591_v41, %v3593_v54 }
 0xadf   : >> { %v3622_v51 = vadd.f32 %v3606_v16, %v3503_v15 }
 0xae0   : >> { %v3595_v49 = vpop.permute.xlu1 %3594 }
 0xae1   : >> { %3630 = vst [vmem:[%s6097_s18 + $0x48] sm:$0xff] %v3622_v51  ;;  %v3607_v36 = vsel %vm897_vm3, %v3593_v54, %v3595_v49  ;;  %v3597_v21 = vpop.permute.xlu0 %3596 }
 0xae2   : >> { %v3623_v25 = vadd.f32 %v3607_v36, %v3504_v5 }
 0xae3   : > { %2430 = sbr.rel (!%p2428_p12) target bundleno = 2152 (0x868), region = 178 }
 0xae4   : >> { %3631 = vst [vmem:[%s6097_s18 + $0x50] sm:$0xff] %v3623_v25  ;;  %v3599_v40 = vpop.permute.xlu1 %3598 }
 0xae5   : >> { %v3608_v62 = vsel %vm897_vm3, %v3597_v21, %v3599_v40  ;;  %v3601_v35 = vpop.permute.xlu0 %3600 }
 0xae6   : >> { %v3624_v28 = vadd.f32 %v3608_v62, %v3505_v60  ;;  %v3609_v26 = vsel %vm897_vm3, %v3599_v40, %v3601_v35 }
 0xae7   : >> { %v3625_v10 = vadd.f32 %v3609_v26, %v3506_v46 }
 0xae8   : >> { %3632 = vst [vmem:[%s6097_s18 + $0x68] sm:$0xff] %v3624_v28 }
 0xae9   : >> { %3633 = vst [vmem:[%s6097_s18 + $0x70] sm:$0xff] %v3625_v10  ;;  %s6836_s18 = smov (%p2428_p12), 0  }
 0xaea LB: >> { %v4642_v2 = vmov 0.0   ;;  %s6868_s23 = sshll.u32 %s4602_s18, 5  ;;  %s3639_s18 = sadd.s32 1, %s4602_s18   ;;  %s4602_s18 = sphi %s6836_s18, %s3639_s18   ;;  %v4598_v13 = vphi %v6834_v13, %v7227_v13   ;;  %v4594_v38 = vphi %v6832_v38, %v7226_v38   ;;  %v4590_v22 = vphi %v6830_v22, %v7225_v22   ;;  %v4586_v34 = vphi %v6828_v34, %v7224_v34   ;;  %v4582_v27 = vphi %v6826_v27, %v7223_v27   ;;  %v4578_v50 = vphi %v6824_v50, %v7222_v50   ;;  %v4574_v59 = vphi %v6822_v59, %v7221_v59   ;;  %v4570_v32 = vphi %v6820_v32, %v7220_v32  }
 0xaeb   : >> { %3837 = vmatprep.mubr.f32.mxu0 %v4642_v2  ;;  %3849 = vmatprep.mubr.f32.mxu1 %v4642_v2  ;;  %s3649_s29 = sshra.s32 %s6868_s23, 3  ;;  %s3734_s27 = sadd.s32 64, %s6868_s23 }
 0xaec   : >> { %s4119_s28 = sshll.u32 %s3649_s29, 5  ;;  %s3735_s19 = sshra.s32 %s3734_s27, 3 }
 0xaed   : >> { %s3653_s20 = scalar_lea.vmem [#allocation3], %s4119_s28  ;;  %s4120_s2 = sshll.u32 %s3735_s19, 5 }
 0xaee   : >> { %s6902_s26 = scalar_lea.vmem [#allocation3], %s4120_s2  ;;  %p3636_p13 = scmp.ge.s32.totalorder %s3639_s18, 2  }
 0xaef   : > { %s4643_s18 = smov (%p3636_p13), [#allocation4]  }
 0xaf0   : >> { %v3655_v52 = vld [vmem:[%s3653_s20 + $0x10] sm:$0xff]  ;;  %v3654_v12 = vld [vmem:[%s3653_s20 + $0x8] sm:$0xff]  ;;  %s4456_s28 = sshll.u32 (%p3636_p13), %s4643_s18, 4  ;;  %s4457_s28 = int_to_ptr.vmem [resolvable:$false] %s4456_s28 }
 0xaf1   : >> { %v3657_v24 = vld [vmem:[%s3653_s20 + $0x30] sm:$0xff]  ;;  %v3671_v47 = vmul.f32 0.044715, %v3655_v52  ;;  %v6871_v1 = vld [vmem:[%s3653_s20 + $0x28] sm:$0xff]  ;;  %v3670_v14 = vmul.f32 0.044715, %v3654_v12 }
 0xaf2   : >> { %v3673_v56 = vmul.f32 0.044715, %v3657_v24  ;;  %v3672_v39 = vmul.f32 0.044715, %v6871_v1  ;;  %v6874_v61 = vld [vmem:[%s3653_s20 + $0x50] sm:$0xff]  ;;  %v6880_v45 = vld [vmem:[%s3653_s20 + $0x48] sm:$0xff] }
 0xaf3   : >> { %v3679_v43 = vmul.f32 %v3671_v47, %v3655_v52  ;;  %v3678_v18 = vmul.f32 %v3670_v14, %v3654_v12  ;;  %v6876_v55 = vld [vmem:[%s3653_s20 + $0x70] sm:$0xff]  ;;  %v3675_v19 = vmul.f32 0.044715, %v6874_v61  ;;  %v6884_v9 = vld [vmem:[%s3653_s20 + $0x68] sm:$0xff]  ;;  %v3674_v53 = vmul.f32 0.044715, %v6880_v45  ;;  %s3756_s20 = scalar_lea.vmem %s7049_s13, %s6868_s23 }
 0xaf4   : >> { %v3681_v8 = vmul.f32 %v3673_v56, %v3657_v24  ;;  %v3680_v31 = vmul.f32 %v3672_v39, %v6871_v1  ;;  %v3677_v57 = vmul.f32 0.044715, %v6876_v55  ;;  %v3676_v54 = vmul.f32 0.044715, %v6884_v9  ;;  %v3741_v56 = vld [vmem:[%s6902_s26 + $0x10] sm:$0xff]  ;;  %s3932_s23 = sshll.u32 (%p3636_p13), %s4896_s30, 4  ;;  %s6987_s23 = int_to_ptr.vmem [resolvable:$true] %s3932_s23 }
 0xaf5   : >> { %v3687_v17 = vmul.f32 %v3679_v43, %v3655_v52  ;;  %v3686_v63 = vmul.f32 %v3678_v18, %v3654_v12  ;;  %v3683_v3 = vmul.f32 %v3675_v19, %v6874_v61  ;;  %v3682_v51 = vmul.f32 %v3674_v53, %v6880_v45  ;;  %v3743_v39 = vld [vmem:[%s6902_s26 + $0x30] sm:$0xff]  ;;  %s4452_s29 = scalar_lea.vmem (%p3636_p13), %s6987_s23, 1024  ;;  %p4459_p3 = scmp.lt.s32.totalorder (%p3636_p13), %s6987_s23, %s4457_s28 }
 0xaf6   : >> { %v3689_v11 = vmul.f32 %v3681_v8, %v3657_v24  ;;  %v3688_v23 = vmul.f32 %v3680_v31, %v6871_v1  ;;  %v3685_v42 = vmul.f32 %v3677_v57, %v6876_v55  ;;  %v3684_v5 = vmul.f32 %v3676_v54, %v6884_v9  ;;  %p4453_p0 = scmp.ne.s32.totalorder (%p3636_p13), %s6987_s23, %s4452_s29 }
 0xaf7   : >> { %v3695_v58 = vadd.f32 %v3687_v17, %v3655_v52  ;;  %v3694_v4 = vadd.f32 %v3686_v63, %v3654_v12  ;;  %v3691_v44 = vmul.f32 %v3683_v3, %v6874_v61  ;;  %v3690_v36 = vmul.f32 %v3682_v51, %v6880_v45  ;;  %v3740_v17 = vld [vmem:[%s6902_s26 + $0x8] sm:$0xff] }
 0xaf8   : >> { %v3697_v30 = vadd.f32 %v3689_v11, %v3657_v24  ;;  %v3696_v7 = vadd.f32 %v3688_v23, %v6871_v1  ;;  %v3693_v16 = vmul.f32 %v3685_v42, %v6876_v55  ;;  %v3692_v21 = vmul.f32 %v3684_v5, %v6884_v9  ;;  %v3742_v3 = vld [vmem:[%s6902_s26 + $0x28] sm:$0xff]  ;;  %p4454_p1 = pnand (%p3636_p13), %p4453_p0, %p4769_p5 }
 0xaf9   : >> { %v3703_v41 = vmul.f32 0.7978846, %v3695_v58  ;;  %v3702_v0 = vmul.f32 0.7978846, %v3694_v4  ;;  %v3699_v6 = vadd.f32 %v3691_v44, %v6874_v61  ;;  %v3698_v37 = vadd.f32 %v3690_v36, %v6880_v45  ;;  %v3745_v4 = vld [vmem:[%s6902_s26 + $0x50] sm:$0xff] }
 0xafa   : >> { %v3705_v15 = vmul.f32 0.7978846, %v3697_v30  ;;  %v3704_v29 = vmul.f32 0.7978846, %v3696_v7  ;;  %v3701_v49 = vadd.f32 %v3693_v16, %v6876_v55  ;;  %v3700_v25 = vadd.f32 %v3692_v21, %v6884_v9  ;;  %p4455_p2 = pneg (%p3636_p13), %p4454_p1 }
 0xafb   : >> { %4434 = vtanh.f32 %v3703_v41  ;;  %v3707_v20 = vmul.f32 0.7978846, %v3699_v6  ;;  %v3706_v33 = vmul.f32 0.7978846, %v3698_v37  ;;  %v3663_v40 = vmul.f32 0.5, %v3655_v52  ;;  %v3747_v41 = vld [vmem:[%s6902_s26 + $0x70] sm:$0xff] }
 0xafc   : >> { %4436 = vtanh.f32 %v3705_v15  ;;  %v3709_v48 = vmul.f32 0.7978846, %v3701_v49  ;;  %v3708_v60 = vmul.f32 0.7978846, %v3700_v25  ;;  %v3665_v62 = vmul.f32 0.5, %v3657_v24  ;;  %v3757_v25 = vld [vmem:[%s3756_s20] sm:$0xff] }
 0xafd   : >> { %4438 = vtanh.f32 %v3702_v0  ;;  %v3662_v26 = vmul.f32 0.5, %v3654_v12  ;;  %v3664_v14 = vmul.f32 0.5, %v6871_v1  ;;  %v3667_v24 = vmul.f32 0.5, %v6874_v61 }
 0xafe   : >> { %4440 = vtanh.f32 %v3704_v29  ;;  %v3669_v11 = vmul.f32 0.5, %v6876_v55  ;;  %v3666_v42 = vmul.f32 0.5, %v6880_v45  ;;  %v3668_v15 = vmul.f32 0.5, %v6884_v9  ;;  %v3744_v29 = vld [vmem:[%s6902_s26 + $0x48] sm:$0xff] }
 0xaff   : >> { %4442 = vtanh.f32 %v3707_v20  ;;  %v3746_v20 = vld [vmem:[%s6902_s26 + $0x68] sm:$0xff] }
 0xb00   : >> { %4444 = vtanh.f32 %v3709_v48 }
 0xb01   : >> { %4446 = vtanh.f32 %v3706_v33  ;;  %v3759_v33 = vld [vmem:[%s3756_s20 + $0x10] sm:$0xff] }
 0xb02   : >> { %4448 = vtanh.f32 %v3708_v60  ;;  %v3758_v60 = vld [vmem:[%s3756_s20 + $0x8] sm:$0xff] }
 0xb05   : >> { %v4435_v46 = vpop.eup %4434 }
 0xb06   : >> { %v4437_v35 = vpop.eup %4436  ;;  %v3719_v28 = vadd.f32 1.0, %v4435_v46 }
 0xb07   : >> { %v4439_v10 = vpop.eup %4438  ;;  %v3721_v47 = vadd.f32 1.0, %v4437_v35 }
 0xb08   : >> { %v4441_v43 = vpop.eup %4440  ;;  %v3727_v8 = vmul.f32 %v3719_v28, %v3663_v40  ;;  %v3718_v52 = vadd.f32 1.0, %v4439_v10  ;;  %v3760_v40 = vld [vmem:[%s3756_s20 + $0x18] sm:$0xff]  ;;  %s4121_s20 = sshll.u32 (%p3636_p13), %s4752_s25, 10  ;;  %s7237_s25 = sand.u32 (%p3636_p13), 1, %s4550_s22  }
 0xb09   : >> { %v4443_v18 = vpop.eup %4442  ;;  %v3729_v12 = vmul.f32 %v3721_v47, %v3665_v62  ;;  %v3720_v19 = vadd.f32 1.0, %v4441_v43  ;;  %s6985_s2 = scalar_lea.hbm (%p3636_p13), %s7052_s16, %s4121_s20  ;;  %s6995_s26 = scalar_lea.sflag (%p3636_p13), [#allocation5], %s7237_s25 }
 0xb0a   : >> { %v4445_v31 = vpop.eup %4444  ;;  %v3749_v63 = vmul.f32 %v3741_v56, %v3727_v8  ;;  %v3726_v57 = vmul.f32 %v3718_v52, %v3662_v26  ;;  %v3723_v58 = vadd.f32 1.0, %v4443_v18  ;;  %s4458_s20 = scalar_lea.vmem (%p3636_p13), %s4457_s28, 2048 }
 0xb0b   : >> { %v3751_v1 = vmul.f32 %v3743_v39, %v3729_v12  ;;  %v3728_v30 = vmul.f32 %v3720_v19, %v3664_v14  ;;  %v3725_v23 = vadd.f32 1.0, %v4445_v31  ;;  %v4447_v61 = vpop.eup %4446  ;;  %v3880_v12 = vld [vmem:[%s7050_s14 + $0x10] sm:$0xff] (%p3636_p13)  ;;  %v3878_v19 = vld [vmem:[%s7050_s14] sm:$0xff] (%p3636_p13)  ;;  %p4460_p4 = scmp.lt.s32.totalorder (%p3636_p13), %s4458_s20, %s4452_s29 }
 0xb0c   : >> { %v3748_v44 = vmul.f32 %v3740_v17, %v3726_v57  ;;  %v3731_v53 = vmul.f32 %v3723_v58, %v3667_v24  ;;  %v4449_v55 = vpop.eup %4448  ;;  %v3722_v16 = vadd.f32 1.0, %v4447_v61  ;;  %v3881_v17 = vld [vmem:[%s7050_s14 + $0x18] sm:$0xff] (%p3636_p13) }
 0xb0d   : >> { %v4162_v7 = vpack.c.bf16 %v3751_v1, %v3749_v63  ;;  %v3750_v54 = vmul.f32 %v3742_v3, %v3728_v30  ;;  %v3733_v0 = vmul.f32 %v3725_v23, %v3669_v11  ;;  %v3724_v51 = vadd.f32 1.0, %v4449_v55  ;;  %v7232_v11 = vld [vmem:[#allocation20_spill] sm:$0xff] (%p3636_p13)  ;;  %v7234_v1 = vld [vmem:[#allocation25_spill] sm:$0xff] (%p3636_p13)  ;;  %v7235_v23 = vld [vmem:[#allocation19_spill] sm:$0xff] (%p3636_p13)  ;;  %p4461_p7 = por (%p3636_p13), %p4460_p4, %p4459_p3 }
 0xb0e   : >> { %v3753_v6 = vmul.f32 %v3745_v4, %v3731_v53  ;;  %v3730_v49 = vmul.f32 %v3722_v16, %v3666_v42  ;;  %v7233_v3 = vld [vmem:[#allocation24_spill] sm:$0xff] (%p3636_p13)  ;;  %v7236_v42 = vld [vmem:[#allocation21_spill] sm:$0xff] (%p3636_p13) }
 0xb0f   : >> { %4163 = vmatprep.subr.bf16.mxu0 %v4162_v7  ;;  %4182 = vmatprep.subr.bf16.mxu1 %v4162_v7  ;;  %v4164_v5 = vpack.c.bf16 %v3750_v54, %v3748_v44  ;;  %v3755_v45 = vmul.f32 %v3747_v41, %v3733_v0  ;;  %v3732_v36 = vmul.f32 %v3724_v51, %v3668_v15  ;;  %p4462_p8 = pnand (%p3636_p13), %p4461_p7, %p4455_p2 }
 0xb10   : >> { %v3752_v9 = vmul.f32 %v3744_v29, %v3730_v49 }
 0xb11   : >> { %4165 = vmatpush1.bf16.msra.mxu0 %v4164_v5  ;;  %4184 = vmatpush1.bf16.msra.mxu1 %v4164_v5  ;;  %v4166_v21 = vpack.c.bf16 %v3755_v45, %v3753_v6  ;;  %v3754_v48 = vmul.f32 %v3746_v20, %v3732_v36 }
 0xb13   : >> { %4167 = vmatprep.subr.bf16.mxu0 %v4166_v21  ;;  %4183 = vmatprep.subr.bf16.mxu1 %v4166_v21  ;;  %v4168_v37 = vpack.c.bf16 %v3754_v48, %v3752_v9 }
 0xb15   : >> { %4169 = vmatpush1.bf16.msra.mxu0 %v4168_v37  ;;  %4185 = vmatpush1.bf16.msra.mxu1 %v4168_v37 }
 0xb18   : >> { %4107 = vmatmul.mubr.msk.f32.vlgmr.msra.gmra.mrb[0].mxu0 %vm690_vm0, %v3757_v25  ;;  %4109 = vmatmul.mubr.msk.f32.vlgmr.msra.gmra.mrb[0].mxu1 %vm690_vm0, %v3759_v33 }
 0xb19   : >> { %3843 = vmatprep.mubr.f32.mxu0 %v4642_v2  ;;  %3855 = vmatprep.mubr.f32.mxu1 %v4642_v2 }
 0xb1c   : >> { %4108 = vmatmul.mubr.msk.f32.gmra.mrb[2].mxu0 %vm690_vm0, %v3758_v60  ;;  %4110 = vmatmul.mubr.msk.f32.gmra.mrb[2].mxu1 %vm690_vm0, %v3760_v40 }
 0xbeb   : >> { %v3839_v46 = vpop.f32.mrb[0].mxu0  ;;  %v3851_v62 = vpop.f32.mrb[0].mxu1 }
 0xbec   : >> { %v3862_v35 = vadd.f32 %v4598_v13, %v3839_v46   ;;  %v3866_v28 = vadd.f32 %v4582_v27, %v3851_v62   ;;  %v3841_v26 = vpop.f32.mrb[1].mxu0  ;;  %v3853_v10 = vpop.f32.mrb[1].mxu1 }
 0xbed   : >> { %v3863_v47 = vadd.f32 %v4594_v38, %v3841_v26   ;;  %v3867_v56 = vadd.f32 %v4578_v50, %v3853_v10   ;;  %3638 = sbr.rel (!%p3636_p13) target bundleno = 2794 (0xaea), region = 189 }
 0xbee   : >> { %v7223_v27 = vmov %v3866_v28  ;;  %v7227_v13 = vmov %v3862_v35 }
 0xbef   : >> { %v3845_v14 = vpop.f32.mrb[2].mxu0  ;;  %v3857_v2 = vpop.f32.mrb[2].mxu1  ;;  %v7222_v50 = vmov %v3867_v56  ;;  %v7226_v38 = vmov %v3863_v47  ;;  %v7228_v13 = vmov (%p3636_p13), 0   ;;  %v7230_v27 = vld [vmem:[#allocation23_spill] sm:$0xff] (%p3636_p13)  ;;  %v3871_v31 = vadd.f32 (%p3636_p13), %v3863_v47, %v7232_v11 }
 0xbf0   : >> { %v3864_v43 = vadd.f32 %v4590_v22, %v3845_v14   ;;  %v3868_v8 = vadd.f32 %v4574_v59, %v3857_v2   ;;  %v3847_v39 = vpop.f32.mrb[3].mxu0  ;;  %v3859_v52 = vpop.f32.mrb[3].mxu1  ;;  %4451 = vset.pattern.permute.xlu1 (%p3636_p13), %v7228_v13  ;;  %4450 = vset.pattern.permute.xlu0 (%p3636_p13), %v7228_v13 }
 0xbf1   : >> { %v3865_v24 = vadd.f32 %v4586_v34, %v3847_v39   ;;  %v3869_v18 = vadd.f32 %v4570_v32, %v3859_v52   ;;  %3894 = vperm.xlu1 (%p3636_p13), %4451, %v3880_v12   ;;  %3884 = vperm.xlu0 (%p3636_p13), %4450, %v3878_v19  }
 0xbf2   : >> { %v7221_v59 = vmov %v3868_v8  ;;  %v7225_v22 = vmov %v3864_v43  ;;  %v3876_v58 = vadd.f32 (%p3636_p13), %v3868_v8, %v7233_v3  ;;  %v3872_v4 = vadd.f32 (%p3636_p13), %v3864_v43, %v7235_v23 }
 0xbf3   : >> { %v7220_v32 = vmov %v3869_v18  ;;  %v7224_v34 = vmov %v3865_v24  ;;  %v7229_v59 = vld [vmem:[#allocation22_spill] sm:$0xff] (%p3636_p13)  ;;  %v3877_v30 = vadd.f32 (%p3636_p13), %v3869_v18, %v7234_v1  ;;  %v3873_v61 = vadd.f32 (%p3636_p13), %v3865_v24, %v7236_v42 }
 0xbf4   : > { %v3879_v32 = vld [vmem:[%s7050_s14 + $0x8] sm:$0xff]  ;;  %v3874_v50 = vadd.f32 %v3866_v28, %v7229_v59  ;;  %v3875_v34 = vadd.f32 %v3867_v56, %v7230_v27  ;;  %v7231_v22 = vld [vmem:[#allocation18_spill] sm:$0xff] }
 0xbf5   : > { %3899 = vperm.xlu1 %4451, %v3881_v17   ;;  %3889 = vperm.xlu0 %4450, %v3879_v32   ;;  %v3870_v38 = vadd.f32 %v3862_v35, %v7231_v22 }
 0xc70   : > { %v3895_v63 = vpop.permute.xlu1 %3894  ;;  %v3885_v57 = vpop.permute.xlu0 %3884 }
 0xc71   : > { %v3906_v44 = vadd.f32 %v3895_v63, %v3874_v50  ;;  %v3907_v53 = vadd.f32 %v3895_v63, %v3875_v34  ;;  %v3902_v41 = vadd.f32 %v3885_v57, %v3870_v38  ;;  %v3903_v15 = vadd.f32 %v3885_v57, %v3871_v31 }
 0xc73   : > { %3914 = vst [vmem:[%s4896_s30 + $0x20] sm:$0xff] %v3906_v44  ;;  %3915 = vst [vmem:[%s4896_s30 + $0x28] sm:$0xff] %v3907_v53 }
 0xc74   : > { %3910 = vst [vmem:[%s4896_s30] sm:$0xff] %v3902_v41  ;;  %3911 = vst [vmem:[%s4896_s30 + $0x8] sm:$0xff] %v3903_v15  ;;  %v3900_v55 = vpop.permute.xlu1 %3899  ;;  %v3890_v7 = vpop.permute.xlu0 %3889 }
 0xc75   : > { %v3908_v54 = vadd.f32 %v3900_v55, %v3876_v58  ;;  %v3909_v0 = vadd.f32 %v3900_v55, %v3877_v30  ;;  %v3904_v16 = vadd.f32 %v3890_v7, %v3872_v4  ;;  %v3905_v6 = vadd.f32 %v3890_v7, %v3873_v61 }
 0xc77   : > { %3916 = vst [vmem:[%s4896_s30 + $0x30] sm:$0xff] %v3908_v54  ;;  %3917 = vst [vmem:[%s4896_s30 + $0x38] sm:$0xff] %v3909_v0 }
 0xc78   : > { %3912 = vst [vmem:[%s4896_s30 + $0x10] sm:$0xff] %v3904_v16  ;;  %3913 = vst [vmem:[%s4896_s30 + $0x18] sm:$0xff] %v3905_v6 }
 0xc79   : > { %4465 = shalt.err (!%p4462_p8)
}
 0xc7a   : > { %s4466_s30 = scalar_lea.hbm %s6985_s2, 1024  ;;  %s4470_s25 = scalar_lea.hbm %s7052_s16, 2048 }
 0xc7b   : > { %p4467_p9 = scmp.ne.s32.totalorder %s6985_s2, %s4466_s30  ;;  %p4471_p12 = scmp.lt.u32.totalorder %s6985_s2, %s7052_s16 }
 0xc7c   : > { %p4472_p13 = scmp.lt.u32.totalorder %s4470_s25, %s4466_s30  ;;  %p4474_p1 = scmp.lt.u32.totalorder %s4466_s30, %s6985_s2 }
 0xc7d   : > { %p4468_p10 = pnand %p4467_p9, %p4769_p5 }
 0xc7e   : > { %p4473_p0 = por %p4472_p13, %p4471_p12 }
 0xc7f   : > { %p4469_p11 = pneg %p4468_p10 }
 0xc80   : > { %p4475_p2 = por %p4474_p1, %p4473_p0 }
 0xc82   : > { %p4476_p3 = pnand %p4475_p2, %p4469_p11 }
 0xc84   : > { %4479 = shalt.err (!%p4476_p3)
}
 0xc85   : > { %s4644_s29 = smov 256   ;;  %s4645_s20 = smov 16  }
 0xc86   : > { %4186 = dma.vmem_to_hbm [thread:$0]  (%p4769_p5), %s6987_s23, 1024, %s6985_s2, %s6995_s26, %s4644_s29, %s4644_s29, %s4645_s20  }
 0xc87 PF: > { %p4192_p4 = scmp.ge.s32.totalorder %s4558_s24, 2  ;;  %s3947_s27 = sand.u32 1, %s4546_s21  }
 0xc88   : > { %s3948_s30 = scalar_lea.sflag [#allocation5], %s3947_s27 }
 0xc89   : > { %p4189_p7 = pnand %p4192_p4, %p4773_p6 }
 0xc8b   : > { %4541 = dma.done.wait (!%p4189_p7), %s3948_s30, 1024  }
 0xc8c   : > { %4543 = vsyncadd (!%p4189_p7), %s3948_s30, 4294966272  ;;  %s7238_s24 = sld [smem:[#allocation8_spill]]  ;;  %s7239_s19 = sld [smem:[#allocation7_spill]] }
 0xc8d   : > { %s7240_s23 = sld [smem:[#allocation9_spill]]  ;;  %s7241_s21 = smov %s4550_s22 }
 0xc92   : > { %p26_p8 = scmp.ge.s32.totalorder %s7238_s24, 4   ;;  %s7242_s22 = smov %s7239_s19 }
 0xc94   :  { %28 = sbr.rel (!%p26_p8) target bundleno = 6 (0x6), region = 200 }
 0xc9b   :  { %3953 = vsyncpa [#allocation5], 1 }
 0xc9c   :  { %3955 = vsyncpa [#allocation5 + $0x1], 1 }

</bundles_post_ra>
